<compile_context>
chip_gen: v6e
topology: v6e:2x2x1
jax: 0.10.0
libtpu: 0.0.40
codegen_flags: <defaults>
</compile_context>

<pallas_src>
import functools

import jax
import jax.numpy as jnp
from jax.experimental import pallas as pl
from jax.experimental.pallas import tpu as pltpu

LEAKY_SLOPE = 0.2          # nn.LeakyReLU(0.2)
IN_EPS = 1e-5              # nn.InstanceNorm3d default eps
_TM_MAX, _TK_MAX, _TN_MAX = 512, 512, 256


# --------------------------------------------------------------------------
# Pallas tiled matmul kernel with fused bias (+ optional LeakyReLU) epilogue
# --------------------------------------------------------------------------
def _matmul_kernel(a_ref, b_ref, bias_ref, o_ref, *, act_slope):
    k = pl.program_id(2)

    @pl.when(k == 0)
    def _():
        o_ref[...] = jnp.zeros_like(o_ref)

    # bf16 operands, f32 accumulation directly into the revisited output block.
    o_ref[...] += jnp.dot(a_ref[...], b_ref[...], preferred_element_type=jnp.float32)

    @pl.when(k == pl.num_programs(2) - 1)
    def _():
        y = o_ref[...] + bias_ref[...]
        if act_slope is not None:
            y = jnp.where(y >= 0, y, act_slope * y)
        o_ref[...] = y


def _round_up(x, m):
    return (x + m - 1) // m * m


def _pick_m_tile(m):
    """Adaptive M tiling: single tile when small, otherwise a large low-waste tile."""
    mp = _round_up(m, 16)                      # bf16 sublane-friendly
    if mp <= _TM_MAX:
        return mp, mp
    best = None
    for t in (512, 448, 384, 320, 256, 192, 128):
        p = _round_up(mp, t)
        key = (p, -t)                          # minimize padding, prefer larger tiles
        if best is None or key < best[0]:
            best = (key, p, t)
    return best[1], best[2]


def _pick_lane_tile(dim, max_tile):
    p = _round_up(dim, 128)
    if p <= max_tile:
        return p, p
    return _round_up(p, max_tile), max_tile


def _pad2(x, rows, cols):
    return jnp.pad(x, ((0, rows - x.shape[0]), (0, cols - x.shape[1])))


def pallas_matmul_bias_act(a, b, bias, *, act_slope=None):
    """(M, K) @ (K, N) + bias [-> LeakyReLU], f32 out, bf16 MXU operands."""
    M, K = a.shape
    K2, N = b.shape
    assert K == K2 and bias.shape == (N,)

    Mp, TM = _pick_m_tile(M)
    Kp, TK = _pick_lane_tile(K, _TK_MAX)
    Np, TN = _pick_lane_tile(N, _TN_MAX)

    ap = _pad2(a.astype(jnp.bfloat16), Mp, Kp)
    bp = _pad2(b.astype(jnp.bfloat16), Kp, Np)
    biasp = _pad2(bias.astype(jnp.float32)[None, :], 1, Np)

    out = pl.pallas_call(
        functools.partial(_matmul_kernel, act_slope=act_slope),
        out_shape=jax.ShapeDtypeStruct((Mp, Np), jnp.float32),
        grid=(Mp // TM, Np // TN, Kp // TK),
        in_specs=[pl.BlockSpec((TM, TK), lambda i, j, k: (i, k)),
                  pl.BlockSpec((TK, TN), lambda i, j, k: (k, j)),
                  pl.BlockSpec((1, TN), lambda i, j, k: (0, j))],
        out_specs=pl.BlockSpec((TM, TN), lambda i, j, k: (i, j)),
        compiler_params=pltpu.CompilerParams(
            dimension_semantics=("parallel", "parallel", "arbitrary")),
    )(ap, bp, biasp)
    return out[:M, :N]


# --------------------------------------------------------------------------
# Fused InstanceNorm3d (affine=False) + LeakyReLU(0.2) — channels-last, no transposes
# --------------------------------------------------------------------------
def _inorm_lrelu_kernel(x_ref, o_ref, *, eps, slope):
    x = x_ref[...]                                            # (1, S, C), C on lanes
    m = jnp.mean(x, axis=1, keepdims=True)                    # per-channel mean
    v = jnp.mean(jnp.square(x - m), axis=1, keepdims=True)    # per-channel var
    y = (x - m) * jax.lax.rsqrt(v + eps)
    o_ref[...] = jnp.where(y >= 0, y, slope * y)


def instance_norm_leaky_relu(x, *, eps=IN_EPS, slope=LEAKY_SLOPE):
    """x: (B, D, H, W, C) f32. Per-(b, c) normalization over spatial, then LeakyReLU."""
    B, D, H, W, C = x.shape
    S = D * H * W
    xr = x.reshape(B, S, C)
    y = pl.pallas_call(
        functools.partial(_inorm_lrelu_kernel, eps=eps, slope=slope),
        out_shape=jax.ShapeDtypeStruct((B, S, C), jnp.float32),
        grid=(B,),
        in_specs=[pl.BlockSpec((1, S, C), lambda i: (i, 0, 0))],
        out_specs=pl.BlockSpec((1, S, C), lambda i: (i, 0, 0)),
        compiler_params=pltpu.CompilerParams(dimension_semantics=("parallel",)),
    )(xr)
    return y.reshape(B, D, H, W, C)


# --------------------------------------------------------------------------
# Conv3d = im2col (glue) + Pallas matmul with fused epilogue
# --------------------------------------------------------------------------
def conv3d(x, w, b, *, k, stride, padding, act_slope=None):
    """x: (B, D, H, W, Cin) channels-last f32; w: (k^3*Cin, Cout); b: (Cout,)."""
    B, D, H, W, C = x.shape
    cout = w.shape[1]
    assert w.shape[0] == (k ** 3) * C

    xp = jnp.pad(x, ((0, 0), (padding, padding), (padding, padding),
                     (padding, padding), (0, 0)))
    Dp, Hp, Wp = xp.shape[1], xp.shape[2], xp.shape[3]
    Do, Ho, Wo = (Dp - k) // stride + 1, (Hp - k) // stride + 1, (Wp - k) // stride + 1

    # TODO(synk): patch matrix is materialized in HBM (fine at these small shapes); a
    # fully in-kernel k^3-shifted-view accumulation would avoid it for large volumes.
    taps = []
    for a in range(k):
        for bb in range(k):
            for cc in range(k):
                taps.append(xp[:, a:a + (Do - 1) * stride + 1:stride,
                                  bb:bb + (Ho - 1) * stride + 1:stride,
                                  cc:cc + (Wo - 1) * stride + 1:stride, :])
    pm = jnp.stack(taps, axis=4).reshape(B * Do * Ho * Wo, (k ** 3) * C)
    y = pallas_matmul_bias_act(pm, w, b, act_slope=act_slope)
    return y.reshape(B, Do, Ho, Wo, cout)


def init_conv(key, cin, cout, k):
    kw, kb = jax.random.split(key)
    w = 0.02 * jax.random.normal(kw, (k, k, k, cin, cout), jnp.float32)
    b = 0.02 * jax.random.normal(kb, (cout,), jnp.float32)
    return {'w': w.reshape(k ** 3 * cin, cout), 'b': b}


# --------------------------------------------------------------------------
# PatchGANDiscriminator
# --------------------------------------------------------------------------
def make_patchgan(key, in_channels, num_filters=64, num_layers=3, strides=None):
    if strides is None:
        strides = [2] * (num_layers - 2) + [1, 1]
    keys = jax.random.split(key, num_layers)
    params = {
        'first': init_conv(keys[0], in_channels, num_filters, 4),
        'mid': [init_conv(keys[i], num_filters * 2 ** (i - 1), num_filters * 2 ** i, 4)
                for i in range(1, num_layers - 1)],
        'last': init_conv(keys[num_layers - 1], num_filters * 2 ** (num_layers - 2), 1, 4),
    }
    mid_strides = strides[1:num_layers - 1]
    s_first, s_last = strides[0], strides[-1]

    def apply(pp, x_ncdhw):
        x = jnp.transpose(x_ncdhw, (0, 2, 3, 4, 1))            # NCDHW -> NDHWC
        # Conv + LeakyReLU(0.2) fused into the matmul epilogue.
        y = conv3d(x, pp['first']['w'], pp['first']['b'], k=4, stride=s_first,
                   padding=1, act_slope=LEAKY_SLOPE)
        for cp, ms in zip(pp['mid'], mid_strides):
            y = conv3d(y, cp['w'], cp['b'], k=4, stride=ms, padding=1)   # bias fused
            y = instance_norm_leaky_relu(y)                              # IN + LeakyReLU
        y = conv3d(y, pp['last']['w'], pp['last']['b'], k=4, stride=s_last, padding=1)
        return jnp.transpose(y, (0, 4, 1, 2, 3))               # NDHWC -> NCDHW

    return params, apply


if __name__ == "__main__":
    key = jax.random.PRNGKey(0)
    kp, kx = jax.random.split(key)

    B, C_IN, S = 2, 1, 16
    params, apply_fn = make_patchgan(kp, C_IN, num_filters=64, num_layers=3)

    x = jax.random.normal(kx, (B, C_IN, S, S, S), jnp.float32)

    fwd = jax.jit(apply_fn)
    out = fwd(params, x)
    out = jax.block_until_ready(out)

    # 16 -> (k4,s2,p1) 8 -> (k4,s1,p1) 7 -> (k4,s1,p1) 6
    assert out.shape == (B, 1, 6, 6, 6), out.shape
    assert bool(jnp.all(jnp.isfinite(out)))
    print("KERNEL_OK")
</pallas_src>

<mosaic_0001>
module attributes {stable_mosaic.version = 11 : i64} {
  func.func @_matmul_kernel(%arg0: i32, %arg1: i32, %arg2: i32, %arg3: memref<512x128xbf16, #tpu.memory_space<vmem>>, %arg4: memref<128x128xbf16, #tpu.memory_space<vmem>>, %arg5: memref<1x128xf32, #tpu.memory_space<vmem>>, %arg6: memref<512x128xf32, #tpu.memory_space<vmem>>) attributes {dimension_semantics = [#tpu.dimension_semantics<parallel>, #tpu.dimension_semantics<parallel>, #tpu.dimension_semantics<arbitrary>], iteration_bounds = array<i64: 2, 1, 1>, scalar_prefetch = 0 : i64, scratch_operands = 0 : i64, tpu.core_type = #tpu.core_type<tc>, window_params = [{transform_indices = @transform_0, window_bounds = array<i64: 512, 128>}, {transform_indices = @transform_1, window_bounds = array<i64: 128, 128>}, {transform_indices = @transform_2, window_bounds = array<i64: 1, 128>}, {transform_indices = @transform_3, window_bounds = array<i64: 512, 128>}]} {
    %c0_i32 = arith.constant 0 : i32
    %0 = arith.cmpi eq, %arg2, %c0_i32 : i32
    %1 = arith.extui %0 : i1 to i32
    %c0_i32_0 = arith.constant 0 : i32
    %2 = arith.cmpi ne, %1, %c0_i32_0 : i32
    scf.if %2 {
      %cst_10 = arith.constant 0.000000e+00 : f32
      %12 = vector.broadcast %cst_10 : f32 to vector<512x128xf32>
      %c0_11 = arith.constant 0 : index
      %c0_12 = arith.constant 0 : index
      %13 = vector.load %arg6[%c0_11, %c0_12] : memref<512x128xf32, #tpu.memory_space<vmem>>, vector<512x128xf32>
      tpu.vector_store %arg6[%c0_11, %c0_12], %12 {strides = array<i32>} : memref<512x128xf32, #tpu.memory_space<vmem>>, vector<512x128xf32>,
    } else {
    }
    %c0 = arith.constant 0 : index
    %c0_1 = arith.constant 0 : index
    %3 = vector.load %arg6[%c0, %c0_1] : memref<512x128xf32, #tpu.memory_space<vmem>>, vector<512x128xf32>
    %c0_2 = arith.constant 0 : index
    %c0_3 = arith.constant 0 : index
    %4 = vector.load %arg3[%c0_2, %c0_3] : memref<512x128xbf16, #tpu.memory_space<vmem>>, vector<512x128xbf16>
    %c0_4 = arith.constant 0 : index
    %c0_5 = arith.constant 0 : index
    %5 = vector.load %arg4[%c0_4, %c0_5] : memref<128x128xbf16, #tpu.memory_space<vmem>>, vector<128x128xbf16>
    %cst = arith.constant dense<0.000000e+00> : vector<512x128xf32>
    %6 = tpu.matmul %4, %5, %cst {dimension_numbers = #tpu.dot_dimension_numbers<[1], [0], [0], [1], [0, 0, 1, 1], [], []>} : vector<512x128xbf16>, vector<128x128xbf16>, vector<512x128xf32> -> vector<512x128xf32>
    %7 = arith.addf %3, %6 : vector<512x128xf32>
    %c0_6 = arith.constant 0 : index
    %c0_7 = arith.constant 0 : index
    %8 = vector.load %arg6[%c0_6, %c0_7] : memref<512x128xf32, #tpu.memory_space<vmem>>, vector<512x128xf32>
    tpu.vector_store %arg6[%c0_6, %c0_7], %7 {strides = array<i32>} : memref<512x128xf32, #tpu.memory_space<vmem>>, vector<512x128xf32>,
    %c0_i32_8 = arith.constant 0 : i32
    %9 = arith.cmpi eq, %arg2, %c0_i32_8 : i32
    %10 = arith.extui %9 : i1 to i32
    %c0_i32_9 = arith.constant 0 : i32
    %11 = arith.cmpi ne, %10, %c0_i32_9 : i32
    scf.if %11 {
      %c0_10 = arith.constant 0 : index
      %c0_11 = arith.constant 0 : index
      %12 = vector.load %arg6[%c0_10, %c0_11] : memref<512x128xf32, #tpu.memory_space<vmem>>, vector<512x128xf32>
      %c0_12 = arith.constant 0 : index
      %c0_13 = arith.constant 0 : index
      %13 = vector.load %arg5[%c0_12, %c0_13] : memref<1x128xf32, #tpu.memory_space<vmem>>, vector<1x128xf32>
      %14 = vector.broadcast %13 : vector<1x128xf32> to vector<512x128xf32>
      %15 = arith.addf %12, %14 : vector<512x128xf32>
      %cst_14 = arith.constant 0.000000e+00 : f32
      %16 = vector.broadcast %cst_14 : f32 to vector<512x128xf32>
      %17 = arith.cmpf oge, %15, %16 : vector<512x128xf32>
      %cst_15 = arith.constant 2.000000e-01 : f32
      %18 = vector.broadcast %cst_15 : f32 to vector<512x128xf32>
      %19 = arith.mulf %18, %15 : vector<512x128xf32>
      %20 = arith.select %17, %15, %19 : vector<512x128xi1>, vector<512x128xf32>
      %c0_16 = arith.constant 0 : index
      %c0_17 = arith.constant 0 : index
      %21 = vector.load %arg6[%c0_16, %c0_17] : memref<512x128xf32, #tpu.memory_space<vmem>>, vector<512x128xf32>
      tpu.vector_store %arg6[%c0_16, %c0_17], %20 {strides = array<i32>} : memref<512x128xf32, #tpu.memory_space<vmem>>, vector<512x128xf32>,
    } else {
    }
    return
  }
  func.func @transform_0(%arg0: i32, %arg1: i32, %arg2: i32) -> (i32, i32) {
    %c0_i32 = arith.constant 0 : i32
    return %arg0, %arg2 : i32, i32
  }
  func.func @transform_1(%arg0: i32, %arg1: i32, %arg2: i32) -> (i32, i32) {
    %c0_i32 = arith.constant 0 : i32
    return %arg2, %arg1 : i32, i32
  }
  func.func @transform_2(%arg0: i32, %arg1: i32, %arg2: i32) -> (i32, i32) {
    %c0_i32 = arith.constant 0 : i32
    %c0_i32_0 = arith.constant 0 : i32
    return %c0_i32, %arg1 : i32, i32
  }
  func.func @transform_3(%arg0: i32, %arg1: i32, %arg2: i32) -> (i32, i32) {
    %c0_i32 = arith.constant 0 : i32
    return %arg0, %arg1 : i32, i32
  }
}

module attributes {stable_mosaic.version = 11 : i64} {
  func.func @_matmul_kernel(%arg0: i32, %arg1: i32, %arg2: i32, %arg3: memref<384x512xbf16, #tpu.memory_space<vmem>>, %arg4: memref<512x128xbf16, #tpu.memory_space<vmem>>, %arg5: memref<1x128xf32, #tpu.memory_space<vmem>>, %arg6: memref<384x128xf32, #tpu.memory_space<vmem>>) attributes {dimension_semantics = [#tpu.dimension_semantics<parallel>, #tpu.dimension_semantics<parallel>, #tpu.dimension_semantics<arbitrary>], iteration_bounds = array<i64: 2, 1, 8>, scalar_prefetch = 0 : i64, scratch_operands = 0 : i64, tpu.core_type = #tpu.core_type<tc>, window_params = [{transform_indices = @transform_0, window_bounds = array<i64: 384, 512>}, {transform_indices = @transform_1, window_bounds = array<i64: 512, 128>}, {transform_indices = @transform_2, window_bounds = array<i64: 1, 128>}, {transform_indices = @transform_3, window_bounds = array<i64: 384, 128>}]} {
    %c0_i32 = arith.constant 0 : i32
    %0 = arith.cmpi eq, %arg2, %c0_i32 : i32
    %1 = arith.extui %0 : i1 to i32
    %c0_i32_0 = arith.constant 0 : i32
    %2 = arith.cmpi ne, %1, %c0_i32_0 : i32
    scf.if %2 {
      %cst_9 = arith.constant 0.000000e+00 : f32
      %12 = vector.broadcast %cst_9 : f32 to vector<384x128xf32>
      %c0_10 = arith.constant 0 : index
      %c0_11 = arith.constant 0 : index
      %13 = vector.load %arg6[%c0_10, %c0_11] : memref<384x128xf32, #tpu.memory_space<vmem>>, vector<384x128xf32>
      tpu.vector_store %arg6[%c0_10, %c0_11], %12 {strides = array<i32>} : memref<384x128xf32, #tpu.memory_space<vmem>>, vector<384x128xf32>,
    } else {
    }
    %c0 = arith.constant 0 : index
    %c0_1 = arith.constant 0 : index
    %3 = vector.load %arg6[%c0, %c0_1] : memref<384x128xf32, #tpu.memory_space<vmem>>, vector<384x128xf32>
    %c0_2 = arith.constant 0 : index
    %c0_3 = arith.constant 0 : index
    %4 = vector.load %arg3[%c0_2, %c0_3] : memref<384x512xbf16, #tpu.memory_space<vmem>>, vector<384x512xbf16>
    %c0_4 = arith.constant 0 : index
    %c0_5 = arith.constant 0 : index
    %5 = vector.load %arg4[%c0_4, %c0_5] : memref<512x128xbf16, #tpu.memory_space<vmem>>, vector<512x128xbf16>
    %cst = arith.constant dense<0.000000e+00> : vector<384x128xf32>
    %6 = tpu.matmul %4, %5, %cst {dimension_numbers = #tpu.dot_dimension_numbers<[1], [0], [0], [1], [0, 0, 1, 1], [], []>} : vector<384x512xbf16>, vector<512x128xbf16>, vector<384x128xf32> -> vector<384x128xf32>
    %7 = arith.addf %3, %6 : vector<384x128xf32>
    %c0_6 = arith.constant 0 : index
    %c0_7 = arith.constant 0 : index
    %8 = vector.load %arg6[%c0_6, %c0_7] : memref<384x128xf32, #tpu.memory_space<vmem>>, vector<384x128xf32>
    tpu.vector_store %arg6[%c0_6, %c0_7], %7 {strides = array<i32>} : memref<384x128xf32, #tpu.memory_space<vmem>>, vector<384x128xf32>,
    %c7_i32 = arith.constant 7 : i32
    %9 = arith.cmpi eq, %arg2, %c7_i32 : i32
    %10 = arith.extui %9 : i1 to i32
    %c0_i32_8 = arith.constant 0 : i32
    %11 = arith.cmpi ne, %10, %c0_i32_8 : i32
    scf.if %11 {
      %c0_9 = arith.constant 0 : index
      %c0_10 = arith.constant 0 : index
      %12 = vector.load %arg6[%c0_9, %c0_10] : memref<384x128xf32, #tpu.memory_space<vmem>>, vector<384x128xf32>
      %c0_11 = arith.constant 0 : index
      %c0_12 = arith.constant 0 : index
      %13 = vector.load %arg5[%c0_11, %c0_12] : memref<1x128xf32, #tpu.memory_space<vmem>>, vector<1x128xf32>
      %14 = vector.broadcast %13 : vector<1x128xf32> to vector<384x128xf32>
      %15 = arith.addf %12, %14 : vector<384x128xf32>
      %c0_13 = arith.constant 0 : index
      %c0_14 = arith.constant 0 : index
      %16 = vector.load %arg6[%c0_13, %c0_14] : memref<384x128xf32, #tpu.memory_space<vmem>>, vector<384x128xf32>
      tpu.vector_store %arg6[%c0_13, %c0_14], %15 {strides = array<i32>} : memref<384x128xf32, #tpu.memory_space<vmem>>, vector<384x128xf32>,
    } else {
    }
    return
  }
  func.func @transform_0(%arg0: i32, %arg1: i32, %arg2: i32) -> (i32, i32) {
    %c0_i32 = arith.constant 0 : i32
    return %arg0, %arg2 : i32, i32
  }
  func.func @transform_1(%arg0: i32, %arg1: i32, %arg2: i32) -> (i32, i32) {
    %c0_i32 = arith.constant 0 : i32
    return %arg2, %arg1 : i32, i32
  }
  func.func @transform_2(%arg0: i32, %arg1: i32, %arg2: i32) -> (i32, i32) {
    %c0_i32 = arith.constant 0 : i32
    %c0_i32_0 = arith.constant 0 : i32
    return %c0_i32, %arg1 : i32, i32
  }
  func.func @transform_3(%arg0: i32, %arg1: i32, %arg2: i32) -> (i32, i32) {
    %c0_i32 = arith.constant 0 : i32
    return %arg0, %arg1 : i32, i32
  }
}

module attributes {stable_mosaic.version = 11 : i64} {
  func.func @_inorm_lrelu_kernel(%arg0: i32, %arg1: memref<1x343x128xf32, #tpu.memory_space<vmem>>, %arg2: memref<1x343x128xf32, #tpu.memory_space<vmem>>) attributes {dimension_semantics = [#tpu.dimension_semantics<parallel>], iteration_bounds = array<i64: 2>, scalar_prefetch = 0 : i64, scratch_operands = 0 : i64, tpu.core_type = #tpu.core_type<tc>, window_params = [{transform_indices = @transform_0, window_bounds = array<i64: 1, 343, 128>}, {transform_indices = @transform_1, window_bounds = array<i64: 1, 343, 128>}]} {
    %c0 = arith.constant 0 : index
    %c0_0 = arith.constant 0 : index
    %c0_1 = arith.constant 0 : index
    %0 = vector.load %arg1[%c0, %c0_0, %c0_1] : memref<1x343x128xf32, #tpu.memory_space<vmem>>, vector<1x343x128xf32>
    %cst = arith.constant dense<0.000000e+00> : vector<1x128xf32>
    %1 = vector.multi_reduction <add>, %0, %cst [1] : vector<1x343x128xf32> to vector<1x128xf32>
    %2 = vector.shape_cast %1 : vector<1x128xf32> to vector<1x1x128xf32>
    %cst_2 = arith.constant 3.430000e+02 : f32
    %3 = vector.broadcast %cst_2 : f32 to vector<1x1x128xf32>
    %4 = arith.divf %2, %3 : vector<1x1x128xf32>
    %5 = vector.broadcast %4 : vector<1x1x128xf32> to vector<1x343x128xf32>
    %6 = arith.subf %0, %5 : vector<1x343x128xf32>
    %7 = arith.mulf %6, %6 : vector<1x343x128xf32>
    %cst_3 = arith.constant dense<0.000000e+00> : vector<1x128xf32>
    %8 = vector.multi_reduction <add>, %7, %cst_3 [1] : vector<1x343x128xf32> to vector<1x128xf32>
    %9 = vector.shape_cast %8 : vector<1x128xf32> to vector<1x1x128xf32>
    %cst_4 = arith.constant 3.430000e+02 : f32
    %10 = vector.broadcast %cst_4 : f32 to vector<1x1x128xf32>
    %11 = arith.divf %9, %10 : vector<1x1x128xf32>
    %12 = vector.broadcast %4 : vector<1x1x128xf32> to vector<1x343x128xf32>
    %13 = arith.subf %0, %12 : vector<1x343x128xf32>
    %cst_5 = arith.constant 9.99999974E-6 : f32
    %14 = vector.broadcast %cst_5 : f32 to vector<1x1x128xf32>
    %15 = arith.addf %11, %14 : vector<1x1x128xf32>
    %16 = math.rsqrt %15 : vector<1x1x128xf32>
    %17 = vector.broadcast %16 : vector<1x1x128xf32> to vector<1x343x128xf32>
    %18 = arith.mulf %13, %17 : vector<1x343x128xf32>
    %cst_6 = arith.constant 0.000000e+00 : f32
    %19 = vector.broadcast %cst_6 : f32 to vector<1x343x128xf32>
    %20 = arith.cmpf oge, %18, %19 : vector<1x343x128xf32>
    %cst_7 = arith.constant 2.000000e-01 : f32
    %21 = vector.broadcast %cst_7 : f32 to vector<1x343x128xf32>
    %22 = arith.mulf %21, %18 : vector<1x343x128xf32>
    %23 = arith.select %20, %18, %22 : vector<1x343x128xi1>, vector<1x343x128xf32>
    %c0_8 = arith.constant 0 : index
    %c0_9 = arith.constant 0 : index
    %c0_10 = arith.constant 0 : index
    %24 = vector.load %arg2[%c0_8, %c0_9, %c0_10] : memref<1x343x128xf32, #tpu.memory_space<vmem>>, vector<1x343x128xf32>
    tpu.vector_store %arg2[%c0_8, %c0_9, %c0_10], %23 {strides = array<i32>} : memref<1x343x128xf32, #tpu.memory_space<vmem>>, vector<1x343x128xf32>,
    return
  }
  func.func @transform_0(%arg0: i32) -> (i32, i32, i32) {
    %c0_i32 = arith.constant 0 : i32
    %c0_i32_0 = arith.constant 0 : i32
    %c0_i32_1 = arith.constant 0 : i32
    return %arg0, %c0_i32, %c0_i32_0 : i32, i32, i32
  }
  func.func @transform_1(%arg0: i32) -> (i32, i32, i32) {
    %c0_i32 = arith.constant 0 : i32
    %c0_i32_0 = arith.constant 0 : i32
    %c0_i32_1 = arith.constant 0 : i32
    return %arg0, %c0_i32, %c0_i32_0 : i32, i32, i32
  }
}

module attributes {stable_mosaic.version = 11 : i64} {
  func.func @_matmul_kernel(%arg0: i32, %arg1: i32, %arg2: i32, %arg3: memref<432x512xbf16, #tpu.memory_space<vmem>>, %arg4: memref<512x128xbf16, #tpu.memory_space<vmem>>, %arg5: memref<1x128xf32, #tpu.memory_space<vmem>>, %arg6: memref<432x128xf32, #tpu.memory_space<vmem>>) attributes {dimension_semantics = [#tpu.dimension_semantics<parallel>, #tpu.dimension_semantics<parallel>, #tpu.dimension_semantics<arbitrary>], iteration_bounds = array<i64: 1, 1, 16>, scalar_prefetch = 0 : i64, scratch_operands = 0 : i64, tpu.core_type = #tpu.core_type<tc>, window_params = [{transform_indices = @transform_0, window_bounds = array<i64: 432, 512>}, {transform_indices = @transform_1, window_bounds = array<i64: 512, 128>}, {transform_indices = @transform_2, window_bounds = array<i64: 1, 128>}, {transform_indices = @transform_3, window_bounds = array<i64: 432, 128>}]} {
    %c0_i32 = arith.constant 0 : i32
    %0 = arith.cmpi eq, %arg2, %c0_i32 : i32
    %1 = arith.extui %0 : i1 to i32
    %c0_i32_0 = arith.constant 0 : i32
    %2 = arith.cmpi ne, %1, %c0_i32_0 : i32
    scf.if %2 {
      %cst_9 = arith.constant 0.000000e+00 : f32
      %12 = vector.broadcast %cst_9 : f32 to vector<432x128xf32>
      %c0_10 = arith.constant 0 : index
      %c0_11 = arith.constant 0 : index
      %13 = vector.load %arg6[%c0_10, %c0_11] : memref<432x128xf32, #tpu.memory_space<vmem>>, vector<432x128xf32>
      tpu.vector_store %arg6[%c0_10, %c0_11], %12 {strides = array<i32>} : memref<432x128xf32, #tpu.memory_space<vmem>>, vector<432x128xf32>,
    } else {
    }
    %c0 = arith.constant 0 : index
    %c0_1 = arith.constant 0 : index
    %3 = vector.load %arg6[%c0, %c0_1] : memref<432x128xf32, #tpu.memory_space<vmem>>, vector<432x128xf32>
    %c0_2 = arith.constant 0 : index
    %c0_3 = arith.constant 0 : index
    %4 = vector.load %arg3[%c0_2, %c0_3] : memref<432x512xbf16, #tpu.memory_space<vmem>>, vector<432x512xbf16>
    %c0_4 = arith.constant 0 : index
    %c0_5 = arith.constant 0 : index
    %5 = vector.load %arg4[%c0_4, %c0_5] : memref<512x128xbf16, #tpu.memory_space<vmem>>, vector<512x128xbf16>
    %cst = arith.constant dense<0.000000e+00> : vector<432x128xf32>
    %6 = tpu.matmul %4, %5, %cst {dimension_numbers = #tpu.dot_dimension_numbers<[1], [0], [0], [1], [0, 0, 1, 1], [], []>} : vector<432x512xbf16>, vector<512x128xbf16>, vector<432x128xf32> -> vector<432x128xf32>
    %7 = arith.addf %3, %6 : vector<432x128xf32>
    %c0_6 = arith.constant 0 : index
    %c0_7 = arith.constant 0 : index
    %8 = vector.load %arg6[%c0_6, %c0_7] : memref<432x128xf32, #tpu.memory_space<vmem>>, vector<432x128xf32>
    tpu.vector_store %arg6[%c0_6, %c0_7], %7 {strides = array<i32>} : memref<432x128xf32, #tpu.memory_space<vmem>>, vector<432x128xf32>,
    %c15_i32 = arith.constant 15 : i32
    %9 = arith.cmpi eq, %arg2, %c15_i32 : i32
    %10 = arith.extui %9 : i1 to i32
    %c0_i32_8 = arith.constant 0 : i32
    %11 = arith.cmpi ne, %10, %c0_i32_8 : i32
    scf.if %11 {
      %c0_9 = arith.constant 0 : index
      %c0_10 = arith.constant 0 : index
      %12 = vector.load %arg6[%c0_9, %c0_10] : memref<432x128xf32, #tpu.memory_space<vmem>>, vector<432x128xf32>
      %c0_11 = arith.constant 0 : index
      %c0_12 = arith.constant 0 : index
      %13 = vector.load %arg5[%c0_11, %c0_12] : memref<1x128xf32, #tpu.memory_space<vmem>>, vector<1x128xf32>
      %14 = vector.broadcast %13 : vector<1x128xf32> to vector<432x128xf32>
      %15 = arith.addf %12, %14 : vector<432x128xf32>
      %c0_13 = arith.constant 0 : index
      %c0_14 = arith.constant 0 : index
      %16 = vector.load %arg6[%c0_13, %c0_14] : memref<432x128xf32, #tpu.memory_space<vmem>>, vector<432x128xf32>
      tpu.vector_store %arg6[%c0_13, %c0_14], %15 {strides = array<i32>} : memref<432x128xf32, #tpu.memory_space<vmem>>, vector<432x128xf32>,
    } else {
    }
    return
  }
  func.func @transform_0(%arg0: i32, %arg1: i32, %arg2: i32) -> (i32, i32) {
    %c0_i32 = arith.constant 0 : i32
    return %arg0, %arg2 : i32, i32
  }
  func.func @transform_1(%arg0: i32, %arg1: i32, %arg2: i32) -> (i32, i32) {
    %c0_i32 = arith.constant 0 : i32
    return %arg2, %arg1 : i32, i32
  }
  func.func @transform_2(%arg0: i32, %arg1: i32, %arg2: i32) -> (i32, i32) {
    %c0_i32 = arith.constant 0 : i32
    %c0_i32_0 = arith.constant 0 : i32
    return %c0_i32, %arg1 : i32, i32
  }
  func.func @transform_3(%arg0: i32, %arg1: i32, %arg2: i32) -> (i32, i32) {
    %c0_i32 = arith.constant 0 : i32
    return %arg0, %arg1 : i32, i32
  }
}

</mosaic_0001>

<bundles_post_ra>
// kernel: apply.4
= control target key start
LH: loop header
LB: loop body
LE: loop exit
PB: predicated region body
PF: predicated region fallthrough
CT: control target
= control target key end

     0   :  { %s1933_s12 = smov 0   ;;  %s1935_s13 = smov 0   ;;  %s2199_s0 = inlined_call_operand.vmem [shape: bf16[1024,128], index: 0, kind: input, shape index: {}]   ;;  %s2200_s1 = inlined_call_operand.vmem [shape: bf16[128,128], index: 1, kind: input, shape index: {}]   ;;  %s2201_s2 = inlined_call_operand.vmem [shape: f32[1,128], index: 2, kind: input, shape index: {}]   ;;  %s2202_s3 = inlined_call_operand.vmem [shape: f32[1024,128], index: 3, kind: output, shape index: {}]  }
   0x1   :  { %s1937_s14 = smov 0  }
   0x2 LB: > { %s32_s15 = sadd.s32 1, %s1907_s13  ;;  %p1640_p0 = scmp.ge.s32.totalorder %s1911_s14, 1  ;;  %s1911_s14 = sphi %s1937_s14, %s13_s14   ;;  %s1907_s13 = sphi %s1935_s13, %s2204_s13   ;;  %s1903_s12 = sphi %s1933_s12, %s2203_s12  }
   0x3   : > { %p34_p1 = scmp.ge.s32.totalorder %s32_s15, 2  ;;  %p188_p2 = scmp.lt.s32.totalorder %s1911_s14, 3 }
   0x5   : > { %s2206_s15 = smov (%p34_p1, %s32_s15), 0  ;;  %p189_p3 = pnand %p1640_p0, %p188_p2 }
   0x6   : > { %s1641_s18 = sshll.u32 (!%p189_p3), %s1903_s12, 6 }
   0x7   : > { %192 = sbr.rel (%p189_p3) target bundleno = 307 (0x133), region = 32  ;;  %p230_p4 = scmp.lt.s32.totalorder (!%p189_p3), %s1641_s18, 127 }
   0xc   : > { %v1849_v0 = vld [vmem:[%s2200_s1 + $0x38] sm:$0xff]   ;;  %v1850_v1 = vld [vmem:[%s2200_s1 + $0x30] sm:$0xff]   ;;  %s2208_s18 = smov (!%p230_p4, %s1641_s18), 127  ;;  %v1851_v2 = vld [vmem:[%s2200_s1 + $0x28] sm:$0xff]  }
   0xd   : > { %1728 = vmatprep.subr.bf16.mxu0 %v1849_v0  ;;  %1808 = vmatprep.subr.bf16.mxu1 %v1849_v0  ;;  %s1642_s23 = sshll.u32 %s2208_s18, 2  ;;  %v1852_v3 = vld [vmem:[%s2200_s1 + $0x20] sm:$0xff]   ;;  %v1853_v6 = vld [vmem:[%s2200_s1 + $0x18] sm:$0xff]   ;;  %v1854_v7 = vld [vmem:[%s2200_s1 + $0x10] sm:$0xff]   ;;  %s1644_s12 = sshll.u32 %s2208_s18, 3 }
   0xe   : > { %1729 = vmatpush3.bf16.msra.mxu0 %v1849_v0  ;;  %1816 = vmatpush3.bf16.msra.mxu1 %v1849_v0  ;;  %s1966_s26 = scalar_lea.vmem %s2199_s0, %s1642_s23  ;;  %v1855_v8 = vld [vmem:[%s2200_s1 + $0x8] sm:$0xff]   ;;  %v1856_v9 = vld [vmem:[%s2200_s1] sm:$0xff]   ;;  %s2026_s19 = scalar_lea.vmem %s2202_s3, %s1644_s12 }
   0xf   : > { %1730 = vmatprep.subr.bf16.mxu0 %v1850_v1  ;;  %1809 = vmatprep.subr.bf16.mxu1 %v1850_v1  ;;  %v1857_v4 = vld [vmem:[%s1966_s26] sm:$0xff]   ;;  %v1859_v10 = vld [vmem:[%s1966_s26 + $0x8] sm:$0xff]   ;;  %v1861_v12 = vld [vmem:[%s1966_s26 + $0x10] sm:$0xff]  }
  0x10   : > { %v1858_v5 = vld [vmem:[%s1966_s26 + $0x80] sm:$0xff]   ;;  %1744 = vmatprep.mubr.bf16.mxu0 %v1857_v4  ;;  %v1860_v11 = vld [vmem:[%s1966_s26 + $0x88] sm:$0xff]   ;;  %v1862_v13 = vld [vmem:[%s1966_s26 + $0x90] sm:$0xff]  }
  0x11   : > { %1776 = vmatprep.mubr.bf16.mxu1 %v1858_v5  ;;  %v1863_v14 = vld [vmem:[%s1966_s26 + $0x18] sm:$0xff]   ;;  %v1865_v16 = vld [vmem:[%s1966_s26 + $0x20] sm:$0xff]   ;;  %v1867_v18 = vld [vmem:[%s1966_s26 + $0x28] sm:$0xff]  }
  0x12   : > { %1731 = vmatpush3.bf16.msra.mxu0 %v1850_v1  ;;  %1817 = vmatpush3.bf16.msra.mxu1 %v1850_v1  ;;  %v1864_v15 = vld [vmem:[%s1966_s26 + $0x98] sm:$0xff]   ;;  %v1866_v17 = vld [vmem:[%s1966_s26 + $0xa0] sm:$0xff]   ;;  %v1868_v19 = vld [vmem:[%s1966_s26 + $0xa8] sm:$0xff]  }
  0x13   : > { %1732 = vmatprep.subr.bf16.mxu0 %v1851_v2  ;;  %1810 = vmatprep.subr.bf16.mxu1 %v1851_v2  ;;  %v1869_v20 = vld [vmem:[%s1966_s26 + $0x30] sm:$0xff]   ;;  %v1871_v22 = vld [vmem:[%s1966_s26 + $0x38] sm:$0xff]   ;;  %v1873_v24 = vld [vmem:[%s1966_s26 + $0x40] sm:$0xff]  }
  0x14   : > { %v1870_v21 = vld [vmem:[%s1966_s26 + $0xb0] sm:$0xff]   ;;  %v1872_v23 = vld [vmem:[%s1966_s26 + $0xb8] sm:$0xff]   ;;  %v1874_v25 = vld [vmem:[%s1966_s26 + $0xc0] sm:$0xff]  }
  0x15   : > { %v1875_v26 = vld [vmem:[%s1966_s26 + $0x48] sm:$0xff]   ;;  %v1877_v28 = vld [vmem:[%s1966_s26 + $0x50] sm:$0xff]   ;;  %v1879_v30 = vld [vmem:[%s1966_s26 + $0x58] sm:$0xff]  }
  0x16   : > { %1733 = vmatpush3.bf16.msra.mxu0 %v1851_v2  ;;  %1818 = vmatpush3.bf16.msra.mxu1 %v1851_v2  ;;  %v1876_v27 = vld [vmem:[%s1966_s26 + $0xc8] sm:$0xff]   ;;  %v1878_v29 = vld [vmem:[%s1966_s26 + $0xd0] sm:$0xff]   ;;  %v1880_v31 = vld [vmem:[%s1966_s26 + $0xd8] sm:$0xff]  }
  0x17   : > { %1734 = vmatprep.subr.bf16.mxu0 %v1852_v3  ;;  %1811 = vmatprep.subr.bf16.mxu1 %v1852_v3  ;;  %v1881_v32 = vld [vmem:[%s1966_s26 + $0x60] sm:$0xff]   ;;  %v1883_v34 = vld [vmem:[%s1966_s26 + $0x68] sm:$0xff]   ;;  %v1885_v36 = vld [vmem:[%s1966_s26 + $0x70] sm:$0xff]  }
  0x18   : > { %v1882_v33 = vld [vmem:[%s1966_s26 + $0xe0] sm:$0xff]   ;;  %v1884_v35 = vld [vmem:[%s1966_s26 + $0xe8] sm:$0xff]   ;;  %v1886_v37 = vld [vmem:[%s1966_s26 + $0xf0] sm:$0xff]  }
  0x19   : > { %v1887_v38 = vld [vmem:[%s1966_s26 + $0x78] sm:$0xff]   ;;  %v2018_v41 = vld [vmem:[%s2201_s2] ss:$0 sm:$0xff] }
  0x1a   : > { %1735 = vmatpush3.bf16.msra.mxu0 %v1852_v3  ;;  %1819 = vmatpush3.bf16.msra.mxu1 %v1852_v3  ;;  %v1888_v39 = vld [vmem:[%s1966_s26 + $0xf8] sm:$0xff]  }
  0x1b   : > { %1736 = vmatprep.subr.bf16.mxu0 %v1853_v6  ;;  %1812 = vmatprep.subr.bf16.mxu1 %v1853_v6 }
  0x1e   : > { %1737 = vmatpush3.bf16.msra.mxu0 %v1853_v6  ;;  %1820 = vmatpush3.bf16.msra.mxu1 %v1853_v6 }
  0x1f   : > { %1738 = vmatprep.subr.bf16.mxu0 %v1854_v7  ;;  %1813 = vmatprep.subr.bf16.mxu1 %v1854_v7 }
  0x22   : > { %1739 = vmatpush3.bf16.msra.mxu0 %v1854_v7  ;;  %1821 = vmatpush3.bf16.msra.mxu1 %v1854_v7 }
  0x23   : > { %1740 = vmatprep.subr.bf16.mxu0 %v1855_v8  ;;  %1814 = vmatprep.subr.bf16.mxu1 %v1855_v8 }
  0x26   : > { %1741 = vmatpush3.bf16.msra.mxu0 %v1855_v8  ;;  %1822 = vmatpush3.bf16.msra.mxu1 %v1855_v8 }
  0x27   : > { %1742 = vmatprep.subr.bf16.mxu0 %v1856_v9  ;;  %1815 = vmatprep.subr.bf16.mxu1 %v1856_v9 }
  0x2a   : > { %1743 = vmatpush3.bf16.msra.mxu0 %v1856_v9  ;;  %1823 = vmatpush3.bf16.msra.mxu1 %v1856_v9 }
  0x2d   : > { %1745 = vmatmul.mubr.bf16.vlgmr.msra.gmra.mxu0 %v1859_v10  ;;  %1777 = vmatmul.mubr.bf16.vlgmr.msra.gmra.mxu1 %v1860_v11 }
  0x2e   : > { %1748 = vmatprep.mubr.bf16.mxu0 %v1861_v12  ;;  %1780 = vmatprep.mubr.bf16.mxu1 %v1862_v13 }
  0x35   : > { %1749 = vmatmul.mubr.bf16.gmra.mxu0 %v1863_v14  ;;  %1781 = vmatmul.mubr.bf16.gmra.mxu1 %v1864_v15 }
  0x36   : > { %1752 = vmatprep.mubr.bf16.mxu0 %v1865_v16  ;;  %1784 = vmatprep.mubr.bf16.mxu1 %v1866_v17 }
  0x3d   : > { %1753 = vmatmul.mubr.bf16.gmra.mxu0 %v1867_v18  ;;  %1785 = vmatmul.mubr.bf16.gmra.mxu1 %v1868_v19 }
  0x3e   : > { %1756 = vmatprep.mubr.bf16.mxu0 %v1869_v20  ;;  %1788 = vmatprep.mubr.bf16.mxu1 %v1870_v21 }
  0x45   : > { %1757 = vmatmul.mubr.bf16.gmra.mxu0 %v1871_v22  ;;  %1789 = vmatmul.mubr.bf16.gmra.mxu1 %v1872_v23 }
  0x46   : > { %1760 = vmatprep.mubr.bf16.mxu0 %v1873_v24  ;;  %1792 = vmatprep.mubr.bf16.mxu1 %v1874_v25 }
  0x4d   : > { %1761 = vmatmul.mubr.bf16.gmra.mxu0 %v1875_v26  ;;  %1793 = vmatmul.mubr.bf16.gmra.mxu1 %v1876_v27 }
  0x4e   : > { %1764 = vmatprep.mubr.bf16.mxu0 %v1877_v28  ;;  %1796 = vmatprep.mubr.bf16.mxu1 %v1878_v29 }
  0x55   : > { %1765 = vmatmul.mubr.bf16.gmra.mxu0 %v1879_v30  ;;  %1797 = vmatmul.mubr.bf16.gmra.mxu1 %v1880_v31 }
  0x56   : > { %1768 = vmatprep.mubr.bf16.mxu0 %v1881_v32  ;;  %1800 = vmatprep.mubr.bf16.mxu1 %v1882_v33 }
  0x5d   : > { %1769 = vmatmul.mubr.bf16.gmra.mxu0 %v1883_v34  ;;  %1801 = vmatmul.mubr.bf16.gmra.mxu1 %v1884_v35 }
  0x5e   : > { %1772 = vmatprep.mubr.bf16.mxu0 %v1885_v36  ;;  %1804 = vmatprep.mubr.bf16.mxu1 %v1886_v37 }
  0x65   : > { %1773 = vmatmul.mubr.bf16.gmra.mxu0 %v1887_v38  ;;  %1805 = vmatmul.mubr.bf16.gmra.mxu1 %v1888_v39 }
  0xed   : > { %v1746_v40 = vpop.f32.mrf.mxu0  ;;  %v1778_v42 = vpop.f32.mrf.mxu1 }
  0xee   : > { %v1205_v45 = vadd.f32 %v1746_v40, %v2018_v41  ;;  %v1237_v46 = vadd.f32 %v1778_v42, %v2018_v41 }
  0xef   : > { %v746_v43 = vpop.f32.mrf.mxu0  ;;  %v874_v44 = vpop.f32.mrf.mxu1 }
  0xf0   : > { %vm1269_vm0 = vcmp.ge.f32.partialorder %v1205_v45, 0.0  ;;  %v1333_v49 = vmul.f32 0.2, %v1205_v45  ;;  %vm1301_vm1 = vcmp.ge.f32.partialorder %v1237_v46, 0.0  ;;  %v1365_v50 = vmul.f32 0.2, %v1237_v46 }
  0xf1   : > { %v1747_v47 = vpop.f32.mrf.mxu0  ;;  %v1779_v48 = vpop.f32.mrf.mxu1  ;;  %v1203_v51 = vadd.f32 %v2018_v41, %v746_v43  ;;  %v1235_v52 = vadd.f32 %v2018_v41, %v874_v44 }
  0xf2   : > { %v1397_v55 = vsel %vm1269_vm0, %v1205_v45, %v1333_v49  ;;  %v1429_v56 = vsel %vm1301_vm1, %v1237_v46, %v1365_v50  ;;  %v1206_v61 = vadd.f32 %v1747_v47, %v2018_v41  ;;  %v1238_v62 = vadd.f32 %v1779_v48, %v2018_v41 }
  0xf3   : > { %v749_v53 = vpop.f32.mrf.mxu0  ;;  %v877_v54 = vpop.f32.mrf.mxu1  ;;  %1461 = vst [vmem:[%s2026_s19 + $0x10] sm:$0xff] %v1397_v55  ;;  %1493 = vst [vmem:[%s2026_s19 + $0x110] sm:$0xff] %v1429_v56  ;;  %vm1267_vm2 = vcmp.ge.f32.partialorder %v1203_v51, 0.0  ;;  %v1331_v57 = vmul.f32 0.2, %v1203_v51  ;;  %vm1299_vm3 = vcmp.ge.f32.partialorder %v1235_v52, 0.0 }
  0xf4   : > { %v1363_v58 = vmul.f32 0.2, %v1235_v52  ;;  %v1204_v63 = vadd.f32 %v2018_v41, %v749_v53  ;;  %v1236_v0 = vadd.f32 %v2018_v41, %v877_v54  ;;  %vm1270_vm4 = vcmp.ge.f32.partialorder %v1206_v61, 0.0 }
  0xf5   : > { %v1750_v59 = vpop.f32.mrf.mxu0  ;;  %v1782_v60 = vpop.f32.mrf.mxu1  ;;  %v1395_v1 = vsel %vm1267_vm2, %v1203_v51, %v1331_v57  ;;  %v1334_v5 = vmul.f32 0.2, %v1206_v61  ;;  %vm1302_vm5 = vcmp.ge.f32.partialorder %v1238_v62, 0.0  ;;  %v1366_v6 = vmul.f32 0.2, %v1238_v62 }
  0xf6   : > { %v1427_v2 = vsel %vm1299_vm3, %v1235_v52, %v1363_v58  ;;  %1459 = vst [vmem:[%s2026_s19] sm:$0xff] %v1395_v1  ;;  %vm1268_vm6 = vcmp.ge.f32.partialorder %v1204_v63, 0.0  ;;  %v1332_v7 = vmul.f32 0.2, %v1204_v63  ;;  %vm1300_vm7 = vcmp.ge.f32.partialorder %v1236_v0, 0.0 }
  0xf7   : > { %v762_v3 = vpop.f32.mrf.mxu0  ;;  %v890_v4 = vpop.f32.mrf.mxu1  ;;  %1491 = vst [vmem:[%s2026_s19 + $0x100] sm:$0xff] %v1427_v2  ;;  %v1364_v8 = vmul.f32 0.2, %v1236_v0  ;;  %v1398_v11 = vsel %vm1270_vm4, %v1206_v61, %v1334_v5  ;;  %v1430_v12 = vsel %vm1302_vm5, %v1238_v62, %v1366_v6  ;;  %v1209_v13 = vadd.f32 %v1750_v59, %v2018_v41 }
  0xf8   : > { %v1241_v14 = vadd.f32 %v1782_v60, %v2018_v41  ;;  %1462 = vst [vmem:[%s2026_s19 + $0x18] sm:$0xff] %v1398_v11  ;;  %1494 = vst [vmem:[%s2026_s19 + $0x118] sm:$0xff] %v1430_v12  ;;  %v1396_v15 = vsel %vm1268_vm6, %v1204_v63, %v1332_v7  ;;  %v1207_v21 = vadd.f32 %v2018_v41, %v762_v3 }
  0xf9   : > { %v1751_v9 = vpop.f32.mrf.mxu0  ;;  %v1783_v10 = vpop.f32.mrf.mxu1  ;;  %v1428_v16 = vsel %vm1300_vm7, %v1236_v0, %v1364_v8  ;;  %1460 = vst [vmem:[%s2026_s19 + $0x8] sm:$0xff] %v1396_v15  ;;  %vm1273_vm8 = vcmp.ge.f32.partialorder %v1209_v13, 0.0  ;;  %v1337_v19 = vmul.f32 0.2, %v1209_v13  ;;  %v1239_v22 = vadd.f32 %v2018_v41, %v890_v4 }
  0xfa   : > { %1492 = vst [vmem:[%s2026_s19 + $0x108] sm:$0xff] %v1428_v16  ;;  %vm1305_vm9 = vcmp.ge.f32.partialorder %v1241_v14, 0.0  ;;  %v1369_v20 = vmul.f32 0.2, %v1241_v14  ;;  %vm1271_vm10 = vcmp.ge.f32.partialorder %v1207_v21, 0.0  ;;  %v1210_v31 = vadd.f32 %v1751_v9, %v2018_v41 }
  0xfb   : > { %v765_v17 = vpop.f32.mrf.mxu0  ;;  %v893_v18 = vpop.f32.mrf.mxu1  ;;  %v1401_v25 = vsel %vm1273_vm8, %v1209_v13, %v1337_v19  ;;  %v1335_v27 = vmul.f32 0.2, %v1207_v21  ;;  %vm1303_vm11 = vcmp.ge.f32.partialorder %v1239_v22, 0.0  ;;  %v1367_v28 = vmul.f32 0.2, %v1239_v22 }
  0xfc   : > { %v1433_v26 = vsel %vm1305_vm9, %v1241_v14, %v1369_v20  ;;  %1465 = vst [vmem:[%s2026_s19 + $0x30] sm:$0xff] %v1401_v25  ;;  %v1242_v32 = vadd.f32 %v1783_v10, %v2018_v41  ;;  %v1208_v33 = vadd.f32 %v2018_v41, %v765_v17  ;;  %v1240_v34 = vadd.f32 %v2018_v41, %v893_v18 }
  0xfd   : > { %v1754_v23 = vpop.f32.mrf.mxu0  ;;  %v1786_v24 = vpop.f32.mrf.mxu1  ;;  %1497 = vst [vmem:[%s2026_s19 + $0x130] sm:$0xff] %v1433_v26  ;;  %v1399_v35 = vsel %vm1271_vm10, %v1207_v21, %v1335_v27  ;;  %v1431_v36 = vsel %vm1303_vm11, %v1239_v22, %v1367_v28  ;;  %vm1274_vm12 = vcmp.ge.f32.partialorder %v1210_v31, 0.0  ;;  %v1338_v39 = vmul.f32 0.2, %v1210_v31 }
  0xfe   : > { %1463 = vst [vmem:[%s2026_s19 + $0x20] sm:$0xff] %v1399_v35  ;;  %1495 = vst [vmem:[%s2026_s19 + $0x120] sm:$0xff] %v1431_v36  ;;  %vm1306_vm13 = vcmp.ge.f32.partialorder %v1242_v32, 0.0  ;;  %v1370_v40 = vmul.f32 0.2, %v1242_v32  ;;  %vm1272_vm14 = vcmp.ge.f32.partialorder %v1208_v33, 0.0  ;;  %v1213_v48 = vadd.f32 %v1754_v23, %v2018_v41 }
  0xff   : > { %v778_v29 = vpop.f32.mrf.mxu0  ;;  %v906_v30 = vpop.f32.mrf.mxu1  ;;  %v1336_v42 = vmul.f32 0.2, %v1208_v33  ;;  %vm1304_vm15 = vcmp.ge.f32.partialorder %v1240_v34, 0.0  ;;  %v1368_v43 = vmul.f32 0.2, %v1240_v34  ;;  %v1402_v46 = vsel %vm1274_vm12, %v1210_v31, %v1338_v39 }
 0x100   : > { %v1434_v47 = vsel %vm1306_vm13, %v1242_v32, %v1370_v40  ;;  %v1245_v49 = vadd.f32 %v1786_v24, %v2018_v41  ;;  %1466 = vst [vmem:[%s2026_s19 + $0x38] sm:$0xff] %v1402_v46  ;;  %vm1277_vm0 = vcmp.ge.f32.partialorder %v1213_v48, 0.0  ;;  %v1341_v54 = vmul.f32 0.2, %v1213_v48 }
 0x101   : > { %v1755_v37 = vpop.f32.mrf.mxu0  ;;  %v1787_v38 = vpop.f32.mrf.mxu1  ;;  %1498 = vst [vmem:[%s2026_s19 + $0x138] sm:$0xff] %v1434_v47  ;;  %v1400_v50 = vsel %vm1272_vm14, %v1208_v33, %v1336_v42  ;;  %v1432_v51 = vsel %vm1304_vm15, %v1240_v34, %v1368_v43  ;;  %v1211_v56 = vadd.f32 %v2018_v41, %v778_v29  ;;  %v1243_v57 = vadd.f32 %v2018_v41, %v906_v30 }
 0x102   : > { %1464 = vst [vmem:[%s2026_s19 + $0x28] sm:$0xff] %v1400_v50  ;;  %1496 = vst [vmem:[%s2026_s19 + $0x128] sm:$0xff] %v1432_v51  ;;  %vm1309_vm1 = vcmp.ge.f32.partialorder %v1245_v49, 0.0  ;;  %v1373_v55 = vmul.f32 0.2, %v1245_v49  ;;  %v1405_v60 = vsel %vm1277_vm0, %v1213_v48, %v1341_v54  ;;  %v1214_v2 = vadd.f32 %v1755_v37, %v2018_v41 }
 0x103   : > { %v781_v44 = vpop.f32.mrf.mxu0  ;;  %v909_v45 = vpop.f32.mrf.mxu1  ;;  %1469 = vst [vmem:[%s2026_s19 + $0x50] sm:$0xff] %v1405_v60  ;;  %vm1275_vm2 = vcmp.ge.f32.partialorder %v1211_v56, 0.0  ;;  %v1339_v62 = vmul.f32 0.2, %v1211_v56  ;;  %vm1307_vm3 = vcmp.ge.f32.partialorder %v1243_v57, 0.0  ;;  %v1246_v3 = vadd.f32 %v1787_v38, %v2018_v41 }
 0x104   : > { %v1437_v61 = vsel %vm1309_vm1, %v1245_v49, %v1373_v55  ;;  %v1371_v63 = vmul.f32 0.2, %v1243_v57  ;;  %v1212_v4 = vadd.f32 %v2018_v41, %v781_v44  ;;  %v1244_v5 = vadd.f32 %v2018_v41, %v909_v45 }
 0x105   : > { %v1758_v52 = vpop.f32.mrf.mxu0  ;;  %v1790_v53 = vpop.f32.mrf.mxu1  ;;  %1501 = vst [vmem:[%s2026_s19 + $0x150] sm:$0xff] %v1437_v61  ;;  %v1403_v6 = vsel %vm1275_vm2, %v1211_v56, %v1339_v62  ;;  %vm1278_vm4 = vcmp.ge.f32.partialorder %v1214_v2, 0.0  ;;  %v1342_v10 = vmul.f32 0.2, %v1214_v2  ;;  %vm1310_vm5 = vcmp.ge.f32.partialorder %v1246_v3, 0.0 }
 0x106   : > { %v1435_v7 = vsel %vm1307_vm3, %v1243_v57, %v1371_v63  ;;  %1467 = vst [vmem:[%s2026_s19 + $0x40] sm:$0xff] %v1403_v6  ;;  %v1374_v11 = vmul.f32 0.2, %v1246_v3  ;;  %vm1276_vm6 = vcmp.ge.f32.partialorder %v1212_v4, 0.0  ;;  %v1340_v12 = vmul.f32 0.2, %v1212_v4 }
 0x107   : > { %v794_v58 = vpop.f32.mrf.mxu0  ;;  %v922_v59 = vpop.f32.mrf.mxu1  ;;  %1499 = vst [vmem:[%s2026_s19 + $0x140] sm:$0xff] %v1435_v7  ;;  %vm1308_vm7 = vcmp.ge.f32.partialorder %v1244_v5, 0.0  ;;  %v1372_v13 = vmul.f32 0.2, %v1244_v5  ;;  %v1406_v16 = vsel %vm1278_vm4, %v1214_v2, %v1342_v10  ;;  %v1217_v18 = vadd.f32 %v1758_v52, %v2018_v41 }
 0x108   : > { %v1438_v17 = vsel %vm1310_vm5, %v1246_v3, %v1374_v11  ;;  %v1249_v19 = vadd.f32 %v1790_v53, %v2018_v41  ;;  %1470 = vst [vmem:[%s2026_s19 + $0x58] sm:$0xff] %v1406_v16  ;;  %v1404_v20 = vsel %vm1276_vm6, %v1212_v4, %v1340_v12  ;;  %v1215_v26 = vadd.f32 %v2018_v41, %v794_v58 }
 0x109   : > { %v1759_v0 = vpop.f32.mrf.mxu0  ;;  %v1791_v1 = vpop.f32.mrf.mxu1  ;;  %1502 = vst [vmem:[%s2026_s19 + $0x158] sm:$0xff] %v1438_v17  ;;  %v1436_v21 = vsel %vm1308_vm7, %v1244_v5, %v1372_v13  ;;  %1468 = vst [vmem:[%s2026_s19 + $0x48] sm:$0xff] %v1404_v20  ;;  %vm1281_vm8 = vcmp.ge.f32.partialorder %v1217_v18, 0.0  ;;  %v1345_v24 = vmul.f32 0.2, %v1217_v18  ;;  %v1247_v27 = vadd.f32 %v2018_v41, %v922_v59 }
 0x10a   : > { %1500 = vst [vmem:[%s2026_s19 + $0x148] sm:$0xff] %v1436_v21  ;;  %vm1313_vm9 = vcmp.ge.f32.partialorder %v1249_v19, 0.0  ;;  %v1377_v25 = vmul.f32 0.2, %v1249_v19  ;;  %vm1279_vm10 = vcmp.ge.f32.partialorder %v1215_v26, 0.0  ;;  %v1218_v36 = vadd.f32 %v1759_v0, %v2018_v41 }
 0x10b   : > { %v797_v8 = vpop.f32.mrf.mxu0  ;;  %v925_v9 = vpop.f32.mrf.mxu1  ;;  %v1409_v30 = vsel %vm1281_vm8, %v1217_v18, %v1345_v24  ;;  %v1343_v32 = vmul.f32 0.2, %v1215_v26  ;;  %vm1311_vm11 = vcmp.ge.f32.partialorder %v1247_v27, 0.0  ;;  %v1375_v33 = vmul.f32 0.2, %v1247_v27 }
 0x10c   : > { %v1441_v31 = vsel %vm1313_vm9, %v1249_v19, %v1377_v25  ;;  %1473 = vst [vmem:[%s2026_s19 + $0x70] sm:$0xff] %v1409_v30  ;;  %v1250_v37 = vadd.f32 %v1791_v1, %v2018_v41  ;;  %v1216_v38 = vadd.f32 %v2018_v41, %v797_v8  ;;  %v1248_v39 = vadd.f32 %v2018_v41, %v925_v9 }
 0x10d   : > { %v1762_v14 = vpop.f32.mrf.mxu0  ;;  %v1794_v15 = vpop.f32.mrf.mxu1  ;;  %1505 = vst [vmem:[%s2026_s19 + $0x170] sm:$0xff] %v1441_v31  ;;  %v1407_v40 = vsel %vm1279_vm10, %v1215_v26, %v1343_v32  ;;  %v1439_v42 = vsel %vm1311_vm11, %v1247_v27, %v1375_v33  ;;  %vm1282_vm12 = vcmp.ge.f32.partialorder %v1218_v36, 0.0  ;;  %v1346_v45 = vmul.f32 0.2, %v1218_v36 }
 0x10e   : > { %1471 = vst [vmem:[%s2026_s19 + $0x60] sm:$0xff] %v1407_v40  ;;  %1503 = vst [vmem:[%s2026_s19 + $0x160] sm:$0xff] %v1439_v42  ;;  %vm1314_vm13 = vcmp.ge.f32.partialorder %v1250_v37, 0.0  ;;  %v1378_v46 = vmul.f32 0.2, %v1250_v37  ;;  %vm1280_vm14 = vcmp.ge.f32.partialorder %v1216_v38, 0.0  ;;  %v1221_v53 = vadd.f32 %v1762_v14, %v2018_v41 }
 0x10f   : > { %v810_v22 = vpop.f32.mrf.mxu0  ;;  %v938_v23 = vpop.f32.mrf.mxu1  ;;  %v1344_v47 = vmul.f32 0.2, %v1216_v38  ;;  %vm1312_vm15 = vcmp.ge.f32.partialorder %v1248_v39, 0.0  ;;  %v1376_v48 = vmul.f32 0.2, %v1248_v39  ;;  %v1410_v51 = vsel %vm1282_vm12, %v1218_v36, %v1346_v45 }
 0x110   : > { %v1442_v52 = vsel %vm1314_vm13, %v1250_v37, %v1378_v46  ;;  %v1253_v54 = vadd.f32 %v1794_v15, %v2018_v41  ;;  %1474 = vst [vmem:[%s2026_s19 + $0x78] sm:$0xff] %v1410_v51  ;;  %vm1285_vm0 = vcmp.ge.f32.partialorder %v1221_v53, 0.0  ;;  %v1349_v59 = vmul.f32 0.2, %v1221_v53 }
 0x111   : > { %v1763_v28 = vpop.f32.mrf.mxu0  ;;  %v1795_v29 = vpop.f32.mrf.mxu1  ;;  %1506 = vst [vmem:[%s2026_s19 + $0x178] sm:$0xff] %v1442_v52  ;;  %v1408_v55 = vsel %vm1280_vm14, %v1216_v38, %v1344_v47  ;;  %v1440_v56 = vsel %vm1312_vm15, %v1248_v39, %v1376_v48  ;;  %v1219_v61 = vadd.f32 %v2018_v41, %v810_v22  ;;  %v1251_v62 = vadd.f32 %v2018_v41, %v938_v23 }
 0x112   : > { %1472 = vst [vmem:[%s2026_s19 + $0x68] sm:$0xff] %v1408_v55  ;;  %1504 = vst [vmem:[%s2026_s19 + $0x168] sm:$0xff] %v1440_v56  ;;  %vm1317_vm1 = vcmp.ge.f32.partialorder %v1253_v54, 0.0  ;;  %v1381_v60 = vmul.f32 0.2, %v1253_v54  ;;  %v1413_v1 = vsel %vm1285_vm0, %v1221_v53, %v1349_v59  ;;  %v1222_v7 = vadd.f32 %v1763_v28, %v2018_v41 }
 0x113   : > { %v813_v34 = vpop.f32.mrf.mxu0  ;;  %v941_v35 = vpop.f32.mrf.mxu1  ;;  %1477 = vst [vmem:[%s2026_s19 + $0x90] sm:$0xff] %v1413_v1  ;;  %vm1283_vm2 = vcmp.ge.f32.partialorder %v1219_v61, 0.0  ;;  %v1347_v3 = vmul.f32 0.2, %v1219_v61  ;;  %vm1315_vm3 = vcmp.ge.f32.partialorder %v1251_v62, 0.0  ;;  %v1254_v8 = vadd.f32 %v1795_v29, %v2018_v41 }
 0x114   : > { %v1445_v2 = vsel %vm1317_vm1, %v1253_v54, %v1381_v60  ;;  %v1379_v4 = vmul.f32 0.2, %v1251_v62  ;;  %v1220_v9 = vadd.f32 %v2018_v41, %v813_v34  ;;  %v1252_v10 = vadd.f32 %v2018_v41, %v941_v35 }
 0x115   : > { %v2084_v43 = vpop.f32.mrf.mxu0  ;;  %v2086_v44 = vpop.f32.mrf.mxu1  ;;  %1509 = vst [vmem:[%s2026_s19 + $0x190] sm:$0xff] %v1445_v2  ;;  %v1411_v11 = vsel %vm1283_vm2, %v1219_v61, %v1347_v3  ;;  %vm1286_vm4 = vcmp.ge.f32.partialorder %v1222_v7, 0.0  ;;  %v1350_v15 = vmul.f32 0.2, %v1222_v7  ;;  %vm1318_vm5 = vcmp.ge.f32.partialorder %v1254_v8, 0.0 }
 0x116   : > { %v1443_v12 = vsel %vm1315_vm3, %v1251_v62, %v1379_v4  ;;  %1475 = vst [vmem:[%s2026_s19 + $0x80] sm:$0xff] %v1411_v11  ;;  %v1382_v16 = vmul.f32 0.2, %v1254_v8  ;;  %vm1284_vm6 = vcmp.ge.f32.partialorder %v1220_v9, 0.0  ;;  %v1348_v17 = vmul.f32 0.2, %v1220_v9 }
 0x117   : > { %v2090_v49 = vpop.f32.mrf.mxu0  ;;  %v2092_v50 = vpop.f32.mrf.mxu1  ;;  %1507 = vst [vmem:[%s2026_s19 + $0x180] sm:$0xff] %v1443_v12  ;;  %vm1316_vm7 = vcmp.ge.f32.partialorder %v1252_v10, 0.0  ;;  %v1380_v18 = vmul.f32 0.2, %v1252_v10  ;;  %v1414_v19 = vsel %vm1286_vm4, %v1222_v7, %v1350_v15  ;;  %v1225_v21 = vadd.f32 %v2084_v43, %v2018_v41 }
 0x118   : > { %v1446_v20 = vsel %vm1318_vm5, %v1254_v8, %v1382_v16  ;;  %v1257_v22 = vadd.f32 %v2086_v44, %v2018_v41  ;;  %1478 = vst [vmem:[%s2026_s19 + $0x98] sm:$0xff] %v1414_v19  ;;  %v1412_v23 = vsel %vm1284_vm6, %v1220_v9, %v1348_v17  ;;  %v1223_v29 = vadd.f32 %v2018_v41, %v2090_v49 }
 0x119   : > { %v2098_v57 = vpop.f32.mrf.mxu0  ;;  %v2100_v58 = vpop.f32.mrf.mxu1  ;;  %1510 = vst [vmem:[%s2026_s19 + $0x198] sm:$0xff] %v1446_v20  ;;  %v1444_v24 = vsel %vm1316_vm7, %v1252_v10, %v1380_v18  ;;  %1476 = vst [vmem:[%s2026_s19 + $0x88] sm:$0xff] %v1412_v23  ;;  %vm1289_vm8 = vcmp.ge.f32.partialorder %v1225_v21, 0.0  ;;  %v1353_v27 = vmul.f32 0.2, %v1225_v21  ;;  %v1255_v30 = vadd.f32 %v2018_v41, %v2092_v50 }
 0x11a   : > { %1508 = vst [vmem:[%s2026_s19 + $0x188] sm:$0xff] %v1444_v24  ;;  %vm1321_vm9 = vcmp.ge.f32.partialorder %v1257_v22, 0.0  ;;  %v1385_v28 = vmul.f32 0.2, %v1257_v22  ;;  %vm1287_vm10 = vcmp.ge.f32.partialorder %v1223_v29, 0.0  ;;  %v1226_v37 = vadd.f32 %v2098_v57, %v2018_v41 }
 0x11b   : > { %v829_v63 = vpop.f32.mrf.mxu0  ;;  %v957_v0 = vpop.f32.mrf.mxu1  ;;  %v1417_v31 = vsel %vm1289_vm8, %v1225_v21, %v1353_v27  ;;  %v1351_v33 = vmul.f32 0.2, %v1223_v29  ;;  %vm1319_vm11 = vcmp.ge.f32.partialorder %v1255_v30, 0.0  ;;  %v1383_v34 = vmul.f32 0.2, %v1255_v30 }
 0x11c   : > { %v1449_v32 = vsel %vm1321_vm9, %v1257_v22, %v1385_v28  ;;  %1481 = vst [vmem:[%s2026_s19 + $0xb0] sm:$0xff] %v1417_v31  ;;  %v1258_v38 = vadd.f32 %v2100_v58, %v2018_v41  ;;  %v1224_v39 = vadd.f32 %v2018_v41, %v829_v63  ;;  %v1256_v40 = vadd.f32 %v2018_v41, %v957_v0 }
 0x11d   : > { %v2108_v5 = vpop.f32.mrf.mxu0  ;;  %v2110_v6 = vpop.f32.mrf.mxu1  ;;  %1513 = vst [vmem:[%s2026_s19 + $0x1b0] sm:$0xff] %v1449_v32  ;;  %v1415_v42 = vsel %vm1287_vm10, %v1223_v29, %v1351_v33  ;;  %v1447_v43 = vsel %vm1319_vm11, %v1255_v30, %v1383_v34  ;;  %vm1290_vm12 = vcmp.ge.f32.partialorder %v1226_v37, 0.0  ;;  %v1354_v44 = vmul.f32 0.2, %v1226_v37 }
 0x11e   : > { %1479 = vst [vmem:[%s2026_s19 + $0xa0] sm:$0xff] %v1415_v42  ;;  %1511 = vst [vmem:[%s2026_s19 + $0x1a0] sm:$0xff] %v1447_v43  ;;  %vm1322_vm13 = vcmp.ge.f32.partialorder %v1258_v38, 0.0  ;;  %v1386_v45 = vmul.f32 0.2, %v1258_v38  ;;  %vm1288_vm14 = vcmp.ge.f32.partialorder %v1224_v39, 0.0  ;;  %v1229_v52 = vadd.f32 %v2108_v5, %v2018_v41 }
 0x11f   : > { %v2116_v13 = vpop.f32.mrf.mxu0  ;;  %v2118_v14 = vpop.f32.mrf.mxu1  ;;  %v1352_v46 = vmul.f32 0.2, %v1224_v39  ;;  %vm1320_vm15 = vcmp.ge.f32.partialorder %v1256_v40, 0.0  ;;  %v1384_v47 = vmul.f32 0.2, %v1256_v40  ;;  %v1418_v50 = vsel %vm1290_vm12, %v1226_v37, %v1354_v44 }
 0x120   : > { %v1450_v51 = vsel %vm1322_vm13, %v1258_v38, %v1386_v45  ;;  %v1261_v53 = vadd.f32 %v2110_v6, %v2018_v41  ;;  %1482 = vst [vmem:[%s2026_s19 + $0xb8] sm:$0xff] %v1418_v50  ;;  %vm1293_vm0 = vcmp.ge.f32.partialorder %v1229_v52, 0.0  ;;  %v1357_v56 = vmul.f32 0.2, %v1229_v52 }
 0x121   : > { %v2128_v25 = vpop.f32.mrf.mxu0  ;;  %v2130_v26 = vpop.f32.mrf.mxu1  ;;  %1514 = vst [vmem:[%s2026_s19 + $0x1b8] sm:$0xff] %v1450_v51  ;;  %v1416_v54 = vsel %vm1288_vm14, %v1224_v39, %v1352_v46  ;;  %v1448_v55 = vsel %vm1320_vm15, %v1256_v40, %v1384_v47  ;;  %v1227_v58 = vadd.f32 %v2018_v41, %v2116_v13  ;;  %v1259_v59 = vadd.f32 %v2018_v41, %v2118_v14 }
 0x122   : > { %1480 = vst [vmem:[%s2026_s19 + $0xa8] sm:$0xff] %v1416_v54  ;;  %1512 = vst [vmem:[%s2026_s19 + $0x1a8] sm:$0xff] %v1448_v55  ;;  %vm1325_vm1 = vcmp.ge.f32.partialorder %v1261_v53, 0.0  ;;  %v1389_v57 = vmul.f32 0.2, %v1261_v53  ;;  %v1421_v62 = vsel %vm1293_vm0, %v1229_v52, %v1357_v56  ;;  %v1230_v2 = vadd.f32 %v2128_v25, %v2018_v41 }
 0x123   : > { %v845_v35 = vpop.f32.mrf.mxu0  ;;  %v973_v36 = vpop.f32.mrf.mxu1  ;;  %1485 = vst [vmem:[%s2026_s19 + $0xd0] sm:$0xff] %v1421_v62  ;;  %vm1291_vm2 = vcmp.ge.f32.partialorder %v1227_v58, 0.0  ;;  %v1355_v0 = vmul.f32 0.2, %v1227_v58  ;;  %vm1323_vm3 = vcmp.ge.f32.partialorder %v1259_v59, 0.0  ;;  %v1262_v3 = vadd.f32 %v2130_v26, %v2018_v41 }
 0x124   : > { %v1453_v63 = vsel %vm1325_vm1, %v1261_v53, %v1389_v57  ;;  %v1387_v1 = vmul.f32 0.2, %v1259_v59  ;;  %v1228_v4 = vadd.f32 %v2018_v41, %v845_v35  ;;  %v1260_v5 = vadd.f32 %v2018_v41, %v973_v36 }
 0x125   : > { %v1774_v48 = vpop.f32.mrf.mxu0  ;;  %v1806_v49 = vpop.f32.mrf.mxu1  ;;  %1517 = vst [vmem:[%s2026_s19 + $0x1d0] sm:$0xff] %v1453_v63  ;;  %v1419_v6 = vsel %vm1291_vm2, %v1227_v58, %v1355_v0  ;;  %vm1294_vm4 = vcmp.ge.f32.partialorder %v1230_v2, 0.0  ;;  %v1358_v10 = vmul.f32 0.2, %v1230_v2  ;;  %vm1326_vm5 = vcmp.ge.f32.partialorder %v1262_v3, 0.0 }
 0x126   : > { %v1451_v7 = vsel %vm1323_vm3, %v1259_v59, %v1387_v1  ;;  %1483 = vst [vmem:[%s2026_s19 + $0xc0] sm:$0xff] %v1419_v6  ;;  %v1390_v11 = vmul.f32 0.2, %v1262_v3  ;;  %vm1292_vm6 = vcmp.ge.f32.partialorder %v1228_v4, 0.0  ;;  %v1356_v12 = vmul.f32 0.2, %v1228_v4 }
 0x127   : > { %v858_v60 = vpop.f32.mrf.mxu0  ;;  %v986_v61 = vpop.f32.mrf.mxu1  ;;  %1515 = vst [vmem:[%s2026_s19 + $0x1c0] sm:$0xff] %v1451_v7  ;;  %vm1324_vm7 = vcmp.ge.f32.partialorder %v1260_v5, 0.0  ;;  %v1388_v13 = vmul.f32 0.2, %v1260_v5  ;;  %v1422_v14 = vsel %vm1294_vm4, %v1230_v2, %v1358_v10  ;;  %v1233_v16 = vadd.f32 %v1774_v48, %v2018_v41 }
 0x128   : > { %v1454_v15 = vsel %vm1326_vm5, %v1262_v3, %v1390_v11  ;;  %v1265_v17 = vadd.f32 %v1806_v49, %v2018_v41  ;;  %1486 = vst [vmem:[%s2026_s19 + $0xd8] sm:$0xff] %v1422_v14  ;;  %v1420_v18 = vsel %vm1292_vm6, %v1228_v4, %v1356_v12  ;;  %v1231_v24 = vadd.f32 %v2018_v41, %v858_v60 }
 0x129   : > { %v1775_v8 = vpop.f32.mrf.mxu0  ;;  %v1807_v9 = vpop.f32.mrf.mxu1  ;;  %1518 = vst [vmem:[%s2026_s19 + $0x1d8] sm:$0xff] %v1454_v15  ;;  %v1452_v19 = vsel %vm1324_vm7, %v1260_v5, %v1388_v13  ;;  %1484 = vst [vmem:[%s2026_s19 + $0xc8] sm:$0xff] %v1420_v18  ;;  %vm1297_vm8 = vcmp.ge.f32.partialorder %v1233_v16, 0.0  ;;  %v1361_v22 = vmul.f32 0.2, %v1233_v16  ;;  %v1263_v25 = vadd.f32 %v2018_v41, %v986_v61 }
 0x12a   : > { %1516 = vst [vmem:[%s2026_s19 + $0x1c8] sm:$0xff] %v1452_v19  ;;  %vm1329_vm9 = vcmp.ge.f32.partialorder %v1265_v17, 0.0  ;;  %v1393_v23 = vmul.f32 0.2, %v1265_v17  ;;  %vm1295_vm10 = vcmp.ge.f32.partialorder %v1231_v24, 0.0  ;;  %v1234_v30 = vadd.f32 %v1775_v8, %v2018_v41 }
 0x12b   : > { %v861_v20 = vpop.f32.mrf.mxu0  ;;  %v989_v21 = vpop.f32.mrf.mxu1  ;;  %v1425_v26 = vsel %vm1297_vm8, %v1233_v16, %v1361_v22  ;;  %v1359_v28 = vmul.f32 0.2, %v1231_v24  ;;  %vm1327_vm11 = vcmp.ge.f32.partialorder %v1263_v25, 0.0  ;;  %v1391_v29 = vmul.f32 0.2, %v1263_v25 }
 0x12c   : > { %v1457_v27 = vsel %vm1329_vm9, %v1265_v17, %v1393_v23  ;;  %1489 = vst [vmem:[%s2026_s19 + $0xf0] sm:$0xff] %v1425_v26  ;;  %v1266_v31 = vadd.f32 %v1807_v9, %v2018_v41  ;;  %v1232_v32 = vadd.f32 %v2018_v41, %v861_v20  ;;  %v1264_v33 = vadd.f32 %v2018_v41, %v989_v21 }
 0x12d   : > { %1521 = vst [vmem:[%s2026_s19 + $0x1f0] sm:$0xff] %v1457_v27  ;;  %v1423_v34 = vsel %vm1295_vm10, %v1231_v24, %v1359_v28  ;;  %v1455_v35 = vsel %vm1327_vm11, %v1263_v25, %v1391_v29  ;;  %vm1298_vm12 = vcmp.ge.f32.partialorder %v1234_v30, 0.0  ;;  %v1362_v36 = vmul.f32 0.2, %v1234_v30 }
 0x12e   : > { %1487 = vst [vmem:[%s2026_s19 + $0xe0] sm:$0xff] %v1423_v34  ;;  %1519 = vst [vmem:[%s2026_s19 + $0x1e0] sm:$0xff] %v1455_v35  ;;  %vm1330_vm13 = vcmp.ge.f32.partialorder %v1266_v31, 0.0  ;;  %v1394_v37 = vmul.f32 0.2, %v1266_v31  ;;  %vm1296_vm14 = vcmp.ge.f32.partialorder %v1232_v32, 0.0 }
 0x12f   : > { %v1360_v38 = vmul.f32 0.2, %v1232_v32  ;;  %vm1328_vm15 = vcmp.ge.f32.partialorder %v1264_v33, 0.0  ;;  %v1392_v39 = vmul.f32 0.2, %v1264_v33  ;;  %v1426_v40 = vsel %vm1298_vm12, %v1234_v30, %v1362_v36 }
 0x130   : > { %v1458_v42 = vsel %vm1330_vm13, %v1266_v31, %v1394_v37  ;;  %1490 = vst [vmem:[%s2026_s19 + $0xf8] sm:$0xff] %v1426_v40 }
 0x131   : > { %1522 = vst [vmem:[%s2026_s19 + $0x1f8] sm:$0xff] %v1458_v42  ;;  %v1424_v41 = vsel %vm1296_vm14, %v1232_v32, %v1360_v38  ;;  %v1456_v43 = vsel %vm1328_vm15, %v1264_v33, %v1392_v39 }
 0x132   : > { %1488 = vst [vmem:[%s2026_s19 + $0xe8] sm:$0xff] %v1424_v41  ;;  %1520 = vst [vmem:[%s2026_s19 + $0x1e8] sm:$0xff] %v1456_v43 }
 0x133 PF: > { %s13_s14 = sadd.s32 1, %s1911_s14   ;;  %s2203_s12 = smov %s1907_s13 }
 0x134   : > { %p10_p5 = scmp.ge.s32.totalorder %s13_s14, 4   ;;  %s2204_s13 = smov %s2206_s15 }
 0x136   :  { %12 = sbr.rel (!%p10_p5) target bundleno = 2 (0x2), region = 76 }

// kernel: apply.5
= control target key start
LH: loop header
LB: loop body
LE: loop exit
PB: predicated region body
PF: predicated region fallthrough
CT: control target
= control target key end

     0   :  { %s2674_s12 = smov 0   ;;  %s2676_s13 = smov 0   ;;  %s3423_s0 = inlined_call_operand.vmem [shape: bf16[768,4096], index: 0, kind: input, shape index: {}]   ;;  %s3424_s1 = inlined_call_operand.vmem [shape: bf16[4096,128], index: 1, kind: input, shape index: {}]   ;;  %s3425_s2 = inlined_call_operand.vmem [shape: f32[1,128], index: 2, kind: input, shape index: {}]   ;;  %s3426_s3 = inlined_call_operand.vmem [shape: f32[768,128], index: 3, kind: output, shape index: {}]  }
   0x1   :  { %s2678_s14 = smov 0   ;;  %s2680_s15 = smov 0  }
   0x2   :  { %s2682_s16 = smov 0   ;;  %s2684_s17 = smov 0  }
   0x3   :  { %s2686_s18 = smov 0  }
   0x4 LB: > { %s25_s19 = sadd.s32 1, %s2642_s16  ;;  %s32_s20 = sadd.s32 1, %s2646_s17  ;;  %s2650_s18 = sphi %s2686_s18, %s13_s18   ;;  %s2646_s17 = sphi %s2684_s17, %s3432_s17   ;;  %s2642_s16 = sphi %s2682_s16, %s3431_s16   ;;  %s2638_s15 = sphi %s2680_s15, %s3430_s15   ;;  %s2634_s14 = sphi %s2678_s14, %s3429_s14   ;;  %s2630_s13 = sphi %s2676_s13, %s3428_s13   ;;  %s2626_s12 = sphi %s2674_s12, %s3427_s12  }
   0x5   : > { %p26_p0 = scmp.ge.s32.totalorder %s25_s19, 8  ;;  %p48_p1 = scmp.ne.s32.totalorder %s2630_s13, %s2626_s12 }
   0x6   : > { %p49_p2 = scmp.eq.s32.totalorder %s2650_s18, 0  ;;  %s41_s24 = sadd.s32 1, %s2630_s13 }
   0x7   : > { %s3434_s19 = smov (%p26_p0, %s25_s19), 0  ;;  %s3436_s20 = smov (!%p26_p0, %s32_s20), %s2646_s17 }
   0x8   : > { %p50_p3 = por %p49_p2, %p48_p1  ;;  %p34_p4 = scmp.ge.s32.totalorder %s3436_s20, 2 }
   0x9   : > { %s37_s21 = ssub.s32 %s2642_s16, %s3434_s19  ;;  %p2218_p6 = scmp.ge.s32.totalorder %s2650_s18, 16 }
   0xa   : > { %s3438_s20 = smov (%p34_p4, %s3436_s20), 0 }
   0xb   : > { %s36_s22 = ssub.s32 %s2646_s17, %s3438_s20  ;;  %162 = sbr.rel (%p2218_p6) target bundleno = 72 (0x48), region = 20 }
   0xc   : > { %s38_s23 = sor.u32 %s37_s21, %s36_s22 }
   0xd   : > { %p39_p5 = scmp.eq.s32.totalorder %s38_s23, 0 }
   0xf   : > { %s2725_s25 = scalar_select %p39_p5, %s2630_s13, %s41_s24  }
  0x10   : > { %165 = sbr.rel (!%p50_p3) target bundleno = 72 (0x48), region = 24  ;;  %s167_s26 = sand.u32 (%p50_p3), 1, %s2630_s13  }
  0x11   : > { %s2360_s27 = smul.u32 (%p50_p3), 768, %s167_s26  ;;  %s2219_s28 = sshll.u32 (%p50_p3), %s2642_s16, 2 }
  0x12   : > { %s2359_s29 = smul.u32 (%p50_p3), 1536, %s2646_s17 }
  0x13   : > { %s2739_s8 = scalar_lea.vmem (%p50_p3), [#allocation2], %s2360_s27 }
  0x14   : > { %s173_s30 = sadd.s32 (%p50_p3), %s2359_s29, %s2219_s28 }
  0x15   : > { %s2221_s4 = sshll.u32 %s173_s30, 2 }
  0x16   : > { %s2734_s7 = scalar_lea.vmem %s3423_s0, %s2221_s4 }
  0x17   : > { %v188_v0 = vld [vmem:[%s2734_s7] sm:$0xff]  ;;  %v190_v1 = vld [vmem:[%s2734_s7 + $0x8] sm:$0xff] }
  0x18   : > { %v192_v2 = vld [vmem:[%s2734_s7 + $0x80] sm:$0xff]  ;;  %189 = vst [vmem:[%s2739_s8] sm:$0xff] %v188_v0  ;;  %191 = vst [vmem:[%s2739_s8 + $0x8] sm:$0xff] %v190_v1  ;;  %v194_v3 = vld [vmem:[%s2734_s7 + $0x88] sm:$0xff] }
  0x19   : > { %193 = vst [vmem:[%s2739_s8 + $0x10] sm:$0xff] %v192_v2  ;;  %v196_v4 = vld [vmem:[%s2734_s7 + $0x100] sm:$0xff]  ;;  %v198_v5 = vld [vmem:[%s2734_s7 + $0x108] sm:$0xff]  ;;  %195 = vst [vmem:[%s2739_s8 + $0x18] sm:$0xff] %v194_v3 }
  0x1a   : > { %197 = vst [vmem:[%s2739_s8 + $0x20] sm:$0xff] %v196_v4  ;;  %199 = vst [vmem:[%s2739_s8 + $0x28] sm:$0xff] %v198_v5  ;;  %v200_v6 = vld [vmem:[%s2734_s7 + $0x180] sm:$0xff]  ;;  %v202_v7 = vld [vmem:[%s2734_s7 + $0x188] sm:$0xff] }
  0x1b   : > { %v204_v8 = vld [vmem:[%s2734_s7 + $0x200] sm:$0xff]  ;;  %201 = vst [vmem:[%s2739_s8 + $0x30] sm:$0xff] %v200_v6  ;;  %203 = vst [vmem:[%s2739_s8 + $0x38] sm:$0xff] %v202_v7  ;;  %v206_v9 = vld [vmem:[%s2734_s7 + $0x208] sm:$0xff] }
  0x1c   : > { %205 = vst [vmem:[%s2739_s8 + $0x40] sm:$0xff] %v204_v8  ;;  %v208_v10 = vld [vmem:[%s2734_s7 + $0x280] sm:$0xff]  ;;  %v210_v11 = vld [vmem:[%s2734_s7 + $0x288] sm:$0xff]  ;;  %207 = vst [vmem:[%s2739_s8 + $0x48] sm:$0xff] %v206_v9 }
  0x1d   : > { %209 = vst [vmem:[%s2739_s8 + $0x50] sm:$0xff] %v208_v10  ;;  %211 = vst [vmem:[%s2739_s8 + $0x58] sm:$0xff] %v210_v11  ;;  %v212_v12 = vld [vmem:[%s2734_s7 + $0x300] sm:$0xff]  ;;  %v214_v13 = vld [vmem:[%s2734_s7 + $0x308] sm:$0xff] }
  0x1e   : > { %v216_v14 = vld [vmem:[%s2734_s7 + $0x380] sm:$0xff]  ;;  %213 = vst [vmem:[%s2739_s8 + $0x60] sm:$0xff] %v212_v12  ;;  %215 = vst [vmem:[%s2739_s8 + $0x68] sm:$0xff] %v214_v13  ;;  %v218_v15 = vld [vmem:[%s2734_s7 + $0x388] sm:$0xff] }
  0x1f   : > { %217 = vst [vmem:[%s2739_s8 + $0x70] sm:$0xff] %v216_v14  ;;  %v220_v16 = vld [vmem:[%s2734_s7 + $0x400] sm:$0xff]  ;;  %v222_v17 = vld [vmem:[%s2734_s7 + $0x408] sm:$0xff]  ;;  %219 = vst [vmem:[%s2739_s8 + $0x78] sm:$0xff] %v218_v15 }
  0x20   : > { %221 = vst [vmem:[%s2739_s8 + $0x80] sm:$0xff] %v220_v16  ;;  %223 = vst [vmem:[%s2739_s8 + $0x88] sm:$0xff] %v222_v17  ;;  %v224_v18 = vld [vmem:[%s2734_s7 + $0x480] sm:$0xff]  ;;  %v226_v19 = vld [vmem:[%s2734_s7 + $0x488] sm:$0xff] }
  0x21   : > { %v228_v20 = vld [vmem:[%s2734_s7 + $0x500] sm:$0xff]  ;;  %225 = vst [vmem:[%s2739_s8 + $0x90] sm:$0xff] %v224_v18  ;;  %227 = vst [vmem:[%s2739_s8 + $0x98] sm:$0xff] %v226_v19  ;;  %v230_v21 = vld [vmem:[%s2734_s7 + $0x508] sm:$0xff] }
  0x22   : > { %229 = vst [vmem:[%s2739_s8 + $0xa0] sm:$0xff] %v228_v20  ;;  %v232_v22 = vld [vmem:[%s2734_s7 + $0x580] sm:$0xff]  ;;  %v234_v23 = vld [vmem:[%s2734_s7 + $0x588] sm:$0xff]  ;;  %231 = vst [vmem:[%s2739_s8 + $0xa8] sm:$0xff] %v230_v21 }
  0x23   : > { %233 = vst [vmem:[%s2739_s8 + $0xb0] sm:$0xff] %v232_v22  ;;  %235 = vst [vmem:[%s2739_s8 + $0xb8] sm:$0xff] %v234_v23  ;;  %v236_v24 = vld [vmem:[%s2734_s7 + $0x600] sm:$0xff]  ;;  %v238_v25 = vld [vmem:[%s2734_s7 + $0x608] sm:$0xff] }
  0x24   : > { %v240_v26 = vld [vmem:[%s2734_s7 + $0x680] sm:$0xff]  ;;  %237 = vst [vmem:[%s2739_s8 + $0xc0] sm:$0xff] %v236_v24  ;;  %239 = vst [vmem:[%s2739_s8 + $0xc8] sm:$0xff] %v238_v25  ;;  %v242_v27 = vld [vmem:[%s2734_s7 + $0x688] sm:$0xff] }
  0x25   : > { %241 = vst [vmem:[%s2739_s8 + $0xd0] sm:$0xff] %v240_v26  ;;  %v244_v28 = vld [vmem:[%s2734_s7 + $0x700] sm:$0xff]  ;;  %v246_v29 = vld [vmem:[%s2734_s7 + $0x708] sm:$0xff]  ;;  %243 = vst [vmem:[%s2739_s8 + $0xd8] sm:$0xff] %v242_v27 }
  0x26   : > { %245 = vst [vmem:[%s2739_s8 + $0xe0] sm:$0xff] %v244_v28  ;;  %247 = vst [vmem:[%s2739_s8 + $0xe8] sm:$0xff] %v246_v29  ;;  %v248_v30 = vld [vmem:[%s2734_s7 + $0x780] sm:$0xff]  ;;  %v250_v31 = vld [vmem:[%s2734_s7 + $0x788] sm:$0xff] }
  0x27   : > { %v252_v32 = vld [vmem:[%s2734_s7 + $0x800] sm:$0xff]  ;;  %249 = vst [vmem:[%s2739_s8 + $0xf0] sm:$0xff] %v248_v30  ;;  %251 = vst [vmem:[%s2739_s8 + $0xf8] sm:$0xff] %v250_v31  ;;  %v254_v33 = vld [vmem:[%s2734_s7 + $0x808] sm:$0xff] }
  0x28   : > { %253 = vst [vmem:[%s2739_s8 + $0x100] sm:$0xff] %v252_v32  ;;  %v256_v34 = vld [vmem:[%s2734_s7 + $0x880] sm:$0xff]  ;;  %v258_v35 = vld [vmem:[%s2734_s7 + $0x888] sm:$0xff]  ;;  %255 = vst [vmem:[%s2739_s8 + $0x108] sm:$0xff] %v254_v33 }
  0x29   : > { %257 = vst [vmem:[%s2739_s8 + $0x110] sm:$0xff] %v256_v34  ;;  %259 = vst [vmem:[%s2739_s8 + $0x118] sm:$0xff] %v258_v35  ;;  %v260_v36 = vld [vmem:[%s2734_s7 + $0x900] sm:$0xff]  ;;  %v262_v37 = vld [vmem:[%s2734_s7 + $0x908] sm:$0xff] }
  0x2a   : > { %v264_v38 = vld [vmem:[%s2734_s7 + $0x980] sm:$0xff]  ;;  %261 = vst [vmem:[%s2739_s8 + $0x120] sm:$0xff] %v260_v36  ;;  %263 = vst [vmem:[%s2739_s8 + $0x128] sm:$0xff] %v262_v37  ;;  %v266_v39 = vld [vmem:[%s2734_s7 + $0x988] sm:$0xff] }
  0x2b   : > { %265 = vst [vmem:[%s2739_s8 + $0x130] sm:$0xff] %v264_v38  ;;  %v268_v40 = vld [vmem:[%s2734_s7 + $0xa00] sm:$0xff]  ;;  %v270_v41 = vld [vmem:[%s2734_s7 + $0xa08] sm:$0xff]  ;;  %267 = vst [vmem:[%s2739_s8 + $0x138] sm:$0xff] %v266_v39 }
  0x2c   : > { %269 = vst [vmem:[%s2739_s8 + $0x140] sm:$0xff] %v268_v40  ;;  %271 = vst [vmem:[%s2739_s8 + $0x148] sm:$0xff] %v270_v41  ;;  %v272_v42 = vld [vmem:[%s2734_s7 + $0xa80] sm:$0xff]  ;;  %v274_v43 = vld [vmem:[%s2734_s7 + $0xa88] sm:$0xff] }
  0x2d   : > { %v276_v44 = vld [vmem:[%s2734_s7 + $0xb00] sm:$0xff]  ;;  %273 = vst [vmem:[%s2739_s8 + $0x150] sm:$0xff] %v272_v42  ;;  %275 = vst [vmem:[%s2739_s8 + $0x158] sm:$0xff] %v274_v43  ;;  %v278_v45 = vld [vmem:[%s2734_s7 + $0xb08] sm:$0xff] }
  0x2e   : > { %277 = vst [vmem:[%s2739_s8 + $0x160] sm:$0xff] %v276_v44  ;;  %v280_v46 = vld [vmem:[%s2734_s7 + $0xb80] sm:$0xff]  ;;  %v282_v47 = vld [vmem:[%s2734_s7 + $0xb88] sm:$0xff]  ;;  %279 = vst [vmem:[%s2739_s8 + $0x168] sm:$0xff] %v278_v45 }
  0x2f   : > { %281 = vst [vmem:[%s2739_s8 + $0x170] sm:$0xff] %v280_v46  ;;  %283 = vst [vmem:[%s2739_s8 + $0x178] sm:$0xff] %v282_v47  ;;  %v284_v48 = vld [vmem:[%s2734_s7 + $0xc00] sm:$0xff]  ;;  %v286_v49 = vld [vmem:[%s2734_s7 + $0xc08] sm:$0xff] }
  0x30   : > { %v288_v50 = vld [vmem:[%s2734_s7 + $0xc80] sm:$0xff]  ;;  %285 = vst [vmem:[%s2739_s8 + $0x180] sm:$0xff] %v284_v48  ;;  %287 = vst [vmem:[%s2739_s8 + $0x188] sm:$0xff] %v286_v49  ;;  %v290_v51 = vld [vmem:[%s2734_s7 + $0xc88] sm:$0xff] }
  0x31   : > { %289 = vst [vmem:[%s2739_s8 + $0x190] sm:$0xff] %v288_v50  ;;  %v292_v52 = vld [vmem:[%s2734_s7 + $0xd00] sm:$0xff]  ;;  %v294_v53 = vld [vmem:[%s2734_s7 + $0xd08] sm:$0xff]  ;;  %291 = vst [vmem:[%s2739_s8 + $0x198] sm:$0xff] %v290_v51 }
  0x32   : > { %293 = vst [vmem:[%s2739_s8 + $0x1a0] sm:$0xff] %v292_v52  ;;  %295 = vst [vmem:[%s2739_s8 + $0x1a8] sm:$0xff] %v294_v53  ;;  %v296_v54 = vld [vmem:[%s2734_s7 + $0xd80] sm:$0xff]  ;;  %v298_v55 = vld [vmem:[%s2734_s7 + $0xd88] sm:$0xff] }
  0x33   : > { %v300_v56 = vld [vmem:[%s2734_s7 + $0xe00] sm:$0xff]  ;;  %297 = vst [vmem:[%s2739_s8 + $0x1b0] sm:$0xff] %v296_v54  ;;  %299 = vst [vmem:[%s2739_s8 + $0x1b8] sm:$0xff] %v298_v55  ;;  %v302_v57 = vld [vmem:[%s2734_s7 + $0xe08] sm:$0xff] }
  0x34   : > { %301 = vst [vmem:[%s2739_s8 + $0x1c0] sm:$0xff] %v300_v56  ;;  %v304_v58 = vld [vmem:[%s2734_s7 + $0xe80] sm:$0xff]  ;;  %v306_v59 = vld [vmem:[%s2734_s7 + $0xe88] sm:$0xff]  ;;  %303 = vst [vmem:[%s2739_s8 + $0x1c8] sm:$0xff] %v302_v57 }
  0x35   : > { %305 = vst [vmem:[%s2739_s8 + $0x1d0] sm:$0xff] %v304_v58  ;;  %307 = vst [vmem:[%s2739_s8 + $0x1d8] sm:$0xff] %v306_v59  ;;  %v308_v60 = vld [vmem:[%s2734_s7 + $0xf00] sm:$0xff]  ;;  %v310_v61 = vld [vmem:[%s2734_s7 + $0xf08] sm:$0xff] }
  0x36   : > { %v312_v62 = vld [vmem:[%s2734_s7 + $0xf80] sm:$0xff]  ;;  %309 = vst [vmem:[%s2739_s8 + $0x1e0] sm:$0xff] %v308_v60  ;;  %311 = vst [vmem:[%s2739_s8 + $0x1e8] sm:$0xff] %v310_v61  ;;  %v314_v63 = vld [vmem:[%s2734_s7 + $0xf88] sm:$0xff] }
  0x37   : > { %313 = vst [vmem:[%s2739_s8 + $0x1f0] sm:$0xff] %v312_v62  ;;  %v316_v0 = vld [vmem:[%s2734_s7 + $0x1000] sm:$0xff]  ;;  %v318_v1 = vld [vmem:[%s2734_s7 + $0x1008] sm:$0xff]  ;;  %315 = vst [vmem:[%s2739_s8 + $0x1f8] sm:$0xff] %v314_v63 }
  0x38   : > { %317 = vst [vmem:[%s2739_s8 + $0x200] sm:$0xff] %v316_v0  ;;  %319 = vst [vmem:[%s2739_s8 + $0x208] sm:$0xff] %v318_v1  ;;  %v320_v2 = vld [vmem:[%s2734_s7 + $0x1080] sm:$0xff]  ;;  %v322_v3 = vld [vmem:[%s2734_s7 + $0x1088] sm:$0xff] }
  0x39   : > { %v324_v4 = vld [vmem:[%s2734_s7 + $0x1100] sm:$0xff]  ;;  %321 = vst [vmem:[%s2739_s8 + $0x210] sm:$0xff] %v320_v2  ;;  %323 = vst [vmem:[%s2739_s8 + $0x218] sm:$0xff] %v322_v3  ;;  %v326_v5 = vld [vmem:[%s2734_s7 + $0x1108] sm:$0xff] }
  0x3a   : > { %325 = vst [vmem:[%s2739_s8 + $0x220] sm:$0xff] %v324_v4  ;;  %v328_v6 = vld [vmem:[%s2734_s7 + $0x1180] sm:$0xff]  ;;  %v330_v7 = vld [vmem:[%s2734_s7 + $0x1188] sm:$0xff]  ;;  %327 = vst [vmem:[%s2739_s8 + $0x228] sm:$0xff] %v326_v5 }
  0x3b   : > { %329 = vst [vmem:[%s2739_s8 + $0x230] sm:$0xff] %v328_v6  ;;  %331 = vst [vmem:[%s2739_s8 + $0x238] sm:$0xff] %v330_v7  ;;  %v332_v8 = vld [vmem:[%s2734_s7 + $0x1200] sm:$0xff]  ;;  %v334_v9 = vld [vmem:[%s2734_s7 + $0x1208] sm:$0xff] }
  0x3c   : > { %v336_v10 = vld [vmem:[%s2734_s7 + $0x1280] sm:$0xff]  ;;  %333 = vst [vmem:[%s2739_s8 + $0x240] sm:$0xff] %v332_v8  ;;  %335 = vst [vmem:[%s2739_s8 + $0x248] sm:$0xff] %v334_v9  ;;  %v338_v11 = vld [vmem:[%s2734_s7 + $0x1288] sm:$0xff] }
  0x3d   : > { %337 = vst [vmem:[%s2739_s8 + $0x250] sm:$0xff] %v336_v10  ;;  %v340_v12 = vld [vmem:[%s2734_s7 + $0x1300] sm:$0xff]  ;;  %v342_v13 = vld [vmem:[%s2734_s7 + $0x1308] sm:$0xff]  ;;  %339 = vst [vmem:[%s2739_s8 + $0x258] sm:$0xff] %v338_v11 }
  0x3e   : > { %341 = vst [vmem:[%s2739_s8 + $0x260] sm:$0xff] %v340_v12  ;;  %343 = vst [vmem:[%s2739_s8 + $0x268] sm:$0xff] %v342_v13  ;;  %v344_v14 = vld [vmem:[%s2734_s7 + $0x1380] sm:$0xff]  ;;  %v346_v15 = vld [vmem:[%s2734_s7 + $0x1388] sm:$0xff] }
  0x3f   : > { %v348_v16 = vld [vmem:[%s2734_s7 + $0x1400] sm:$0xff]  ;;  %345 = vst [vmem:[%s2739_s8 + $0x270] sm:$0xff] %v344_v14  ;;  %347 = vst [vmem:[%s2739_s8 + $0x278] sm:$0xff] %v346_v15  ;;  %v350_v17 = vld [vmem:[%s2734_s7 + $0x1408] sm:$0xff] }
  0x40   : > { %349 = vst [vmem:[%s2739_s8 + $0x280] sm:$0xff] %v348_v16  ;;  %v352_v18 = vld [vmem:[%s2734_s7 + $0x1480] sm:$0xff]  ;;  %v354_v19 = vld [vmem:[%s2734_s7 + $0x1488] sm:$0xff]  ;;  %351 = vst [vmem:[%s2739_s8 + $0x288] sm:$0xff] %v350_v17 }
  0x41   : > { %353 = vst [vmem:[%s2739_s8 + $0x290] sm:$0xff] %v352_v18  ;;  %355 = vst [vmem:[%s2739_s8 + $0x298] sm:$0xff] %v354_v19  ;;  %v356_v20 = vld [vmem:[%s2734_s7 + $0x1500] sm:$0xff]  ;;  %v358_v21 = vld [vmem:[%s2734_s7 + $0x1508] sm:$0xff] }
  0x42   : > { %v360_v22 = vld [vmem:[%s2734_s7 + $0x1580] sm:$0xff]  ;;  %357 = vst [vmem:[%s2739_s8 + $0x2a0] sm:$0xff] %v356_v20  ;;  %359 = vst [vmem:[%s2739_s8 + $0x2a8] sm:$0xff] %v358_v21  ;;  %v362_v23 = vld [vmem:[%s2734_s7 + $0x1588] sm:$0xff] }
  0x43   : > { %361 = vst [vmem:[%s2739_s8 + $0x2b0] sm:$0xff] %v360_v22  ;;  %v364_v24 = vld [vmem:[%s2734_s7 + $0x1600] sm:$0xff]  ;;  %v366_v25 = vld [vmem:[%s2734_s7 + $0x1608] sm:$0xff]  ;;  %363 = vst [vmem:[%s2739_s8 + $0x2b8] sm:$0xff] %v362_v23 }
  0x44   : > { %365 = vst [vmem:[%s2739_s8 + $0x2c0] sm:$0xff] %v364_v24  ;;  %367 = vst [vmem:[%s2739_s8 + $0x2c8] sm:$0xff] %v366_v25  ;;  %v368_v26 = vld [vmem:[%s2734_s7 + $0x1680] sm:$0xff]  ;;  %v370_v27 = vld [vmem:[%s2734_s7 + $0x1688] sm:$0xff] }
  0x45   : > { %v372_v28 = vld [vmem:[%s2734_s7 + $0x1700] sm:$0xff]  ;;  %369 = vst [vmem:[%s2739_s8 + $0x2d0] sm:$0xff] %v368_v26  ;;  %371 = vst [vmem:[%s2739_s8 + $0x2d8] sm:$0xff] %v370_v27  ;;  %v374_v29 = vld [vmem:[%s2734_s7 + $0x1708] sm:$0xff] }
  0x46   : > { %373 = vst [vmem:[%s2739_s8 + $0x2e0] sm:$0xff] %v372_v28  ;;  %v376_v30 = vld [vmem:[%s2734_s7 + $0x1780] sm:$0xff]  ;;  %v378_v31 = vld [vmem:[%s2734_s7 + $0x1788] sm:$0xff]  ;;  %375 = vst [vmem:[%s2739_s8 + $0x2e8] sm:$0xff] %v374_v29 }
  0x47   : > { %377 = vst [vmem:[%s2739_s8 + $0x2f0] sm:$0xff] %v376_v30  ;;  %379 = vst [vmem:[%s2739_s8 + $0x2f8] sm:$0xff] %v378_v31 }
  0x48 PF: > { %p2222_p7 = scmp.ge.s32.totalorder %s2650_s18, 1  ;;  %p396_p8 = scmp.lt.s32.totalorder %s2650_s18, 17 }
  0x4a   : > { %p397_p9 = pnand %p2222_p7, %p396_p8 }
  0x4b   : > { %s403_s9 = sand.u32 (!%p397_p9), 1, %s2626_s12   ;;  %s2223_s10 = sshll.u32 (!%p397_p9), %s2634_s14, 6 }
  0x4c   : > { %400 = sbr.rel (%p397_p9) target bundleno = 590 (0x24e), region = 51  ;;  %p443_p10 = scmp.lt.s32.totalorder (!%p397_p9), %s2223_s10, 511 }
  0x4d   : > { %s2361_s11 = smul.u32 (!%p397_p9), 768, %s403_s9  ;;  %p2226_p12 = scmp.ne.s32.totalorder (!%p397_p9), %s2634_s14, 0 }
  0x4e   : > { %s454_s21 = smul.u32 (!%p397_p9), 48, %s2638_s15 }
  0x4f   : > { %s2945_s12 = scalar_lea.vmem (!%p397_p9), [#allocation2], %s2361_s11 }
  0x50   : > { %p455_p11 = scmp.lt.s32.totalorder (!%p397_p9), %s454_s21, 95 }
  0x51   : > { %s3440_s10 = smov (!%p443_p10, %s2223_s10), 511  ;;  %467 = sbr.rel (%p2226_p12) target bundleno = 111 (0x6f), region = 59 }
  0x52   : > { %s2224_s22 = sshll.u32 %s3440_s10, 2  ;;  %s3442_s21 = smov (!%p455_p11, %s454_s21), 95 }
  0x53   : > { %s2938_s26 = scalar_lea.vmem %s3424_s1, %s2224_s22  ;;  %s2225_s27 = sshll.u32 %s3442_s21, 3 }
  0x54   : > { %s2943_s30 = scalar_lea.vmem %s3426_s3, %s2225_s27 }
  0x56   : > { %v2652_v32 = vmov 0.0  }
  0x57   : > { %468 = vst [vmem:[%s2943_s30] sm:$0xff] %v2652_v32  ;;  %469 = vst [vmem:[%s2943_s30 + $0x8] sm:$0xff] %v2652_v32 }
  0x58   : > { %470 = vst [vmem:[%s2943_s30 + $0x10] sm:$0xff] %v2652_v32  ;;  %471 = vst [vmem:[%s2943_s30 + $0x18] sm:$0xff] %v2652_v32 }
  0x59   : > { %472 = vst [vmem:[%s2943_s30 + $0x20] sm:$0xff] %v2652_v32  ;;  %473 = vst [vmem:[%s2943_s30 + $0x28] sm:$0xff] %v2652_v32 }
  0x5a   : > { %474 = vst [vmem:[%s2943_s30 + $0x30] sm:$0xff] %v2652_v32  ;;  %475 = vst [vmem:[%s2943_s30 + $0x38] sm:$0xff] %v2652_v32 }
  0x5b   : > { %476 = vst [vmem:[%s2943_s30 + $0x40] sm:$0xff] %v2652_v32  ;;  %477 = vst [vmem:[%s2943_s30 + $0x48] sm:$0xff] %v2652_v32 }
  0x5c   : > { %478 = vst [vmem:[%s2943_s30 + $0x50] sm:$0xff] %v2652_v32  ;;  %479 = vst [vmem:[%s2943_s30 + $0x58] sm:$0xff] %v2652_v32 }
  0x5d   : > { %480 = vst [vmem:[%s2943_s30 + $0x60] sm:$0xff] %v2652_v32  ;;  %481 = vst [vmem:[%s2943_s30 + $0x68] sm:$0xff] %v2652_v32 }
  0x5e   : > { %482 = vst [vmem:[%s2943_s30 + $0x70] sm:$0xff] %v2652_v32  ;;  %483 = vst [vmem:[%s2943_s30 + $0x78] sm:$0xff] %v2652_v32 }
  0x5f   : > { %484 = vst [vmem:[%s2943_s30 + $0x80] sm:$0xff] %v2652_v32  ;;  %485 = vst [vmem:[%s2943_s30 + $0x88] sm:$0xff] %v2652_v32 }
  0x60   : > { %486 = vst [vmem:[%s2943_s30 + $0x90] sm:$0xff] %v2652_v32  ;;  %487 = vst [vmem:[%s2943_s30 + $0x98] sm:$0xff] %v2652_v32 }
  0x61   : > { %488 = vst [vmem:[%s2943_s30 + $0xa0] sm:$0xff] %v2652_v32  ;;  %489 = vst [vmem:[%s2943_s30 + $0xa8] sm:$0xff] %v2652_v32 }
  0x62   : > { %490 = vst [vmem:[%s2943_s30 + $0xb0] sm:$0xff] %v2652_v32  ;;  %491 = vst [vmem:[%s2943_s30 + $0xb8] sm:$0xff] %v2652_v32 }
  0x63   : > { %492 = vst [vmem:[%s2943_s30 + $0xc0] sm:$0xff] %v2652_v32  ;;  %493 = vst [vmem:[%s2943_s30 + $0xc8] sm:$0xff] %v2652_v32 }
  0x64   : > { %494 = vst [vmem:[%s2943_s30 + $0xd0] sm:$0xff] %v2652_v32  ;;  %495 = vst [vmem:[%s2943_s30 + $0xd8] sm:$0xff] %v2652_v32 }
  0x65   : > { %496 = vst [vmem:[%s2943_s30 + $0xe0] sm:$0xff] %v2652_v32  ;;  %497 = vst [vmem:[%s2943_s30 + $0xe8] sm:$0xff] %v2652_v32 }
  0x66   : > { %498 = vst [vmem:[%s2943_s30 + $0xf0] sm:$0xff] %v2652_v32  ;;  %499 = vst [vmem:[%s2943_s30 + $0xf8] sm:$0xff] %v2652_v32 }
  0x67   : > { %500 = vst [vmem:[%s2943_s30 + $0x100] sm:$0xff] %v2652_v32  ;;  %501 = vst [vmem:[%s2943_s30 + $0x108] sm:$0xff] %v2652_v32 }
  0x68   : > { %502 = vst [vmem:[%s2943_s30 + $0x110] sm:$0xff] %v2652_v32  ;;  %503 = vst [vmem:[%s2943_s30 + $0x118] sm:$0xff] %v2652_v32 }
  0x69   : > { %504 = vst [vmem:[%s2943_s30 + $0x120] sm:$0xff] %v2652_v32  ;;  %505 = vst [vmem:[%s2943_s30 + $0x128] sm:$0xff] %v2652_v32 }
  0x6a   : > { %506 = vst [vmem:[%s2943_s30 + $0x130] sm:$0xff] %v2652_v32  ;;  %507 = vst [vmem:[%s2943_s30 + $0x138] sm:$0xff] %v2652_v32 }
  0x6b   : > { %508 = vst [vmem:[%s2943_s30 + $0x140] sm:$0xff] %v2652_v32  ;;  %509 = vst [vmem:[%s2943_s30 + $0x148] sm:$0xff] %v2652_v32 }
  0x6c   : > { %510 = vst [vmem:[%s2943_s30 + $0x150] sm:$0xff] %v2652_v32  ;;  %511 = vst [vmem:[%s2943_s30 + $0x158] sm:$0xff] %v2652_v32 }
  0x6d   : > { %512 = vst [vmem:[%s2943_s30 + $0x160] sm:$0xff] %v2652_v32  ;;  %513 = vst [vmem:[%s2943_s30 + $0x168] sm:$0xff] %v2652_v32 }
  0x6e   : > { %514 = vst [vmem:[%s2943_s30 + $0x170] sm:$0xff] %v2652_v32  ;;  %515 = vst [vmem:[%s2943_s30 + $0x178] sm:$0xff] %v2652_v32 }
  0x6f PF: > { %v2420_v33 = vld [vmem:[%s2938_s26 + $0x38] sm:$0xff]   ;;  %v2653_v34 = vmov 0   ;;  %v2422_v36 = vld [vmem:[%s2938_s26 + $0x30] sm:$0xff]   ;;  %v2424_v38 = vld [vmem:[%s2938_s26 + $0x28] sm:$0xff]   ;;  %p2355_p13 = scmp.ne.s32.totalorder %s2634_s14, 7 }
  0x70   : > { %1396 = vmatprep.subr.bf16.mxu0 %v2653_v34  ;;  %1621 = vmatprep.subr.bf16.mxu1 %v2653_v34  ;;  %v2421_v35 = vld [vmem:[%s2938_s26 + $0xb8] sm:$0xff]   ;;  %v2423_v37 = vld [vmem:[%s2938_s26 + $0xb0] sm:$0xff]   ;;  %v2425_v39 = vld [vmem:[%s2938_s26 + $0xa8] sm:$0xff]  }
  0x71   : > { %1397 = vmatpush1.bf16.msra.mxu0 %v2420_v33  ;;  %1622 = vmatpush1.bf16.msra.mxu1 %v2421_v35  ;;  %v2426_v40 = vld [vmem:[%s2938_s26 + $0x20] sm:$0xff]   ;;  %v2428_v42 = vld [vmem:[%s2938_s26 + $0x18] sm:$0xff]   ;;  %v2430_v44 = vld [vmem:[%s2938_s26 + $0x10] sm:$0xff]  }
  0x72   : > { %1398 = vmatprep.subr.bf16.mxu0 %v2653_v34  ;;  %1623 = vmatprep.subr.bf16.mxu1 %v2653_v34  ;;  %v2427_v41 = vld [vmem:[%s2938_s26 + $0xa0] sm:$0xff]   ;;  %v2429_v43 = vld [vmem:[%s2938_s26 + $0x98] sm:$0xff]   ;;  %v2431_v45 = vld [vmem:[%s2938_s26 + $0x90] sm:$0xff]  }
  0x73   : > { %v2432_v46 = vld [vmem:[%s2938_s26 + $0x8] sm:$0xff]   ;;  %v2434_v48 = vld [vmem:[%s2938_s26] sm:$0xff]   ;;  %v2436_v50 = vld [vmem:[%s2938_s26 + $0x78] sm:$0xff]  }
  0x74   : > { %v2433_v47 = vld [vmem:[%s2938_s26 + $0x88] sm:$0xff]   ;;  %v2435_v49 = vld [vmem:[%s2938_s26 + $0x80] sm:$0xff]   ;;  %v2437_v51 = vld [vmem:[%s2938_s26 + $0xf8] sm:$0xff]  }
  0x75   : > { %1399 = vmatpush1.bf16.msra.mxu0 %v2422_v36  ;;  %1624 = vmatpush1.bf16.msra.mxu1 %v2423_v37  ;;  %v2454_v52 = vld [vmem:[%s2945_s12 + $0x4] ss:$16 sps:$4 sm:$0xff]   ;;  %v2457_v54 = vld [vmem:[%s2945_s12 + $0xc] ss:$16 sps:$4 sm:$0xff]   ;;  %v2452_v4 = vld [vmem:[%s2945_s12] ss:$16 sps:$4 sm:$0xff]  }
  0x76   : > { %1400 = vmatprep.subr.bf16.mxu0 %v2653_v34  ;;  %1625 = vmatprep.subr.bf16.mxu1 %v2653_v34  ;;  %v2438_v53 = vld [vmem:[%s2938_s26 + $0x70] sm:$0xff]   ;;  %v2440_v56 = vld [vmem:[%s2938_s26 + $0x68] sm:$0xff]   ;;  %v2442_v58 = vld [vmem:[%s2938_s26 + $0x60] sm:$0xff]  }
  0x77   : > { %v2439_v55 = vld [vmem:[%s2938_s26 + $0xf0] sm:$0xff]   ;;  %1428 = vmatprep.mubr.bf16.mxu0 %v2454_v52  ;;  %1653 = vmatprep.mubr.bf16.mxu1 %v2457_v54  ;;  %v2441_v57 = vld [vmem:[%s2938_s26 + $0xe8] sm:$0xff]   ;;  %v2443_v59 = vld [vmem:[%s2938_s26 + $0xe0] sm:$0xff]  }
  0x78   : > { %v2444_v60 = vld [vmem:[%s2938_s26 + $0x58] sm:$0xff]   ;;  %v2446_v62 = vld [vmem:[%s2938_s26 + $0x50] sm:$0xff]   ;;  %v2448_v0 = vld [vmem:[%s2938_s26 + $0x48] sm:$0xff]  }
  0x79   : > { %1401 = vmatpush1.bf16.msra.mxu0 %v2424_v38  ;;  %1626 = vmatpush1.bf16.msra.mxu1 %v2425_v39  ;;  %v2445_v61 = vld [vmem:[%s2938_s26 + $0xd8] sm:$0xff]   ;;  %v2447_v63 = vld [vmem:[%s2938_s26 + $0xd0] sm:$0xff]   ;;  %v2449_v1 = vld [vmem:[%s2938_s26 + $0xc8] sm:$0xff]  }
  0x7a   : > { %1402 = vmatprep.subr.bf16.mxu0 %v2653_v34  ;;  %1627 = vmatprep.subr.bf16.mxu1 %v2653_v34  ;;  %v2450_v2 = vld [vmem:[%s2938_s26 + $0x40] sm:$0xff]   ;;  %v2455_v5 = vld [vmem:[%s2945_s12 + $0x8] ss:$16 sps:$4 sm:$0xff]   ;;  %v2460_v7 = vld [vmem:[%s2945_s12 + $0x2c] ss:$16 sps:$4 sm:$0xff]  }
  0x7b   : > { %v2451_v3 = vld [vmem:[%s2938_s26 + $0xc0] sm:$0xff]   ;;  %v2463_v9 = vld [vmem:[%s2945_s12 + $0x28] ss:$16 sps:$4 sm:$0xff]   ;;  %v2466_v11 = vld [vmem:[%s2945_s12 + $0x4c] ss:$16 sps:$4 sm:$0xff]  }
  0x7c   : > { %v2458_v6 = vld [vmem:[%s2945_s12 + $0x24] ss:$16 sps:$4 sm:$0xff]   ;;  %v2462_v8 = vld [vmem:[%s2945_s12 + $0x20] ss:$16 sps:$4 sm:$0xff]   ;;  %v2469_v13 = vld [vmem:[%s2945_s12 + $0x48] ss:$16 sps:$4 sm:$0xff]  }
  0x7d   : > { %1403 = vmatpush1.bf16.msra.mxu0 %v2426_v40  ;;  %1628 = vmatpush1.bf16.msra.mxu1 %v2427_v41  ;;  %v2464_v10 = vld [vmem:[%s2945_s12 + $0x44] ss:$16 sps:$4 sm:$0xff]   ;;  %v2468_v12 = vld [vmem:[%s2945_s12 + $0x40] ss:$16 sps:$4 sm:$0xff]   ;;  %v2472_v15 = vld [vmem:[%s2945_s12 + $0x6c] ss:$16 sps:$4 sm:$0xff]  }
  0x7e   : > { %1404 = vmatprep.subr.bf16.mxu0 %v2653_v34  ;;  %1629 = vmatprep.subr.bf16.mxu1 %v2653_v34  ;;  %v2470_v14 = vld [vmem:[%s2945_s12 + $0x64] ss:$16 sps:$4 sm:$0xff]   ;;  %v2474_v16 = vld [vmem:[%s2945_s12 + $0x60] ss:$16 sps:$4 sm:$0xff]   ;;  %v2475_v17 = vld [vmem:[%s2945_s12 + $0x68] ss:$16 sps:$4 sm:$0xff]  }
  0x7f   : > { %v2476_v18 = vld [vmem:[%s2945_s12 + $0x84] ss:$16 sps:$4 sm:$0xff]   ;;  %v2478_v19 = vld [vmem:[%s2945_s12 + $0x8c] ss:$16 sps:$4 sm:$0xff]   ;;  %v2480_v20 = vld [vmem:[%s2945_s12 + $0x80] ss:$16 sps:$4 sm:$0xff]  }
  0x80   : > { %v2481_v21 = vld [vmem:[%s2945_s12 + $0x88] ss:$16 sps:$4 sm:$0xff]   ;;  %v2482_v22 = vld [vmem:[%s2945_s12 + $0xa4] ss:$16 sps:$4 sm:$0xff]   ;;  %v2484_v23 = vld [vmem:[%s2945_s12 + $0xac] ss:$16 sps:$4 sm:$0xff]  }
  0x81   : > { %1405 = vmatpush1.bf16.msra.mxu0 %v2428_v42  ;;  %1630 = vmatpush1.bf16.msra.mxu1 %v2429_v43  ;;  %v2486_v24 = vld [vmem:[%s2945_s12 + $0xa0] ss:$16 sps:$4 sm:$0xff]   ;;  %v2487_v25 = vld [vmem:[%s2945_s12 + $0xa8] ss:$16 sps:$4 sm:$0xff]   ;;  %v2488_v26 = vld [vmem:[%s2945_s12 + $0xc4] ss:$16 sps:$4 sm:$0xff]  }
  0x82   : > { %1406 = vmatprep.subr.bf16.mxu0 %v2653_v34  ;;  %1631 = vmatprep.subr.bf16.mxu1 %v2653_v34  ;;  %v2490_v27 = vld [vmem:[%s2945_s12 + $0xcc] ss:$16 sps:$4 sm:$0xff]   ;;  %v2492_v28 = vld [vmem:[%s2945_s12 + $0xc0] ss:$16 sps:$4 sm:$0xff]   ;;  %v2493_v29 = vld [vmem:[%s2945_s12 + $0xc8] ss:$16 sps:$4 sm:$0xff]  }
  0x83   : > { %v2494_v30 = vld [vmem:[%s2945_s12 + $0xe4] ss:$16 sps:$4 sm:$0xff]   ;;  %v2496_v31 = vld [vmem:[%s2945_s12 + $0xec] ss:$16 sps:$4 sm:$0xff]   ;;  %v2498_v32 = vld [vmem:[%s2945_s12 + $0xe0] ss:$16 sps:$4 sm:$0xff]  }
  0x84   : > { %v2499_v33 = vld [vmem:[%s2945_s12 + $0xe8] ss:$16 sps:$4 sm:$0xff]   ;;  %v2502_v35 = vld [vmem:[%s2945_s12 + $0x10c] ss:$16 sps:$4 sm:$0xff]   ;;  %v2504_v36 = vld [vmem:[%s2945_s12 + $0x100] ss:$16 sps:$4 sm:$0xff]  }
  0x85   : > { %1407 = vmatpush1.bf16.msra.mxu0 %v2430_v44  ;;  %1632 = vmatpush1.bf16.msra.mxu1 %v2431_v45  ;;  %v2505_v37 = vld [vmem:[%s2945_s12 + $0x108] ss:$16 sps:$4 sm:$0xff]   ;;  %v2506_v38 = vld [vmem:[%s2945_s12 + $0x124] ss:$16 sps:$4 sm:$0xff]   ;;  %v2508_v39 = vld [vmem:[%s2945_s12 + $0x12c] ss:$16 sps:$4 sm:$0xff]  }
  0x86   : > { %1408 = vmatprep.subr.bf16.mxu0 %v2653_v34  ;;  %1633 = vmatprep.subr.bf16.mxu1 %v2653_v34  ;;  %v2510_v40 = vld [vmem:[%s2945_s12 + $0x120] ss:$16 sps:$4 sm:$0xff]   ;;  %v2511_v41 = vld [vmem:[%s2945_s12 + $0x128] ss:$16 sps:$4 sm:$0xff]   ;;  %v2512_v42 = vld [vmem:[%s2945_s12 + $0x144] ss:$16 sps:$4 sm:$0xff]  }
  0x87   : > { %v2514_v43 = vld [vmem:[%s2945_s12 + $0x14c] ss:$16 sps:$4 sm:$0xff]   ;;  %v2516_v44 = vld [vmem:[%s2945_s12 + $0x140] ss:$16 sps:$4 sm:$0xff]   ;;  %v2517_v45 = vld [vmem:[%s2945_s12 + $0x148] ss:$16 sps:$4 sm:$0xff]  }
  0x88   : > { %v2528_v52 = vld [vmem:[%s2945_s12 + $0x180] ss:$16 sps:$4 sm:$0xff]   ;;  %v2530_v54 = vld [vmem:[%s2945_s12 + $0x1a4] ss:$16 sps:$4 sm:$0xff]  }
  0x89   : > { %1409 = vmatpush1.bf16.msra.mxu0 %v2432_v46  ;;  %1634 = vmatpush1.bf16.msra.mxu1 %v2433_v47  ;;  %v2518_v46 = vld [vmem:[%s2945_s12 + $0x164] ss:$16 sps:$4 sm:$0xff]   ;;  %v2520_v47 = vld [vmem:[%s2945_s12 + $0x16c] ss:$16 sps:$4 sm:$0xff]  }
  0x8a   : > { %1410 = vmatprep.subr.bf16.mxu0 %v2653_v34  ;;  %1635 = vmatprep.subr.bf16.mxu1 %v2653_v34 }
  0x8d   : > { %1411 = vmatpush1.bf16.msra.mxu0 %v2434_v48  ;;  %1636 = vmatpush1.bf16.msra.mxu1 %v2435_v49  ;;  %v2522_v48 = vld [vmem:[%s2945_s12 + $0x160] ss:$16 sps:$4 sm:$0xff]   ;;  %v2523_v49 = vld [vmem:[%s2945_s12 + $0x168] ss:$16 sps:$4 sm:$0xff]  }
  0x8e   : > { %1412 = vmatprep.subr.bf16.mxu0 %v2653_v34  ;;  %1637 = vmatprep.subr.bf16.mxu1 %v2653_v34 }
  0x91   : > { %1413 = vmatpush2.bf16.msra.mxu0 %v2436_v50  ;;  %1638 = vmatpush2.bf16.msra.mxu1 %v2437_v51  ;;  %v2524_v50 = vld [vmem:[%s2945_s12 + $0x184] ss:$16 sps:$4 sm:$0xff]   ;;  %v2526_v51 = vld [vmem:[%s2945_s12 + $0x18c] ss:$16 sps:$4 sm:$0xff]  }
  0x92   : > { %1414 = vmatprep.subr.bf16.mxu0 %v2653_v34  ;;  %1639 = vmatprep.subr.bf16.mxu1 %v2653_v34 }
  0x95   : > { %1415 = vmatpush2.bf16.msra.mxu0 %v2438_v53  ;;  %1640 = vmatpush2.bf16.msra.mxu1 %v2439_v55  ;;  %v2529_v53 = vld [vmem:[%s2945_s12 + $0x188] ss:$16 sps:$4 sm:$0xff]   ;;  %v2532_v55 = vld [vmem:[%s2945_s12 + $0x1ac] ss:$16 sps:$4 sm:$0xff]  }
  0x96   : > { %1416 = vmatprep.subr.bf16.mxu0 %v2653_v34  ;;  %1641 = vmatprep.subr.bf16.mxu1 %v2653_v34 }
  0x99   : > { %1417 = vmatpush2.bf16.msra.mxu0 %v2440_v56  ;;  %1642 = vmatpush2.bf16.msra.mxu1 %v2441_v57  ;;  %v2534_v56 = vld [vmem:[%s2945_s12 + $0x1a0] ss:$16 sps:$4 sm:$0xff]   ;;  %v2535_v57 = vld [vmem:[%s2945_s12 + $0x1a8] ss:$16 sps:$4 sm:$0xff]  }
  0x9a   : > { %1418 = vmatprep.subr.bf16.mxu0 %v2653_v34  ;;  %1643 = vmatprep.subr.bf16.mxu1 %v2653_v34 }
  0x9d   : > { %1419 = vmatpush2.bf16.msra.mxu0 %v2442_v58  ;;  %1644 = vmatpush2.bf16.msra.mxu1 %v2443_v59  ;;  %v2536_v58 = vld [vmem:[%s2945_s12 + $0x1c4] ss:$16 sps:$4 sm:$0xff]   ;;  %v2538_v59 = vld [vmem:[%s2945_s12 + $0x1cc] ss:$16 sps:$4 sm:$0xff]  }
  0x9e   : > { %1420 = vmatprep.subr.bf16.mxu0 %v2653_v34  ;;  %1645 = vmatprep.subr.bf16.mxu1 %v2653_v34 }
  0xa1   : > { %1421 = vmatpush2.bf16.msra.mxu0 %v2444_v60  ;;  %1646 = vmatpush2.bf16.msra.mxu1 %v2445_v61  ;;  %v2540_v60 = vld [vmem:[%s2945_s12 + $0x1c0] ss:$16 sps:$4 sm:$0xff]   ;;  %v2541_v61 = vld [vmem:[%s2945_s12 + $0x1c8] ss:$16 sps:$4 sm:$0xff]  }
  0xa2   : > { %1422 = vmatprep.subr.bf16.mxu0 %v2653_v34  ;;  %1647 = vmatprep.subr.bf16.mxu1 %v2653_v34 }
  0xa5   : > { %1423 = vmatpush2.bf16.msra.mxu0 %v2446_v62  ;;  %1648 = vmatpush2.bf16.msra.mxu1 %v2447_v63  ;;  %v2542_v62 = vld [vmem:[%s2945_s12 + $0x1e4] ss:$16 sps:$4 sm:$0xff]   ;;  %v2544_v63 = vld [vmem:[%s2945_s12 + $0x1ec] ss:$16 sps:$4 sm:$0xff]  }
  0xa6   : > { %1424 = vmatprep.subr.bf16.mxu0 %v2653_v34  ;;  %1649 = vmatprep.subr.bf16.mxu1 %v2653_v34 }
  0xa9   : > { %1425 = vmatpush2.bf16.msra.mxu0 %v2448_v0  ;;  %1650 = vmatpush2.bf16.msra.mxu1 %v2449_v1  ;;  %v2546_v0 = vld [vmem:[%s2945_s12 + $0x1e0] ss:$16 sps:$4 sm:$0xff]   ;;  %v2547_v1 = vld [vmem:[%s2945_s12 + $0x1e8] ss:$16 sps:$4 sm:$0xff]  }
  0xaa   : > { %1426 = vmatprep.subr.bf16.mxu0 %v2653_v34  ;;  %1651 = vmatprep.subr.bf16.mxu1 %v2653_v34  ;;  %v2500_v34 = vld [vmem:[%s2945_s12 + $0x104] ss:$16 sps:$4 sm:$0xff]  }
  0xad   : > { %1427 = vmatpush2.bf16.msra.mxu0 %v2450_v2  ;;  %1652 = vmatpush2.bf16.msra.mxu1 %v2451_v3  ;;  %v2548_v2 = vld [vmem:[%s2945_s12 + $0x204] ss:$16 sps:$4 sm:$0xff]   ;;  %v2550_v3 = vld [vmem:[%s2945_s12 + $0x20c] ss:$16 sps:$4 sm:$0xff]  }
  0xb0   : > { %1429 = vmatmul.mubr.bf16.vlgmr.msra.gmra.mxu0 %v2452_v4  ;;  %1654 = vmatmul.mubr.bf16.vlgmr.msra.gmra.mxu1 %v2455_v5  ;;  %v2552_v4 = vld [vmem:[%s2945_s12 + $0x200] ss:$16 sps:$4 sm:$0xff]   ;;  %v2553_v5 = vld [vmem:[%s2945_s12 + $0x208] ss:$16 sps:$4 sm:$0xff]  }
  0xb1   : > { %1436 = vmatprep.mubr.bf16.mxu0 %v2458_v6  ;;  %1661 = vmatprep.mubr.bf16.mxu1 %v2460_v7  ;;  %v2554_v6 = vld [vmem:[%s2945_s12 + $0x224] ss:$16 sps:$4 sm:$0xff]   ;;  %v2556_v7 = vld [vmem:[%s2945_s12 + $0x22c] ss:$16 sps:$4 sm:$0xff]  }
  0xb8   : > { %1437 = vmatmul.mubr.bf16.gmra.mxu0 %v2462_v8  ;;  %1662 = vmatmul.mubr.bf16.gmra.mxu1 %v2463_v9  ;;  %v2558_v8 = vld [vmem:[%s2945_s12 + $0x220] ss:$16 sps:$4 sm:$0xff]   ;;  %v2559_v9 = vld [vmem:[%s2945_s12 + $0x228] ss:$16 sps:$4 sm:$0xff]  }
  0xb9   : > { %1444 = vmatprep.mubr.bf16.mxu0 %v2464_v10  ;;  %1669 = vmatprep.mubr.bf16.mxu1 %v2466_v11  ;;  %v2560_v10 = vld [vmem:[%s2945_s12 + $0x244] ss:$16 sps:$4 sm:$0xff]   ;;  %v2562_v11 = vld [vmem:[%s2945_s12 + $0x24c] ss:$16 sps:$4 sm:$0xff]  }
  0xc0   : > { %1445 = vmatmul.mubr.bf16.gmra.mxu0 %v2468_v12  ;;  %1670 = vmatmul.mubr.bf16.gmra.mxu1 %v2469_v13  ;;  %v2564_v12 = vld [vmem:[%s2945_s12 + $0x240] ss:$16 sps:$4 sm:$0xff]   ;;  %v2565_v13 = vld [vmem:[%s2945_s12 + $0x248] ss:$16 sps:$4 sm:$0xff]  }
  0xc1   : > { %1452 = vmatprep.mubr.bf16.mxu0 %v2470_v14  ;;  %1677 = vmatprep.mubr.bf16.mxu1 %v2472_v15  ;;  %v2566_v14 = vld [vmem:[%s2945_s12 + $0x264] ss:$16 sps:$4 sm:$0xff]   ;;  %v2568_v15 = vld [vmem:[%s2945_s12 + $0x26c] ss:$16 sps:$4 sm:$0xff]  }
  0xc8   : > { %1453 = vmatmul.mubr.bf16.gmra.mxu0 %v2474_v16  ;;  %1678 = vmatmul.mubr.bf16.gmra.mxu1 %v2475_v17  ;;  %v2570_v16 = vld [vmem:[%s2945_s12 + $0x260] ss:$16 sps:$4 sm:$0xff]   ;;  %v2571_v17 = vld [vmem:[%s2945_s12 + $0x268] ss:$16 sps:$4 sm:$0xff]  }
  0xc9   : > { %1460 = vmatprep.mubr.bf16.mxu0 %v2476_v18  ;;  %1685 = vmatprep.mubr.bf16.mxu1 %v2478_v19  ;;  %v2572_v18 = vld [vmem:[%s2945_s12 + $0x284] ss:$16 sps:$4 sm:$0xff]   ;;  %v2574_v19 = vld [vmem:[%s2945_s12 + $0x28c] ss:$16 sps:$4 sm:$0xff]  }
  0xd0   : > { %1461 = vmatmul.mubr.bf16.gmra.mxu0 %v2480_v20  ;;  %1686 = vmatmul.mubr.bf16.gmra.mxu1 %v2481_v21  ;;  %v2576_v20 = vld [vmem:[%s2945_s12 + $0x280] ss:$16 sps:$4 sm:$0xff]   ;;  %v2577_v21 = vld [vmem:[%s2945_s12 + $0x288] ss:$16 sps:$4 sm:$0xff]  }
  0xd1   : > { %1468 = vmatprep.mubr.bf16.mxu0 %v2482_v22  ;;  %1693 = vmatprep.mubr.bf16.mxu1 %v2484_v23  ;;  %v2578_v22 = vld [vmem:[%s2945_s12 + $0x2a4] ss:$16 sps:$4 sm:$0xff]   ;;  %v2580_v23 = vld [vmem:[%s2945_s12 + $0x2ac] ss:$16 sps:$4 sm:$0xff]  }
  0xd8   : > { %1469 = vmatmul.mubr.bf16.gmra.mxu0 %v2486_v24  ;;  %1694 = vmatmul.mubr.bf16.gmra.mxu1 %v2487_v25  ;;  %v2582_v24 = vld [vmem:[%s2945_s12 + $0x2a0] ss:$16 sps:$4 sm:$0xff]   ;;  %v2583_v25 = vld [vmem:[%s2945_s12 + $0x2a8] ss:$16 sps:$4 sm:$0xff]  }
  0xd9   : > { %1476 = vmatprep.mubr.bf16.mxu0 %v2488_v26  ;;  %1701 = vmatprep.mubr.bf16.mxu1 %v2490_v27  ;;  %v2584_v26 = vld [vmem:[%s2945_s12 + $0x2c4] ss:$16 sps:$4 sm:$0xff]   ;;  %v2586_v27 = vld [vmem:[%s2945_s12 + $0x2cc] ss:$16 sps:$4 sm:$0xff]  }
  0xe0   : > { %1477 = vmatmul.mubr.bf16.gmra.mxu0 %v2492_v28  ;;  %1702 = vmatmul.mubr.bf16.gmra.mxu1 %v2493_v29  ;;  %v2588_v28 = vld [vmem:[%s2945_s12 + $0x2c0] ss:$16 sps:$4 sm:$0xff]   ;;  %v2589_v29 = vld [vmem:[%s2945_s12 + $0x2c8] ss:$16 sps:$4 sm:$0xff]  }
  0xe1   : > { %1484 = vmatprep.mubr.bf16.mxu0 %v2494_v30  ;;  %1709 = vmatprep.mubr.bf16.mxu1 %v2496_v31  ;;  %v2590_v30 = vld [vmem:[%s2945_s12 + $0x2e4] ss:$16 sps:$4 sm:$0xff]   ;;  %v2592_v31 = vld [vmem:[%s2945_s12 + $0x2ec] ss:$16 sps:$4 sm:$0xff]  }
  0xe8   : > { %1485 = vmatmul.mubr.bf16.gmra.mxu0 %v2498_v32  ;;  %1710 = vmatmul.mubr.bf16.gmra.mxu1 %v2499_v33  ;;  %v2594_v32 = vld [vmem:[%s2945_s12 + $0x2e0] ss:$16 sps:$4 sm:$0xff]   ;;  %v2595_v33 = vld [vmem:[%s2945_s12 + $0x2e8] ss:$16 sps:$4 sm:$0xff]  }
  0xe9   : > { %1492 = vmatprep.mubr.bf16.mxu0 %v2500_v34  ;;  %1717 = vmatprep.mubr.bf16.mxu1 %v2502_v35  ;;  %v516_v35 = vld [vmem:[%s2943_s30] sm:$0xff] }
  0xf0   : > { %1493 = vmatmul.mubr.bf16.gmra.mxu0 %v2504_v36  ;;  %1718 = vmatmul.mubr.bf16.gmra.mxu1 %v2505_v37 }
  0xf1   : > { %1500 = vmatprep.mubr.bf16.mxu0 %v2506_v38  ;;  %1725 = vmatprep.mubr.bf16.mxu1 %v2508_v39 }
  0xf8   : > { %1501 = vmatmul.mubr.bf16.gmra.mxu0 %v2510_v40  ;;  %1726 = vmatmul.mubr.bf16.gmra.mxu1 %v2511_v41 }
  0xf9   : > { %1508 = vmatprep.mubr.bf16.mxu0 %v2512_v42  ;;  %1733 = vmatprep.mubr.bf16.mxu1 %v2514_v43  ;;  %v517_v42 = vld [vmem:[%s2943_s30 + $0x8] sm:$0xff] }
 0x100   : > { %1509 = vmatmul.mubr.bf16.gmra.mxu0 %v2516_v44  ;;  %1734 = vmatmul.mubr.bf16.gmra.mxu1 %v2517_v45 }
 0x101   : > { %1516 = vmatprep.mubr.bf16.mxu0 %v2518_v46  ;;  %1741 = vmatprep.mubr.bf16.mxu1 %v2520_v47 }
 0x108   : > { %1517 = vmatmul.mubr.bf16.gmra.mxu0 %v2522_v48  ;;  %1742 = vmatmul.mubr.bf16.gmra.mxu1 %v2523_v49  ;;  %v518_v49 = vld [vmem:[%s2943_s30 + $0x10] sm:$0xff] }
 0x109   : > { %1524 = vmatprep.mubr.bf16.mxu0 %v2524_v50  ;;  %1749 = vmatprep.mubr.bf16.mxu1 %v2526_v51 }
 0x110   : > { %1525 = vmatmul.mubr.bf16.gmra.mxu0 %v2528_v52  ;;  %1750 = vmatmul.mubr.bf16.gmra.mxu1 %v2529_v53 }
 0x111   : > { %1532 = vmatprep.mubr.bf16.mxu0 %v2530_v54  ;;  %1757 = vmatprep.mubr.bf16.mxu1 %v2532_v55 }
 0x118   : > { %1533 = vmatmul.mubr.bf16.gmra.mxu0 %v2534_v56  ;;  %1758 = vmatmul.mubr.bf16.gmra.mxu1 %v2535_v57  ;;  %v519_v56 = vld [vmem:[%s2943_s30 + $0x18] sm:$0xff] }
 0x119   : > { %1540 = vmatprep.mubr.bf16.mxu0 %v2536_v58  ;;  %1765 = vmatprep.mubr.bf16.mxu1 %v2538_v59 }
 0x120   : > { %1541 = vmatmul.mubr.bf16.gmra.mxu0 %v2540_v60  ;;  %1766 = vmatmul.mubr.bf16.gmra.mxu1 %v2541_v61 }
 0x121   : > { %1548 = vmatprep.mubr.bf16.mxu0 %v2542_v62  ;;  %1773 = vmatprep.mubr.bf16.mxu1 %v2544_v63  ;;  %v520_v63 = vld [vmem:[%s2943_s30 + $0x20] sm:$0xff] }
 0x128   : > { %1549 = vmatmul.mubr.bf16.gmra.mxu0 %v2546_v0  ;;  %1774 = vmatmul.mubr.bf16.gmra.mxu1 %v2547_v1 }
 0x129   : > { %1556 = vmatprep.mubr.bf16.mxu0 %v2548_v2  ;;  %1781 = vmatprep.mubr.bf16.mxu1 %v2550_v3 }
 0x130   : > { %1557 = vmatmul.mubr.bf16.gmra.mxu0 %v2552_v4  ;;  %1782 = vmatmul.mubr.bf16.gmra.mxu1 %v2553_v5 }
 0x131   : > { %1564 = vmatprep.mubr.bf16.mxu0 %v2554_v6  ;;  %1789 = vmatprep.mubr.bf16.mxu1 %v2556_v7  ;;  %v521_v6 = vld [vmem:[%s2943_s30 + $0x28] sm:$0xff] }
 0x138   : > { %1565 = vmatmul.mubr.bf16.gmra.mxu0 %v2558_v8  ;;  %1790 = vmatmul.mubr.bf16.gmra.mxu1 %v2559_v9 }
 0x139   : > { %1572 = vmatprep.mubr.bf16.mxu0 %v2560_v10  ;;  %1797 = vmatprep.mubr.bf16.mxu1 %v2562_v11 }
 0x140   : > { %1573 = vmatmul.mubr.bf16.gmra.mxu0 %v2564_v12  ;;  %1798 = vmatmul.mubr.bf16.gmra.mxu1 %v2565_v13  ;;  %v522_v13 = vld [vmem:[%s2943_s30 + $0x30] sm:$0xff] }
 0x141   : > { %1580 = vmatprep.mubr.bf16.mxu0 %v2566_v14  ;;  %1805 = vmatprep.mubr.bf16.mxu1 %v2568_v15 }
 0x148   : > { %1581 = vmatmul.mubr.bf16.gmra.mxu0 %v2570_v16  ;;  %1806 = vmatmul.mubr.bf16.gmra.mxu1 %v2571_v17 }
 0x149   : > { %1588 = vmatprep.mubr.bf16.mxu0 %v2572_v18  ;;  %1813 = vmatprep.mubr.bf16.mxu1 %v2574_v19 }
 0x150   : > { %1589 = vmatmul.mubr.bf16.gmra.mxu0 %v2576_v20  ;;  %1814 = vmatmul.mubr.bf16.gmra.mxu1 %v2577_v21  ;;  %v523_v20 = vld [vmem:[%s2943_s30 + $0x38] sm:$0xff] }
 0x151   : > { %1596 = vmatprep.mubr.bf16.mxu0 %v2578_v22  ;;  %1821 = vmatprep.mubr.bf16.mxu1 %v2580_v23 }
 0x158   : > { %1597 = vmatmul.mubr.bf16.gmra.mxu0 %v2582_v24  ;;  %1822 = vmatmul.mubr.bf16.gmra.mxu1 %v2583_v25 }
 0x159   : > { %1604 = vmatprep.mubr.bf16.mxu0 %v2584_v26  ;;  %1829 = vmatprep.mubr.bf16.mxu1 %v2586_v27  ;;  %v524_v27 = vld [vmem:[%s2943_s30 + $0x40] sm:$0xff] }
 0x160   : > { %1605 = vmatmul.mubr.bf16.gmra.mxu0 %v2588_v28  ;;  %1830 = vmatmul.mubr.bf16.gmra.mxu1 %v2589_v29 }
 0x161   : > { %1612 = vmatprep.mubr.bf16.mxu0 %v2590_v30  ;;  %1837 = vmatprep.mubr.bf16.mxu1 %v2592_v31 }
 0x168   : > { %1613 = vmatmul.mubr.bf16.gmra.mxu0 %v2594_v32  ;;  %1838 = vmatmul.mubr.bf16.gmra.mxu1 %v2595_v33 }
 0x170   : > { %v1430_v34 = vpop.f32.mrf.mxu0  ;;  %v1655_v36 = vpop.f32.mrf.mxu1 }
 0x171   : > { %v1656_v37 = vadd.f32 %v1655_v36, %v1430_v34  ;;  %v525_v34 = vld [vmem:[%s2943_s30 + $0x48] sm:$0xff] }
 0x172   : > { %v1432_v38 = vpop.f32.mrf.mxu0  ;;  %v1657_v39 = vpop.f32.mrf.mxu1 }
 0x173   : > { %v1846_v40 = vadd.f32 %v1656_v37, %v516_v35 }
 0x174   : > { %v1433_v41 = vpop.f32.mrf.mxu0  ;;  %v1658_v43 = vpop.f32.mrf.mxu1 }
 0x175   : > { %1894 = vst [vmem:[%s2943_s30] sm:$0xff] %v1846_v40  ;;  %v1659_v44 = vadd.f32 %v1658_v43, %v1433_v41  ;;  %v526_v41 = vld [vmem:[%s2943_s30 + $0x50] sm:$0xff] }
 0x176   : > { %v1435_v45 = vpop.f32.mrf.mxu0  ;;  %v1660_v46 = vpop.f32.mrf.mxu1 }
 0x177   : > { %v1847_v47 = vadd.f32 %v1659_v44, %v517_v42 }
 0x178   : > { %v1438_v48 = vpop.f32.mrf.mxu0  ;;  %v1663_v50 = vpop.f32.mrf.mxu1 }
 0x179   : > { %1895 = vst [vmem:[%s2943_s30 + $0x8] sm:$0xff] %v1847_v47  ;;  %v1664_v51 = vadd.f32 %v1663_v50, %v1438_v48  ;;  %v527_v48 = vld [vmem:[%s2943_s30 + $0x58] sm:$0xff] }
 0x17a   : > { %v1440_v52 = vpop.f32.mrf.mxu0  ;;  %v1665_v53 = vpop.f32.mrf.mxu1 }
 0x17b   : > { %v1848_v54 = vadd.f32 %v1664_v51, %v518_v49 }
 0x17c   : > { %v1441_v55 = vpop.f32.mrf.mxu0  ;;  %v1666_v57 = vpop.f32.mrf.mxu1 }
 0x17d   : > { %1896 = vst [vmem:[%s2943_s30 + $0x10] sm:$0xff] %v1848_v54  ;;  %v1667_v58 = vadd.f32 %v1666_v57, %v1441_v55  ;;  %v528_v55 = vld [vmem:[%s2943_s30 + $0x60] sm:$0xff] }
 0x17e   : > { %v1443_v59 = vpop.f32.mrf.mxu0  ;;  %v1668_v60 = vpop.f32.mrf.mxu1 }
 0x17f   : > { %v1849_v61 = vadd.f32 %v1667_v58, %v519_v56 }
 0x180   : > { %v1446_v62 = vpop.f32.mrf.mxu0  ;;  %v1671_v0 = vpop.f32.mrf.mxu1 }
 0x181   : > { %1897 = vst [vmem:[%s2943_s30 + $0x18] sm:$0xff] %v1849_v61  ;;  %v1672_v1 = vadd.f32 %v1671_v0, %v1446_v62  ;;  %v529_v62 = vld [vmem:[%s2943_s30 + $0x68] sm:$0xff] }
 0x182   : > { %v1448_v2 = vpop.f32.mrf.mxu0  ;;  %v1673_v3 = vpop.f32.mrf.mxu1 }
 0x183   : > { %v1850_v4 = vadd.f32 %v1672_v1, %v520_v63 }
 0x184   : > { %v1449_v5 = vpop.f32.mrf.mxu0  ;;  %v1674_v7 = vpop.f32.mrf.mxu1 }
 0x185   : > { %1898 = vst [vmem:[%s2943_s30 + $0x20] sm:$0xff] %v1850_v4  ;;  %v1675_v8 = vadd.f32 %v1674_v7, %v1449_v5  ;;  %v530_v5 = vld [vmem:[%s2943_s30 + $0x70] sm:$0xff] }
 0x186   : > { %v1451_v9 = vpop.f32.mrf.mxu0  ;;  %v1676_v10 = vpop.f32.mrf.mxu1 }
 0x187   : > { %v1851_v11 = vadd.f32 %v1675_v8, %v521_v6 }
 0x188   : > { %v1454_v12 = vpop.f32.mrf.mxu0  ;;  %v1679_v14 = vpop.f32.mrf.mxu1 }
 0x189   : > { %1899 = vst [vmem:[%s2943_s30 + $0x28] sm:$0xff] %v1851_v11  ;;  %v1680_v15 = vadd.f32 %v1679_v14, %v1454_v12  ;;  %v531_v12 = vld [vmem:[%s2943_s30 + $0x78] sm:$0xff] }
 0x18a   : > { %v1456_v16 = vpop.f32.mrf.mxu0  ;;  %v1681_v17 = vpop.f32.mrf.mxu1 }
 0x18b   : > { %v1852_v18 = vadd.f32 %v1680_v15, %v522_v13 }
 0x18c   : > { %v1457_v19 = vpop.f32.mrf.mxu0  ;;  %v1682_v21 = vpop.f32.mrf.mxu1 }
 0x18d   : > { %1900 = vst [vmem:[%s2943_s30 + $0x30] sm:$0xff] %v1852_v18  ;;  %v1683_v22 = vadd.f32 %v1682_v21, %v1457_v19  ;;  %v532_v19 = vld [vmem:[%s2943_s30 + $0x80] sm:$0xff] }
 0x18e   : > { %v1459_v23 = vpop.f32.mrf.mxu0  ;;  %v1684_v24 = vpop.f32.mrf.mxu1 }
 0x18f   : > { %v1853_v25 = vadd.f32 %v1683_v22, %v523_v20 }
 0x190   : > { %v1462_v26 = vpop.f32.mrf.mxu0  ;;  %v1687_v28 = vpop.f32.mrf.mxu1 }
 0x191   : > { %1901 = vst [vmem:[%s2943_s30 + $0x38] sm:$0xff] %v1853_v25  ;;  %v1688_v29 = vadd.f32 %v1687_v28, %v1462_v26  ;;  %v533_v26 = vld [vmem:[%s2943_s30 + $0x88] sm:$0xff] }
 0x192   : > { %v1464_v30 = vpop.f32.mrf.mxu0  ;;  %v1689_v31 = vpop.f32.mrf.mxu1 }
 0x193   : > { %v1854_v32 = vadd.f32 %v1688_v29, %v524_v27 }
 0x194   : > { %v1465_v33 = vpop.f32.mrf.mxu0  ;;  %v1690_v35 = vpop.f32.mrf.mxu1 }
 0x195   : > { %1902 = vst [vmem:[%s2943_s30 + $0x40] sm:$0xff] %v1854_v32  ;;  %v1691_v36 = vadd.f32 %v1690_v35, %v1465_v33  ;;  %v534_v33 = vld [vmem:[%s2943_s30 + $0x90] sm:$0xff] }
 0x196   : > { %v1467_v37 = vpop.f32.mrf.mxu0  ;;  %v1692_v38 = vpop.f32.mrf.mxu1 }
 0x197   : > { %v1855_v39 = vadd.f32 %v1691_v36, %v525_v34 }
 0x198   : > { %v1470_v40 = vpop.f32.mrf.mxu0  ;;  %v1695_v42 = vpop.f32.mrf.mxu1 }
 0x199   : > { %1903 = vst [vmem:[%s2943_s30 + $0x48] sm:$0xff] %v1855_v39  ;;  %v1696_v43 = vadd.f32 %v1695_v42, %v1470_v40  ;;  %v535_v40 = vld [vmem:[%s2943_s30 + $0x98] sm:$0xff] }
 0x19a   : > { %v1472_v44 = vpop.f32.mrf.mxu0  ;;  %v1697_v45 = vpop.f32.mrf.mxu1 }
 0x19b   : > { %v1856_v46 = vadd.f32 %v1696_v43, %v526_v41 }
 0x19c   : > { %v1473_v47 = vpop.f32.mrf.mxu0  ;;  %v1698_v49 = vpop.f32.mrf.mxu1 }
 0x19d   : > { %1904 = vst [vmem:[%s2943_s30 + $0x50] sm:$0xff] %v1856_v46  ;;  %v1699_v50 = vadd.f32 %v1698_v49, %v1473_v47  ;;  %v536_v47 = vld [vmem:[%s2943_s30 + $0xa0] sm:$0xff] }
 0x19e   : > { %v1475_v51 = vpop.f32.mrf.mxu0  ;;  %v1700_v52 = vpop.f32.mrf.mxu1 }
 0x19f   : > { %v1857_v53 = vadd.f32 %v1699_v50, %v527_v48 }
 0x1a0   : > { %v1478_v54 = vpop.f32.mrf.mxu0  ;;  %v1703_v56 = vpop.f32.mrf.mxu1 }
 0x1a1   : > { %1905 = vst [vmem:[%s2943_s30 + $0x58] sm:$0xff] %v1857_v53  ;;  %v1704_v57 = vadd.f32 %v1703_v56, %v1478_v54  ;;  %v537_v54 = vld [vmem:[%s2943_s30 + $0xa8] sm:$0xff] }
 0x1a2   : > { %v1480_v58 = vpop.f32.mrf.mxu0  ;;  %v1705_v59 = vpop.f32.mrf.mxu1 }
 0x1a3   : > { %v1858_v60 = vadd.f32 %v1704_v57, %v528_v55 }
 0x1a4   : > { %v1481_v61 = vpop.f32.mrf.mxu0  ;;  %v1706_v63 = vpop.f32.mrf.mxu1 }
 0x1a5   : > { %1906 = vst [vmem:[%s2943_s30 + $0x60] sm:$0xff] %v1858_v60  ;;  %v1707_v0 = vadd.f32 %v1706_v63, %v1481_v61  ;;  %v538_v61 = vld [vmem:[%s2943_s30 + $0xb0] sm:$0xff] }
 0x1a6   : > { %v1483_v1 = vpop.f32.mrf.mxu0  ;;  %v1708_v2 = vpop.f32.mrf.mxu1 }
 0x1a7   : > { %v1859_v3 = vadd.f32 %v1707_v0, %v529_v62 }
 0x1a8   : > { %v1486_v4 = vpop.f32.mrf.mxu0  ;;  %v1711_v6 = vpop.f32.mrf.mxu1 }
 0x1a9   : > { %1907 = vst [vmem:[%s2943_s30 + $0x68] sm:$0xff] %v1859_v3  ;;  %v1712_v7 = vadd.f32 %v1711_v6, %v1486_v4  ;;  %v539_v4 = vld [vmem:[%s2943_s30 + $0xb8] sm:$0xff] }
 0x1aa   : > { %v1488_v8 = vpop.f32.mrf.mxu0  ;;  %v1713_v9 = vpop.f32.mrf.mxu1 }
 0x1ab   : > { %v1860_v10 = vadd.f32 %v1712_v7, %v530_v5 }
 0x1ac   : > { %v1489_v11 = vpop.f32.mrf.mxu0  ;;  %v1714_v13 = vpop.f32.mrf.mxu1 }
 0x1ad   : > { %1908 = vst [vmem:[%s2943_s30 + $0x70] sm:$0xff] %v1860_v10  ;;  %v1715_v14 = vadd.f32 %v1714_v13, %v1489_v11  ;;  %v540_v11 = vld [vmem:[%s2943_s30 + $0xc0] sm:$0xff] }
 0x1ae   : > { %v1491_v15 = vpop.f32.mrf.mxu0  ;;  %v1716_v16 = vpop.f32.mrf.mxu1 }
 0x1af   : > { %v1861_v17 = vadd.f32 %v1715_v14, %v531_v12 }
 0x1b0   : > { %v1494_v18 = vpop.f32.mrf.mxu0  ;;  %v1719_v20 = vpop.f32.mrf.mxu1 }
 0x1b1   : > { %1909 = vst [vmem:[%s2943_s30 + $0x78] sm:$0xff] %v1861_v17  ;;  %v1720_v21 = vadd.f32 %v1719_v20, %v1494_v18  ;;  %v541_v18 = vld [vmem:[%s2943_s30 + $0xc8] sm:$0xff] }
 0x1b2   : > { %v1496_v22 = vpop.f32.mrf.mxu0  ;;  %v1721_v23 = vpop.f32.mrf.mxu1 }
 0x1b3   : > { %v1862_v24 = vadd.f32 %v1720_v21, %v532_v19 }
 0x1b4   : > { %v1497_v25 = vpop.f32.mrf.mxu0  ;;  %v1722_v27 = vpop.f32.mrf.mxu1 }
 0x1b5   : > { %1910 = vst [vmem:[%s2943_s30 + $0x80] sm:$0xff] %v1862_v24  ;;  %v1723_v28 = vadd.f32 %v1722_v27, %v1497_v25  ;;  %v542_v25 = vld [vmem:[%s2943_s30 + $0xd0] sm:$0xff] }
 0x1b6   : > { %v1499_v29 = vpop.f32.mrf.mxu0  ;;  %v1724_v30 = vpop.f32.mrf.mxu1 }
 0x1b7   : > { %v1863_v31 = vadd.f32 %v1723_v28, %v533_v26 }
 0x1b8   : > { %v1502_v32 = vpop.f32.mrf.mxu0  ;;  %v1727_v34 = vpop.f32.mrf.mxu1 }
 0x1b9   : > { %1911 = vst [vmem:[%s2943_s30 + $0x88] sm:$0xff] %v1863_v31  ;;  %v1728_v35 = vadd.f32 %v1727_v34, %v1502_v32  ;;  %v543_v32 = vld [vmem:[%s2943_s30 + $0xd8] sm:$0xff] }
 0x1ba   : > { %v1504_v36 = vpop.f32.mrf.mxu0  ;;  %v1729_v37 = vpop.f32.mrf.mxu1 }
 0x1bb   : > { %v1864_v38 = vadd.f32 %v1728_v35, %v534_v33 }
 0x1bc   : > { %v1505_v39 = vpop.f32.mrf.mxu0  ;;  %v1730_v41 = vpop.f32.mrf.mxu1 }
 0x1bd   : > { %1912 = vst [vmem:[%s2943_s30 + $0x90] sm:$0xff] %v1864_v38  ;;  %v1731_v42 = vadd.f32 %v1730_v41, %v1505_v39  ;;  %v544_v39 = vld [vmem:[%s2943_s30 + $0xe0] sm:$0xff] }
 0x1be   : > { %v1507_v43 = vpop.f32.mrf.mxu0  ;;  %v1732_v44 = vpop.f32.mrf.mxu1 }
 0x1bf   : > { %v1865_v45 = vadd.f32 %v1731_v42, %v535_v40 }
 0x1c0   : > { %v1510_v46 = vpop.f32.mrf.mxu0  ;;  %v1735_v48 = vpop.f32.mrf.mxu1 }
 0x1c1   : > { %1913 = vst [vmem:[%s2943_s30 + $0x98] sm:$0xff] %v1865_v45  ;;  %v1736_v49 = vadd.f32 %v1735_v48, %v1510_v46  ;;  %v545_v46 = vld [vmem:[%s2943_s30 + $0xe8] sm:$0xff] }
 0x1c2   : > { %v1512_v50 = vpop.f32.mrf.mxu0  ;;  %v1737_v51 = vpop.f32.mrf.mxu1 }
 0x1c3   : > { %v1866_v52 = vadd.f32 %v1736_v49, %v536_v47 }
 0x1c4   : > { %v1513_v53 = vpop.f32.mrf.mxu0  ;;  %v1738_v55 = vpop.f32.mrf.mxu1 }
 0x1c5   : > { %1914 = vst [vmem:[%s2943_s30 + $0xa0] sm:$0xff] %v1866_v52  ;;  %v1739_v56 = vadd.f32 %v1738_v55, %v1513_v53  ;;  %v546_v53 = vld [vmem:[%s2943_s30 + $0xf0] sm:$0xff] }
 0x1c6   : > { %v1515_v57 = vpop.f32.mrf.mxu0  ;;  %v1740_v58 = vpop.f32.mrf.mxu1 }
 0x1c7   : > { %v1867_v59 = vadd.f32 %v1739_v56, %v537_v54 }
 0x1c8   : > { %v1518_v60 = vpop.f32.mrf.mxu0  ;;  %v1743_v62 = vpop.f32.mrf.mxu1 }
 0x1c9   : > { %1915 = vst [vmem:[%s2943_s30 + $0xa8] sm:$0xff] %v1867_v59  ;;  %v1744_v63 = vadd.f32 %v1743_v62, %v1518_v60  ;;  %v547_v60 = vld [vmem:[%s2943_s30 + $0xf8] sm:$0xff] }
 0x1ca   : > { %v1520_v0 = vpop.f32.mrf.mxu0  ;;  %v1745_v1 = vpop.f32.mrf.mxu1 }
 0x1cb   : > { %v1868_v2 = vadd.f32 %v1744_v63, %v538_v61 }
 0x1cc   : > { %v1521_v3 = vpop.f32.mrf.mxu0  ;;  %v1746_v5 = vpop.f32.mrf.mxu1 }
 0x1cd   : > { %1916 = vst [vmem:[%s2943_s30 + $0xb0] sm:$0xff] %v1868_v2  ;;  %v1747_v6 = vadd.f32 %v1746_v5, %v1521_v3  ;;  %v548_v3 = vld [vmem:[%s2943_s30 + $0x100] sm:$0xff] }
 0x1ce   : > { %v1523_v7 = vpop.f32.mrf.mxu0  ;;  %v1748_v8 = vpop.f32.mrf.mxu1 }
 0x1cf   : > { %v1869_v9 = vadd.f32 %v1747_v6, %v539_v4 }
 0x1d0   : > { %v1526_v10 = vpop.f32.mrf.mxu0  ;;  %v1751_v12 = vpop.f32.mrf.mxu1 }
 0x1d1   : > { %1917 = vst [vmem:[%s2943_s30 + $0xb8] sm:$0xff] %v1869_v9  ;;  %v1752_v13 = vadd.f32 %v1751_v12, %v1526_v10  ;;  %v549_v10 = vld [vmem:[%s2943_s30 + $0x108] sm:$0xff] }
 0x1d2   : > { %v1528_v14 = vpop.f32.mrf.mxu0  ;;  %v1753_v15 = vpop.f32.mrf.mxu1 }
 0x1d3   : > { %v1870_v16 = vadd.f32 %v1752_v13, %v540_v11 }
 0x1d4   : > { %v1529_v17 = vpop.f32.mrf.mxu0  ;;  %v1754_v19 = vpop.f32.mrf.mxu1 }
 0x1d5   : > { %1918 = vst [vmem:[%s2943_s30 + $0xc0] sm:$0xff] %v1870_v16  ;;  %v1755_v20 = vadd.f32 %v1754_v19, %v1529_v17  ;;  %v550_v17 = vld [vmem:[%s2943_s30 + $0x110] sm:$0xff] }
 0x1d6   : > { %v1531_v21 = vpop.f32.mrf.mxu0  ;;  %v1756_v22 = vpop.f32.mrf.mxu1 }
 0x1d7   : > { %v1871_v23 = vadd.f32 %v1755_v20, %v541_v18 }
 0x1d8   : > { %v1534_v24 = vpop.f32.mrf.mxu0  ;;  %v1759_v26 = vpop.f32.mrf.mxu1 }
 0x1d9   : > { %1919 = vst [vmem:[%s2943_s30 + $0xc8] sm:$0xff] %v1871_v23  ;;  %v1760_v27 = vadd.f32 %v1759_v26, %v1534_v24  ;;  %v551_v24 = vld [vmem:[%s2943_s30 + $0x118] sm:$0xff] }
 0x1da   : > { %v1536_v28 = vpop.f32.mrf.mxu0  ;;  %v1761_v29 = vpop.f32.mrf.mxu1 }
 0x1db   : > { %v1872_v30 = vadd.f32 %v1760_v27, %v542_v25 }
 0x1dc   : > { %v1537_v31 = vpop.f32.mrf.mxu0  ;;  %v1762_v33 = vpop.f32.mrf.mxu1 }
 0x1dd   : > { %1920 = vst [vmem:[%s2943_s30 + $0xd0] sm:$0xff] %v1872_v30  ;;  %v1763_v34 = vadd.f32 %v1762_v33, %v1537_v31  ;;  %v552_v31 = vld [vmem:[%s2943_s30 + $0x120] sm:$0xff] }
 0x1de   : > { %v1539_v35 = vpop.f32.mrf.mxu0  ;;  %v1764_v36 = vpop.f32.mrf.mxu1 }
 0x1df   : > { %v1873_v37 = vadd.f32 %v1763_v34, %v543_v32 }
 0x1e0   : > { %v1542_v38 = vpop.f32.mrf.mxu0  ;;  %v1767_v40 = vpop.f32.mrf.mxu1 }
 0x1e1   : > { %1921 = vst [vmem:[%s2943_s30 + $0xd8] sm:$0xff] %v1873_v37  ;;  %v1768_v41 = vadd.f32 %v1767_v40, %v1542_v38  ;;  %v553_v38 = vld [vmem:[%s2943_s30 + $0x128] sm:$0xff] }
 0x1e2   : > { %v1544_v42 = vpop.f32.mrf.mxu0  ;;  %v1769_v43 = vpop.f32.mrf.mxu1 }
 0x1e3   : > { %v1874_v44 = vadd.f32 %v1768_v41, %v544_v39 }
 0x1e4   : > { %v1545_v45 = vpop.f32.mrf.mxu0  ;;  %v1770_v47 = vpop.f32.mrf.mxu1 }
 0x1e5   : > { %1922 = vst [vmem:[%s2943_s30 + $0xe0] sm:$0xff] %v1874_v44  ;;  %v1771_v48 = vadd.f32 %v1770_v47, %v1545_v45  ;;  %v554_v45 = vld [vmem:[%s2943_s30 + $0x130] sm:$0xff] }
 0x1e6   : > { %v1547_v49 = vpop.f32.mrf.mxu0  ;;  %v1772_v50 = vpop.f32.mrf.mxu1 }
 0x1e7   : > { %v1875_v51 = vadd.f32 %v1771_v48, %v545_v46 }
 0x1e8   : > { %v1550_v52 = vpop.f32.mrf.mxu0  ;;  %v1775_v54 = vpop.f32.mrf.mxu1 }
 0x1e9   : > { %1923 = vst [vmem:[%s2943_s30 + $0xe8] sm:$0xff] %v1875_v51  ;;  %v1776_v55 = vadd.f32 %v1775_v54, %v1550_v52  ;;  %v555_v52 = vld [vmem:[%s2943_s30 + $0x138] sm:$0xff] }
 0x1ea   : > { %v1552_v56 = vpop.f32.mrf.mxu0  ;;  %v1777_v57 = vpop.f32.mrf.mxu1 }
 0x1eb   : > { %v1876_v58 = vadd.f32 %v1776_v55, %v546_v53 }
 0x1ec   : > { %v1553_v59 = vpop.f32.mrf.mxu0  ;;  %v1778_v61 = vpop.f32.mrf.mxu1 }
 0x1ed   : > { %1924 = vst [vmem:[%s2943_s30 + $0xf0] sm:$0xff] %v1876_v58  ;;  %v1779_v62 = vadd.f32 %v1778_v61, %v1553_v59  ;;  %v556_v59 = vld [vmem:[%s2943_s30 + $0x140] sm:$0xff] }
 0x1ee   : > { %v1555_v63 = vpop.f32.mrf.mxu0  ;;  %v1780_v0 = vpop.f32.mrf.mxu1 }
 0x1ef   : > { %v1877_v1 = vadd.f32 %v1779_v62, %v547_v60 }
 0x1f0   : > { %v1558_v2 = vpop.f32.mrf.mxu0  ;;  %v1783_v4 = vpop.f32.mrf.mxu1 }
 0x1f1   : > { %1925 = vst [vmem:[%s2943_s30 + $0xf8] sm:$0xff] %v1877_v1  ;;  %v1784_v5 = vadd.f32 %v1783_v4, %v1558_v2  ;;  %v557_v2 = vld [vmem:[%s2943_s30 + $0x148] sm:$0xff] }
 0x1f2   : > { %v1560_v6 = vpop.f32.mrf.mxu0  ;;  %v1785_v7 = vpop.f32.mrf.mxu1 }
 0x1f3   : > { %v1878_v8 = vadd.f32 %v1784_v5, %v548_v3 }
 0x1f4   : > { %v1561_v9 = vpop.f32.mrf.mxu0  ;;  %v1786_v11 = vpop.f32.mrf.mxu1 }
 0x1f5   : > { %1926 = vst [vmem:[%s2943_s30 + $0x100] sm:$0xff] %v1878_v8  ;;  %v1787_v12 = vadd.f32 %v1786_v11, %v1561_v9  ;;  %v558_v9 = vld [vmem:[%s2943_s30 + $0x150] sm:$0xff] }
 0x1f6   : > { %v1563_v13 = vpop.f32.mrf.mxu0  ;;  %v1788_v14 = vpop.f32.mrf.mxu1 }
 0x1f7   : > { %v1879_v15 = vadd.f32 %v1787_v12, %v549_v10 }
 0x1f8   : > { %v1566_v16 = vpop.f32.mrf.mxu0  ;;  %v1791_v18 = vpop.f32.mrf.mxu1 }
 0x1f9   : > { %1927 = vst [vmem:[%s2943_s30 + $0x108] sm:$0xff] %v1879_v15  ;;  %v1792_v19 = vadd.f32 %v1791_v18, %v1566_v16  ;;  %v559_v16 = vld [vmem:[%s2943_s30 + $0x158] sm:$0xff] }
 0x1fa   : > { %v1568_v20 = vpop.f32.mrf.mxu0  ;;  %v1793_v21 = vpop.f32.mrf.mxu1 }
 0x1fb   : > { %v1880_v22 = vadd.f32 %v1792_v19, %v550_v17 }
 0x1fc   : > { %v1569_v23 = vpop.f32.mrf.mxu0  ;;  %v1794_v25 = vpop.f32.mrf.mxu1 }
 0x1fd   : > { %1928 = vst [vmem:[%s2943_s30 + $0x110] sm:$0xff] %v1880_v22  ;;  %v1795_v26 = vadd.f32 %v1794_v25, %v1569_v23  ;;  %v560_v23 = vld [vmem:[%s2943_s30 + $0x160] sm:$0xff] }
 0x1fe   : > { %v1571_v27 = vpop.f32.mrf.mxu0  ;;  %v1796_v28 = vpop.f32.mrf.mxu1 }
 0x1ff   : > { %v1881_v29 = vadd.f32 %v1795_v26, %v551_v24 }
 0x200   : > { %v1574_v30 = vpop.f32.mrf.mxu0  ;;  %v1799_v32 = vpop.f32.mrf.mxu1 }
 0x201   : > { %1929 = vst [vmem:[%s2943_s30 + $0x118] sm:$0xff] %v1881_v29  ;;  %v1800_v33 = vadd.f32 %v1799_v32, %v1574_v30  ;;  %v561_v30 = vld [vmem:[%s2943_s30 + $0x168] sm:$0xff] }
 0x202   : > { %v1576_v34 = vpop.f32.mrf.mxu0  ;;  %v1801_v35 = vpop.f32.mrf.mxu1 }
 0x203   : > { %v1882_v36 = vadd.f32 %v1800_v33, %v552_v31 }
 0x204   : > { %v1577_v37 = vpop.f32.mrf.mxu0  ;;  %v1802_v39 = vpop.f32.mrf.mxu1 }
 0x205   : > { %1930 = vst [vmem:[%s2943_s30 + $0x120] sm:$0xff] %v1882_v36  ;;  %v1803_v40 = vadd.f32 %v1802_v39, %v1577_v37  ;;  %v562_v37 = vld [vmem:[%s2943_s30 + $0x170] sm:$0xff] }
 0x206   : > { %v1579_v41 = vpop.f32.mrf.mxu0  ;;  %v1804_v42 = vpop.f32.mrf.mxu1 }
 0x207   : > { %v1883_v43 = vadd.f32 %v1803_v40, %v553_v38 }
 0x208   : > { %v1582_v44 = vpop.f32.mrf.mxu0  ;;  %v1807_v46 = vpop.f32.mrf.mxu1 }
 0x209   : > { %1931 = vst [vmem:[%s2943_s30 + $0x128] sm:$0xff] %v1883_v43  ;;  %v1808_v47 = vadd.f32 %v1807_v46, %v1582_v44  ;;  %v563_v44 = vld [vmem:[%s2943_s30 + $0x178] sm:$0xff] }
 0x20a   : > { %v1584_v48 = vpop.f32.mrf.mxu0  ;;  %v1809_v49 = vpop.f32.mrf.mxu1 }
 0x20b   : > { %v1884_v50 = vadd.f32 %v1808_v47, %v554_v45 }
 0x20c   : > { %v1585_v51 = vpop.f32.mrf.mxu0  ;;  %v1810_v53 = vpop.f32.mrf.mxu1 }
 0x20d   : > { %1932 = vst [vmem:[%s2943_s30 + $0x130] sm:$0xff] %v1884_v50  ;;  %v1811_v54 = vadd.f32 %v1810_v53, %v1585_v51 }
 0x20e   : > { %v1587_v55 = vpop.f32.mrf.mxu0  ;;  %v1812_v56 = vpop.f32.mrf.mxu1 }
 0x20f   : > { %v1885_v57 = vadd.f32 %v1811_v54, %v555_v52 }
 0x210   : > { %v1590_v58 = vpop.f32.mrf.mxu0  ;;  %v1815_v60 = vpop.f32.mrf.mxu1 }
 0x211   : > { %1933 = vst [vmem:[%s2943_s30 + $0x138] sm:$0xff] %v1885_v57  ;;  %v1816_v61 = vadd.f32 %v1815_v60, %v1590_v58 }
 0x212   : > { %v1592_v62 = vpop.f32.mrf.mxu0  ;;  %v1817_v63 = vpop.f32.mrf.mxu1 }
 0x213   : > { %v1886_v0 = vadd.f32 %v1816_v61, %v556_v59 }
 0x214   : > { %v1593_v1 = vpop.f32.mrf.mxu0  ;;  %v1818_v3 = vpop.f32.mrf.mxu1 }
 0x215   : > { %1934 = vst [vmem:[%s2943_s30 + $0x140] sm:$0xff] %v1886_v0  ;;  %v1819_v4 = vadd.f32 %v1818_v3, %v1593_v1 }
 0x216   : > { %v1595_v5 = vpop.f32.mrf.mxu0  ;;  %v1820_v6 = vpop.f32.mrf.mxu1 }
 0x217   : > { %v1887_v7 = vadd.f32 %v1819_v4, %v557_v2 }
 0x218   : > { %v1598_v8 = vpop.f32.mrf.mxu0  ;;  %v1823_v10 = vpop.f32.mrf.mxu1 }
 0x219   : > { %1935 = vst [vmem:[%s2943_s30 + $0x148] sm:$0xff] %v1887_v7  ;;  %v1824_v11 = vadd.f32 %v1823_v10, %v1598_v8 }
 0x21a   : > { %v1600_v12 = vpop.f32.mrf.mxu0  ;;  %v1825_v13 = vpop.f32.mrf.mxu1 }
 0x21b   : > { %v1888_v14 = vadd.f32 %v1824_v11, %v558_v9 }
 0x21c   : > { %v1601_v15 = vpop.f32.mrf.mxu0  ;;  %v1826_v17 = vpop.f32.mrf.mxu1 }
 0x21d   : > { %1936 = vst [vmem:[%s2943_s30 + $0x150] sm:$0xff] %v1888_v14  ;;  %v1827_v18 = vadd.f32 %v1826_v17, %v1601_v15 }
 0x21e   : > { %v1603_v19 = vpop.f32.mrf.mxu0  ;;  %v1828_v20 = vpop.f32.mrf.mxu1 }
 0x21f   : > { %v1889_v21 = vadd.f32 %v1827_v18, %v559_v16 }
 0x220   : > { %v1606_v22 = vpop.f32.mrf.mxu0  ;;  %v1831_v24 = vpop.f32.mrf.mxu1 }
 0x221   : > { %1937 = vst [vmem:[%s2943_s30 + $0x158] sm:$0xff] %v1889_v21  ;;  %v1832_v25 = vadd.f32 %v1831_v24, %v1606_v22 }
 0x222   : > { %v1608_v26 = vpop.f32.mrf.mxu0  ;;  %v1833_v27 = vpop.f32.mrf.mxu1 }
 0x223   : > { %v1890_v28 = vadd.f32 %v1832_v25, %v560_v23 }
 0x224   : > { %v1609_v29 = vpop.f32.mrf.mxu0  ;;  %v1834_v31 = vpop.f32.mrf.mxu1 }
 0x225   : > { %1938 = vst [vmem:[%s2943_s30 + $0x160] sm:$0xff] %v1890_v28  ;;  %v1835_v32 = vadd.f32 %v1834_v31, %v1609_v29 }
 0x226   : > { %v1611_v33 = vpop.f32.mrf.mxu0  ;;  %v1836_v34 = vpop.f32.mrf.mxu1 }
 0x227   : > { %v1891_v35 = vadd.f32 %v1835_v32, %v561_v30 }
 0x228   : > { %v1614_v36 = vpop.f32.mrf.mxu0  ;;  %v1839_v38 = vpop.f32.mrf.mxu1 }
 0x229   : > { %1939 = vst [vmem:[%s2943_s30 + $0x168] sm:$0xff] %v1891_v35  ;;  %v1840_v39 = vadd.f32 %v1839_v38, %v1614_v36 }
 0x22a   : > { %v1616_v40 = vpop.f32.mrf.mxu0  ;;  %v1841_v41 = vpop.f32.mrf.mxu1 }
 0x22b   : > { %v1892_v42 = vadd.f32 %v1840_v39, %v562_v37 }
 0x22c   : > { %v1617_v43 = vpop.f32.mrf.mxu0  ;;  %v1842_v45 = vpop.f32.mrf.mxu1 }
 0x22d   : > { %1940 = vst [vmem:[%s2943_s30 + $0x170] sm:$0xff] %v1892_v42  ;;  %v1843_v46 = vadd.f32 %v1842_v45, %v1617_v43  ;;  %1945 = sbr.rel (%p2355_p13) target bundleno = 590 (0x24e), region = 63 }
 0x22e   : > { %v1619_v47 = vpop.f32.mrf.mxu0  ;;  %v1844_v48 = vpop.f32.mrf.mxu1 }
 0x22f   : > { %v1893_v49 = vadd.f32 %v1843_v46, %v563_v44 }
 0x231   : > { %1941 = vst [vmem:[%s2943_s30 + $0x178] sm:$0xff] %v1893_v49 }
 0x232   : > { %v1946_v50 = vld [vmem:[%s2943_s30] sm:$0xff]  ;;  %v1947_v52 = vld [vmem:[%s2943_s30 + $0x8] sm:$0xff]  ;;  %v1948_v55 = vld [vmem:[%s2943_s30 + $0x10] sm:$0xff] }
 0x233   : > { %v3257_v51 = vld [vmem:[%s3425_s2] ss:$0 sm:$0xff]  ;;  %v1949_v56 = vld [vmem:[%s2943_s30 + $0x18] sm:$0xff]  ;;  %v1951_v61 = vld [vmem:[%s2943_s30 + $0x28] sm:$0xff] }
 0x234   : > { %v2001_v53 = vadd.f32 %v3257_v51, %v1946_v50  ;;  %v2002_v54 = vadd.f32 %v3257_v51, %v1947_v52  ;;  %v1950_v57 = vld [vmem:[%s2943_s30 + $0x20] sm:$0xff]  ;;  %v2003_v58 = vadd.f32 %v3257_v51, %v1948_v55  ;;  %v2004_v59 = vadd.f32 %v3257_v51, %v1949_v56  ;;  %v1952_v62 = vld [vmem:[%s2943_s30 + $0x30] sm:$0xff]  ;;  %v1953_v63 = vld [vmem:[%s2943_s30 + $0x38] sm:$0xff] }
 0x235   : > { %v2005_v60 = vadd.f32 %v3257_v51, %v1950_v57  ;;  %v2006_v0 = vadd.f32 %v3257_v51, %v1951_v61  ;;  %v2007_v1 = vadd.f32 %v3257_v51, %v1952_v62  ;;  %v2008_v2 = vadd.f32 %v3257_v51, %v1953_v63  ;;  %v1954_v3 = vld [vmem:[%s2943_s30 + $0x40] sm:$0xff]  ;;  %v1955_v4 = vld [vmem:[%s2943_s30 + $0x48] sm:$0xff]  ;;  %v1956_v5 = vld [vmem:[%s2943_s30 + $0x50] sm:$0xff] }
 0x236   : > { %2049 = vst [vmem:[%s2943_s30] sm:$0xff] %v2001_v53  ;;  %2050 = vst [vmem:[%s2943_s30 + $0x8] sm:$0xff] %v2002_v54  ;;  %v2009_v6 = vadd.f32 %v3257_v51, %v1954_v3  ;;  %v2010_v7 = vadd.f32 %v3257_v51, %v1955_v4  ;;  %v2011_v8 = vadd.f32 %v3257_v51, %v1956_v5  ;;  %v1957_v9 = vld [vmem:[%s2943_s30 + $0x58] sm:$0xff]  ;;  %v1958_v10 = vld [vmem:[%s2943_s30 + $0x60] sm:$0xff] }
 0x237   : > { %2051 = vst [vmem:[%s2943_s30 + $0x10] sm:$0xff] %v2003_v58  ;;  %2052 = vst [vmem:[%s2943_s30 + $0x18] sm:$0xff] %v2004_v59  ;;  %v1959_v11 = vld [vmem:[%s2943_s30 + $0x68] sm:$0xff]  ;;  %v2012_v12 = vadd.f32 %v3257_v51, %v1957_v9  ;;  %v2013_v13 = vadd.f32 %v3257_v51, %v1958_v10  ;;  %v1960_v15 = vld [vmem:[%s2943_s30 + $0x70] sm:$0xff] }
 0x238   : > { %2053 = vst [vmem:[%s2943_s30 + $0x20] sm:$0xff] %v2005_v60  ;;  %2054 = vst [vmem:[%s2943_s30 + $0x28] sm:$0xff] %v2006_v0  ;;  %v2014_v14 = vadd.f32 %v3257_v51, %v1959_v11  ;;  %v1961_v16 = vld [vmem:[%s2943_s30 + $0x78] sm:$0xff]  ;;  %v1962_v17 = vld [vmem:[%s2943_s30 + $0x80] sm:$0xff]  ;;  %v2015_v18 = vadd.f32 %v3257_v51, %v1960_v15 }
 0x239   : > { %2055 = vst [vmem:[%s2943_s30 + $0x30] sm:$0xff] %v2007_v1  ;;  %2056 = vst [vmem:[%s2943_s30 + $0x38] sm:$0xff] %v2008_v2  ;;  %v2016_v19 = vadd.f32 %v3257_v51, %v1961_v16  ;;  %v2017_v20 = vadd.f32 %v3257_v51, %v1962_v17  ;;  %v1963_v21 = vld [vmem:[%s2943_s30 + $0x88] sm:$0xff]  ;;  %v1964_v22 = vld [vmem:[%s2943_s30 + $0x90] sm:$0xff] }
 0x23a   : > { %2057 = vst [vmem:[%s2943_s30 + $0x40] sm:$0xff] %v2009_v6  ;;  %2058 = vst [vmem:[%s2943_s30 + $0x48] sm:$0xff] %v2010_v7  ;;  %v1965_v23 = vld [vmem:[%s2943_s30 + $0x98] sm:$0xff]  ;;  %v2018_v24 = vadd.f32 %v3257_v51, %v1963_v21  ;;  %v2019_v25 = vadd.f32 %v3257_v51, %v1964_v22  ;;  %v1966_v27 = vld [vmem:[%s2943_s30 + $0xa0] sm:$0xff] }
 0x23b   : > { %2059 = vst [vmem:[%s2943_s30 + $0x50] sm:$0xff] %v2011_v8  ;;  %2060 = vst [vmem:[%s2943_s30 + $0x58] sm:$0xff] %v2012_v12  ;;  %v2020_v26 = vadd.f32 %v3257_v51, %v1965_v23  ;;  %v1967_v28 = vld [vmem:[%s2943_s30 + $0xa8] sm:$0xff]  ;;  %v1968_v29 = vld [vmem:[%s2943_s30 + $0xb0] sm:$0xff]  ;;  %v2021_v30 = vadd.f32 %v3257_v51, %v1966_v27 }
 0x23c   : > { %2061 = vst [vmem:[%s2943_s30 + $0x60] sm:$0xff] %v2013_v13  ;;  %2062 = vst [vmem:[%s2943_s30 + $0x68] sm:$0xff] %v2014_v14  ;;  %v2022_v31 = vadd.f32 %v3257_v51, %v1967_v28  ;;  %v2023_v32 = vadd.f32 %v3257_v51, %v1968_v29  ;;  %v1969_v33 = vld [vmem:[%s2943_s30 + $0xb8] sm:$0xff]  ;;  %v1970_v34 = vld [vmem:[%s2943_s30 + $0xc0] sm:$0xff] }
 0x23d   : > { %2063 = vst [vmem:[%s2943_s30 + $0x70] sm:$0xff] %v2015_v18  ;;  %2064 = vst [vmem:[%s2943_s30 + $0x78] sm:$0xff] %v2016_v19  ;;  %v1971_v35 = vld [vmem:[%s2943_s30 + $0xc8] sm:$0xff]  ;;  %v2024_v36 = vadd.f32 %v3257_v51, %v1969_v33  ;;  %v2025_v37 = vadd.f32 %v3257_v51, %v1970_v34  ;;  %v1972_v39 = vld [vmem:[%s2943_s30 + $0xd0] sm:$0xff] }
 0x23e   : > { %2065 = vst [vmem:[%s2943_s30 + $0x80] sm:$0xff] %v2017_v20  ;;  %2066 = vst [vmem:[%s2943_s30 + $0x88] sm:$0xff] %v2018_v24  ;;  %v2026_v38 = vadd.f32 %v3257_v51, %v1971_v35  ;;  %v1973_v40 = vld [vmem:[%s2943_s30 + $0xd8] sm:$0xff]  ;;  %v1974_v41 = vld [vmem:[%s2943_s30 + $0xe0] sm:$0xff]  ;;  %v2027_v42 = vadd.f32 %v3257_v51, %v1972_v39 }
 0x23f   : > { %2067 = vst [vmem:[%s2943_s30 + $0x90] sm:$0xff] %v2019_v25  ;;  %2068 = vst [vmem:[%s2943_s30 + $0x98] sm:$0xff] %v2020_v26  ;;  %v2028_v43 = vadd.f32 %v3257_v51, %v1973_v40  ;;  %v2029_v44 = vadd.f32 %v3257_v51, %v1974_v41  ;;  %v1975_v45 = vld [vmem:[%s2943_s30 + $0xe8] sm:$0xff]  ;;  %v1976_v46 = vld [vmem:[%s2943_s30 + $0xf0] sm:$0xff] }
 0x240   : > { %2069 = vst [vmem:[%s2943_s30 + $0xa0] sm:$0xff] %v2021_v30  ;;  %2070 = vst [vmem:[%s2943_s30 + $0xa8] sm:$0xff] %v2022_v31  ;;  %v1977_v47 = vld [vmem:[%s2943_s30 + $0xf8] sm:$0xff]  ;;  %v2030_v48 = vadd.f32 %v3257_v51, %v1975_v45  ;;  %v2031_v49 = vadd.f32 %v3257_v51, %v1976_v46  ;;  %v1978_v52 = vld [vmem:[%s2943_s30 + $0x100] sm:$0xff] }
 0x241   : > { %2071 = vst [vmem:[%s2943_s30 + $0xb0] sm:$0xff] %v2023_v32  ;;  %2072 = vst [vmem:[%s2943_s30 + $0xb8] sm:$0xff] %v2024_v36  ;;  %v2032_v50 = vadd.f32 %v3257_v51, %v1977_v47  ;;  %v1979_v53 = vld [vmem:[%s2943_s30 + $0x108] sm:$0xff]  ;;  %v1980_v54 = vld [vmem:[%s2943_s30 + $0x110] sm:$0xff]  ;;  %v2033_v55 = vadd.f32 %v3257_v51, %v1978_v52 }
 0x242   : > { %2073 = vst [vmem:[%s2943_s30 + $0xc0] sm:$0xff] %v2025_v37  ;;  %2074 = vst [vmem:[%s2943_s30 + $0xc8] sm:$0xff] %v2026_v38  ;;  %v2034_v56 = vadd.f32 %v3257_v51, %v1979_v53  ;;  %v2035_v57 = vadd.f32 %v3257_v51, %v1980_v54  ;;  %v1981_v58 = vld [vmem:[%s2943_s30 + $0x118] sm:$0xff]  ;;  %v1982_v59 = vld [vmem:[%s2943_s30 + $0x120] sm:$0xff] }
 0x243   : > { %2075 = vst [vmem:[%s2943_s30 + $0xd0] sm:$0xff] %v2027_v42  ;;  %2076 = vst [vmem:[%s2943_s30 + $0xd8] sm:$0xff] %v2028_v43  ;;  %v1983_v60 = vld [vmem:[%s2943_s30 + $0x128] sm:$0xff]  ;;  %v2036_v61 = vadd.f32 %v3257_v51, %v1981_v58  ;;  %v2037_v62 = vadd.f32 %v3257_v51, %v1982_v59  ;;  %v1984_v0 = vld [vmem:[%s2943_s30 + $0x130] sm:$0xff] }
 0x244   : > { %2077 = vst [vmem:[%s2943_s30 + $0xe0] sm:$0xff] %v2029_v44  ;;  %2078 = vst [vmem:[%s2943_s30 + $0xe8] sm:$0xff] %v2030_v48  ;;  %v2038_v63 = vadd.f32 %v3257_v51, %v1983_v60  ;;  %v1985_v1 = vld [vmem:[%s2943_s30 + $0x138] sm:$0xff]  ;;  %v1986_v2 = vld [vmem:[%s2943_s30 + $0x140] sm:$0xff]  ;;  %v2039_v3 = vadd.f32 %v3257_v51, %v1984_v0 }
 0x245   : > { %2079 = vst [vmem:[%s2943_s30 + $0xf0] sm:$0xff] %v2031_v49  ;;  %2080 = vst [vmem:[%s2943_s30 + $0xf8] sm:$0xff] %v2032_v50  ;;  %v2040_v4 = vadd.f32 %v3257_v51, %v1985_v1  ;;  %v2041_v5 = vadd.f32 %v3257_v51, %v1986_v2  ;;  %v1987_v6 = vld [vmem:[%s2943_s30 + $0x148] sm:$0xff]  ;;  %v1988_v7 = vld [vmem:[%s2943_s30 + $0x150] sm:$0xff] }
 0x246   : > { %2081 = vst [vmem:[%s2943_s30 + $0x100] sm:$0xff] %v2033_v55  ;;  %2082 = vst [vmem:[%s2943_s30 + $0x108] sm:$0xff] %v2034_v56  ;;  %v1989_v8 = vld [vmem:[%s2943_s30 + $0x158] sm:$0xff]  ;;  %v2042_v9 = vadd.f32 %v3257_v51, %v1987_v6  ;;  %v2043_v10 = vadd.f32 %v3257_v51, %v1988_v7  ;;  %v1990_v12 = vld [vmem:[%s2943_s30 + $0x160] sm:$0xff] }
 0x247   : > { %2083 = vst [vmem:[%s2943_s30 + $0x110] sm:$0xff] %v2035_v57  ;;  %2084 = vst [vmem:[%s2943_s30 + $0x118] sm:$0xff] %v2036_v61  ;;  %v2044_v11 = vadd.f32 %v3257_v51, %v1989_v8  ;;  %v1991_v13 = vld [vmem:[%s2943_s30 + $0x168] sm:$0xff]  ;;  %v1992_v14 = vld [vmem:[%s2943_s30 + $0x170] sm:$0xff]  ;;  %v2045_v15 = vadd.f32 %v3257_v51, %v1990_v12 }
 0x248   : > { %2085 = vst [vmem:[%s2943_s30 + $0x120] sm:$0xff] %v2037_v62  ;;  %2086 = vst [vmem:[%s2943_s30 + $0x128] sm:$0xff] %v2038_v63  ;;  %v2046_v16 = vadd.f32 %v3257_v51, %v1991_v13  ;;  %v2047_v17 = vadd.f32 %v3257_v51, %v1992_v14  ;;  %v1993_v18 = vld [vmem:[%s2943_s30 + $0x178] sm:$0xff] }
 0x249   : > { %2087 = vst [vmem:[%s2943_s30 + $0x130] sm:$0xff] %v2039_v3  ;;  %2088 = vst [vmem:[%s2943_s30 + $0x138] sm:$0xff] %v2040_v4  ;;  %v2048_v19 = vadd.f32 %v3257_v51, %v1993_v18 }
 0x24a   : > { %2089 = vst [vmem:[%s2943_s30 + $0x140] sm:$0xff] %v2041_v5  ;;  %2090 = vst [vmem:[%s2943_s30 + $0x148] sm:$0xff] %v2042_v9 }
 0x24b   : > { %2091 = vst [vmem:[%s2943_s30 + $0x150] sm:$0xff] %v2043_v10  ;;  %2092 = vst [vmem:[%s2943_s30 + $0x158] sm:$0xff] %v2044_v11 }
 0x24c   : > { %2093 = vst [vmem:[%s2943_s30 + $0x160] sm:$0xff] %v2045_v15  ;;  %2094 = vst [vmem:[%s2943_s30 + $0x168] sm:$0xff] %v2046_v16 }
 0x24d   : > { %2095 = vst [vmem:[%s2943_s30 + $0x170] sm:$0xff] %v2047_v17  ;;  %2096 = vst [vmem:[%s2943_s30 + $0x178] sm:$0xff] %v2048_v19 }
 0x24e PF: > { %s13_s18 = sadd.s32 1, %s2650_s18   ;;  %s3427_s12 = smov %s2630_s13 }
 0x24f   : > { %p10_p0 = scmp.ge.s32.totalorder %s13_s18, 18   ;;  %s3428_s13 = smov %s2725_s25 }
 0x250   : > { %s3429_s14 = smov %s2642_s16  ;;  %s3430_s15 = smov %s2646_s17 }
 0x251   : > { %s3431_s16 = smov %s3434_s19  ;;  %s3432_s17 = smov %s3438_s20 }
 0x252   :  { %12 = sbr.rel (!%p10_p0) target bundleno = 4 (0x4), region = 104 }

// kernel: apply.6
= control target key start
LH: loop header
LB: loop body
LE: loop exit
PB: predicated region body
PF: predicated region fallthrough
CT: control target
= control target key end

     0   :  { %s658_s6 = smov 0   ;;  %s1167_s0 = inlined_call_operand.vmem [shape: f32[2,343,128], index: 0, kind: input, shape index: {}]   ;;  %s1168_s1 = inlined_call_operand.vmem [shape: f32[2,343,128], index: 1, kind: output, shape index: {}]  }
   0x1 LB: > { %s620_s7 = sadd.s32 4294967295, %s646_s6   ;;  %p624_p0 = scmp.ge.s32.totalorder %s646_s6, 1  ;;  %s646_s6 = sphi %s658_s6, %s11_s6  }
   0x2   : > { %p87_p1 = scmp.lt.s32.totalorder %s646_s6, 3 }
   0x4   : > { %p88_p2 = pnand %p624_p0, %p87_p1 }
   0x5   : > { %p107_p3 = scmp.lt.s32.totalorder (!%p88_p2), %s620_s7, 1 }
   0x6   : > { %91 = sbr.rel (%p88_p2) target bundleno = 283 (0x11b), region = 24 }
   0xb   : > { %s1170_s7 = smov (!%p107_p3, %s620_s7), 1  ;;  %vm201_vm0 = vcmask 1046528  }
   0xc   : > { %s629_s8 = smul.u32 344, %s1170_s7 }
   0xe   : > { %s674_s11 = scalar_lea.vmem %s1167_s0, %s629_s8  ;;  %s1049_s14 = scalar_lea.vmem %s1168_s1, %s629_s8 }
   0xf   : > { %v677_v0 = vld [vmem:[%s674_s11] sm:$0xff]  ;;  %v680_v1 = vld [vmem:[%s674_s11 + $0x8] sm:$0xff]  ;;  %v683_v2 = vld [vmem:[%s674_s11 + $0x10] sm:$0xff] }
  0x10   : > { %v160_v3 = vadd.f32 %v680_v1, %v677_v0  ;;  %v688_v4 = vld [vmem:[%s674_s11 + $0x18] sm:$0xff]  ;;  %v692_v6 = vld [vmem:[%s674_s11 + $0x20] sm:$0xff]  ;;  %v696_v8 = vld [vmem:[%s674_s11 + $0x28] sm:$0xff] }
  0x11   : > { %v700_v10 = vld [vmem:[%s674_s11 + $0x30] sm:$0xff]  ;;  %v704_v12 = vld [vmem:[%s674_s11 + $0x38] sm:$0xff]  ;;  %v708_v14 = vld [vmem:[%s674_s11 + $0x40] sm:$0xff] }
  0x12   : > { %v161_v5 = vadd.f32 %v160_v3, %v683_v2  ;;  %v712_v16 = vld [vmem:[%s674_s11 + $0x48] sm:$0xff]  ;;  %v716_v18 = vld [vmem:[%s674_s11 + $0x50] sm:$0xff]  ;;  %v720_v20 = vld [vmem:[%s674_s11 + $0x58] sm:$0xff] }
  0x13   : > { %v724_v22 = vld [vmem:[%s674_s11 + $0x60] sm:$0xff]  ;;  %v728_v24 = vld [vmem:[%s674_s11 + $0x68] sm:$0xff]  ;;  %v732_v26 = vld [vmem:[%s674_s11 + $0x70] sm:$0xff] }
  0x14   : > { %v162_v7 = vadd.f32 %v161_v5, %v688_v4  ;;  %v736_v28 = vld [vmem:[%s674_s11 + $0x78] sm:$0xff]  ;;  %v740_v30 = vld [vmem:[%s674_s11 + $0x80] sm:$0xff]  ;;  %v744_v32 = vld [vmem:[%s674_s11 + $0x88] sm:$0xff] }
  0x15   : > { %v748_v34 = vld [vmem:[%s674_s11 + $0x90] sm:$0xff]  ;;  %v752_v36 = vld [vmem:[%s674_s11 + $0x98] sm:$0xff]  ;;  %v756_v38 = vld [vmem:[%s674_s11 + $0xa0] sm:$0xff] }
  0x16   : > { %v163_v9 = vadd.f32 %v162_v7, %v692_v6  ;;  %v138_v40 = vld [vmem:[%s674_s11 + $0xa8] sm:$0xff]  ;;  %v139_v42 = vld [vmem:[%s674_s11 + $0xb0] sm:$0xff]  ;;  %v140_v44 = vld [vmem:[%s674_s11 + $0xb8] sm:$0xff] }
  0x17   : > { %v141_v46 = vld [vmem:[%s674_s11 + $0xc0] sm:$0xff]  ;;  %v142_v48 = vld [vmem:[%s674_s11 + $0xc8] sm:$0xff]  ;;  %v143_v50 = vld [vmem:[%s674_s11 + $0xd0] sm:$0xff] }
  0x18   : > { %v164_v11 = vadd.f32 %v163_v9, %v696_v8  ;;  %v144_v52 = vld [vmem:[%s674_s11 + $0xd8] sm:$0xff]  ;;  %v145_v54 = vld [vmem:[%s674_s11 + $0xe0] sm:$0xff]  ;;  %v146_v56 = vld [vmem:[%s674_s11 + $0xe8] sm:$0xff] }
  0x19   : > { %v147_v58 = vld [vmem:[%s674_s11 + $0xf0] sm:$0xff]  ;;  %v148_v60 = vld [vmem:[%s674_s11 + $0xf8] sm:$0xff]  ;;  %v149_v62 = vld [vmem:[%s674_s11 + $0x100] sm:$0xff] }
  0x1a   : > { %v165_v13 = vadd.f32 %v164_v11, %v700_v10  ;;  %v150_v3 = vld [vmem:[%s674_s11 + $0x108] sm:$0xff]  ;;  %v151_v7 = vld [vmem:[%s674_s11 + $0x110] sm:$0xff]  ;;  %v152_v11 = vld [vmem:[%s674_s11 + $0x118] sm:$0xff] }
  0x1c   : > { %v166_v15 = vadd.f32 %v165_v13, %v704_v12 }
  0x1e   : > { %v167_v17 = vadd.f32 %v166_v15, %v708_v14  ;;  %v153_v15 = vld [vmem:[%s674_s11 + $0x120] sm:$0xff] }
  0x20   : > { %v168_v19 = vadd.f32 %v167_v17, %v712_v16 }
  0x22   : > { %v169_v21 = vadd.f32 %v168_v19, %v716_v18  ;;  %v154_v19 = vld [vmem:[%s674_s11 + $0x128] sm:$0xff] }
  0x24   : > { %v170_v23 = vadd.f32 %v169_v21, %v720_v20 }
  0x26   : > { %v171_v25 = vadd.f32 %v170_v23, %v724_v22  ;;  %v155_v23 = vld [vmem:[%s674_s11 + $0x130] sm:$0xff] }
  0x28   : > { %v172_v27 = vadd.f32 %v171_v25, %v728_v24 }
  0x2a   : > { %v173_v29 = vadd.f32 %v172_v27, %v732_v26  ;;  %v156_v27 = vld [vmem:[%s674_s11 + $0x138] sm:$0xff] }
  0x2c   : > { %v174_v31 = vadd.f32 %v173_v29, %v736_v28 }
  0x2e   : > { %v175_v33 = vadd.f32 %v174_v31, %v740_v30  ;;  %v157_v31 = vld [vmem:[%s674_s11 + $0x140] sm:$0xff] }
  0x30   : > { %v176_v35 = vadd.f32 %v175_v33, %v744_v32  ;;  %v781_v33 = vld [vmem:[%s674_s11 + $0x150] sm:$0x7f] }
  0x32   : > { %v177_v37 = vadd.f32 %v176_v35, %v748_v34 }
  0x34   : > { %v178_v39 = vadd.f32 %v177_v37, %v752_v36  ;;  %v158_v37 = vld [vmem:[%s674_s11 + $0x148] sm:$0xff] }
  0x36   : > { %v179_v41 = vadd.f32 %v178_v39, %v756_v38 }
  0x38   : > { %v180_v43 = vadd.f32 %v179_v41, %v138_v40  ;;  %v202_v41 = vsel %vm201_vm0, %v781_v33, 0.0 }
  0x3a   : > { %v181_v45 = vadd.f32 %v180_v43, %v139_v42 }
  0x3c   : > { %v182_v47 = vadd.f32 %v181_v45, %v140_v44 }
  0x3e   : > { %v183_v49 = vadd.f32 %v182_v47, %v141_v46 }
  0x40   : > { %v184_v51 = vadd.f32 %v183_v49, %v142_v48 }
  0x42   : > { %v185_v53 = vadd.f32 %v184_v51, %v143_v50 }
  0x44   : > { %v186_v55 = vadd.f32 %v185_v53, %v144_v52 }
  0x46   : > { %v187_v57 = vadd.f32 %v186_v55, %v145_v54 }
  0x48   : > { %v188_v59 = vadd.f32 %v187_v57, %v146_v56 }
  0x4a   : > { %v189_v61 = vadd.f32 %v188_v59, %v147_v58 }
  0x4c   : > { %v190_v63 = vadd.f32 %v189_v61, %v148_v60 }
  0x4e   : > { %v191_v5 = vadd.f32 %v190_v63, %v149_v62 }
  0x50   : > { %v192_v9 = vadd.f32 %v191_v5, %v150_v3 }
  0x52   : > { %v193_v13 = vadd.f32 %v192_v9, %v151_v7 }
  0x54   : > { %v194_v17 = vadd.f32 %v193_v13, %v152_v11 }
  0x56   : > { %v195_v21 = vadd.f32 %v194_v17, %v153_v15 }
  0x58   : > { %v196_v25 = vadd.f32 %v195_v21, %v154_v19 }
  0x5a   : > { %v197_v29 = vadd.f32 %v196_v25, %v155_v23 }
  0x5c   : > { %v198_v35 = vadd.f32 %v197_v29, %v156_v27 }
  0x5e   : > { %v199_v39 = vadd.f32 %v198_v35, %v157_v31 }
  0x60   : > { %v200_v43 = vadd.f32 %v199_v39, %v158_v37 }
  0x62   : > { %v203_v45 = vadd.f32 %v202_v41, %v200_v43 }
  0x64   : > { %v204_v47 = vrot.slane %v203_v45, 4 }
  0x66   : > { %v205_v49 = vadd.f32 %v204_v47, %v203_v45 }
  0x68   : > { %v206_v51 = vrot.slane %v205_v49, 2 }
  0x6a   : > { %v207_v53 = vadd.f32 %v206_v51, %v205_v49 }
  0x6c   : > { %v208_v55 = vrot.slane %v207_v53, 1 }
  0x6e   : > { %v209_v57 = vadd.f32 %v208_v55, %v207_v53 }
  0x70   : > { %v786_v59 = vmul.f32 0.002915452, %v209_v57 }
  0x72   : > { %v789_v61 = vsub.f32 %v138_v40, %v786_v59  ;;  %v792_v63 = vsub.f32 %v139_v42, %v786_v59  ;;  %v795_v5 = vsub.f32 %v140_v44, %v786_v59  ;;  %v798_v9 = vsub.f32 %v141_v46, %v786_v59 }
  0x73   : > { %v801_v13 = vsub.f32 %v142_v48, %v786_v59  ;;  %v804_v17 = vsub.f32 %v143_v50, %v786_v59  ;;  %v807_v21 = vsub.f32 %v144_v52, %v786_v59  ;;  %v810_v40 = vsub.f32 %v145_v54, %v786_v59 }
  0x74   : > { %v813_v42 = vsub.f32 %v146_v56, %v786_v59  ;;  %v816_v44 = vsub.f32 %v147_v58, %v786_v59  ;;  %v819_v46 = vsub.f32 %v148_v60, %v786_v59  ;;  %v822_v48 = vsub.f32 %v149_v62, %v786_v59 }
  0x75   : > { %v825_v50 = vsub.f32 %v150_v3, %v786_v59  ;;  %v828_v52 = vsub.f32 %v151_v7, %v786_v59  ;;  %v831_v54 = vsub.f32 %v152_v11, %v786_v59  ;;  %v834_v56 = vsub.f32 %v153_v15, %v786_v59 }
  0x76   : > { %v837_v58 = vsub.f32 %v154_v19, %v786_v59  ;;  %v840_v60 = vsub.f32 %v155_v23, %v786_v59  ;;  %v843_v62 = vsub.f32 %v156_v27, %v786_v59  ;;  %v846_v3 = vsub.f32 %v157_v31, %v786_v59 }
  0x77   : > { %v849_v7 = vsub.f32 %v158_v37, %v786_v59  ;;  %v853_v11 = vsub.f32 %v677_v0, %v786_v59  ;;  %v857_v15 = vsub.f32 %v680_v1, %v786_v59  ;;  %v861_v19 = vsub.f32 %v683_v2, %v786_v59 }
  0x78   : > { %v865_v23 = vsub.f32 %v688_v4, %v786_v59  ;;  %v873_v0 = vsub.f32 %v692_v6, %v786_v59  ;;  %v879_v2 = vsub.f32 %v696_v8, %v786_v59  ;;  %v885_v31 = vsub.f32 %v700_v10, %v786_v59 }
  0x79   : > { %v255_v25 = vmul.f32 %v853_v11, %v853_v11  ;;  %v256_v27 = vmul.f32 %v857_v15, %v857_v15  ;;  %v257_v1 = vmul.f32 %v861_v19, %v861_v19  ;;  %v891_v37 = vsub.f32 %v704_v12, %v786_v59 }
  0x7a   : > { %v258_v4 = vmul.f32 %v865_v23, %v865_v23  ;;  %v259_v35 = vmul.f32 %v873_v0, %v873_v0  ;;  %v260_v8 = vmul.f32 %v879_v2, %v879_v2  ;;  %v897_v41 = vsub.f32 %v708_v14, %v786_v59 }
  0x7b   : > { %v298_v29 = vadd.f32 %v256_v27, %v255_v25  ;;  %v261_v10 = vmul.f32 %v885_v31, %v885_v31  ;;  %v903_v45 = vsub.f32 %v712_v16, %v786_v59  ;;  %v262_v12 = vmul.f32 %v891_v37, %v891_v37 }
  0x7c   : > { %v909_v49 = vsub.f32 %v716_v18, %v786_v59  ;;  %v263_v14 = vmul.f32 %v897_v41, %v897_v41  ;;  %v915_v53 = vsub.f32 %v720_v20, %v786_v59  ;;  %v921_v57 = vsub.f32 %v724_v22, %v786_v59 }
  0x7d   : > { %v299_v6 = vadd.f32 %v298_v29, %v257_v1  ;;  %v264_v16 = vmul.f32 %v903_v45, %v903_v45  ;;  %v927_v27 = vsub.f32 %v728_v24, %v786_v59 }
  0x7e   : > { %v265_v18 = vmul.f32 %v909_v49, %v909_v49  ;;  %v266_v20 = vmul.f32 %v915_v53, %v915_v53  ;;  %v267_v22 = vmul.f32 %v921_v57, %v921_v57 }
  0x7f   : > { %v300_v39 = vadd.f32 %v299_v6, %v258_v4  ;;  %v933_v4 = vsub.f32 %v732_v26, %v786_v59  ;;  %v268_v24 = vmul.f32 %v927_v27, %v927_v27 }
  0x81   : > { %v301_v43 = vadd.f32 %v300_v39, %v259_v35  ;;  %v939_v35 = vsub.f32 %v736_v28, %v786_v59  ;;  %v269_v26 = vmul.f32 %v933_v4, %v933_v4 }
  0x83   : > { %v302_v47 = vadd.f32 %v301_v43, %v260_v8  ;;  %v945_v8 = vsub.f32 %v740_v30, %v786_v59  ;;  %v270_v28 = vmul.f32 %v939_v35, %v939_v35 }
  0x85   : > { %v303_v51 = vadd.f32 %v302_v47, %v261_v10  ;;  %v951_v10 = vsub.f32 %v744_v32, %v786_v59  ;;  %v271_v30 = vmul.f32 %v945_v8, %v945_v8 }
  0x87   : > { %v304_v55 = vadd.f32 %v303_v51, %v262_v12  ;;  %v957_v12 = vsub.f32 %v748_v34, %v786_v59  ;;  %v272_v32 = vmul.f32 %v951_v10, %v951_v10 }
  0x89   : > { %v305_v25 = vadd.f32 %v304_v55, %v263_v14  ;;  %v963_v14 = vsub.f32 %v752_v36, %v786_v59  ;;  %v273_v34 = vmul.f32 %v957_v12, %v957_v12 }
  0x8b   : > { %v306_v1 = vadd.f32 %v305_v25, %v264_v16  ;;  %v969_v16 = vsub.f32 %v756_v38, %v786_v59  ;;  %v277_v38 = vmul.f32 %v792_v63, %v792_v63 }
  0x8d   : > { %v307_v29 = vadd.f32 %v306_v1, %v265_v18  ;;  %v274_v18 = vmul.f32 %v963_v14, %v963_v14  ;;  %v275_v36 = vmul.f32 %v969_v16, %v969_v16  ;;  %v276_v1 = vmul.f32 %v789_v61, %v789_v61 }
  0x8f   : > { %v308_v6 = vadd.f32 %v307_v29, %v266_v20 }
  0x91   : > { %v309_v39 = vadd.f32 %v308_v6, %v267_v22 }
  0x93   : > { %v310_v43 = vadd.f32 %v309_v39, %v268_v24  ;;  %v278_v24 = vmul.f32 %v795_v5, %v795_v5 }
  0x95   : > { %v311_v47 = vadd.f32 %v310_v43, %v269_v26  ;;  %v279_v26 = vmul.f32 %v798_v9, %v798_v9 }
  0x97   : > { %v312_v51 = vadd.f32 %v311_v47, %v270_v28  ;;  %v280_v28 = vmul.f32 %v801_v13, %v801_v13 }
  0x99   : > { %v313_v55 = vadd.f32 %v312_v51, %v271_v30  ;;  %v281_v30 = vmul.f32 %v804_v17, %v804_v17 }
  0x9b   : > { %v314_v25 = vadd.f32 %v313_v55, %v272_v32  ;;  %v282_v32 = vmul.f32 %v807_v21, %v807_v21 }
  0x9d   : > { %v315_v20 = vadd.f32 %v314_v25, %v273_v34  ;;  %v283_v34 = vmul.f32 %v810_v40, %v810_v40 }
  0x9f   : > { %v316_v22 = vadd.f32 %v315_v20, %v274_v18  ;;  %v284_v18 = vmul.f32 %v813_v42, %v813_v42 }
  0xa1   : > { %v317_v29 = vadd.f32 %v316_v22, %v275_v36  ;;  %v285_v36 = vmul.f32 %v816_v44, %v816_v44 }
  0xa3   : > { %v318_v6 = vadd.f32 %v317_v29, %v276_v1  ;;  %v286_v1 = vmul.f32 %v819_v46, %v819_v46 }
  0xa5   : > { %v319_v39 = vadd.f32 %v318_v6, %v277_v38  ;;  %v287_v38 = vmul.f32 %v822_v48, %v822_v48 }
  0xa7   : > { %v320_v43 = vadd.f32 %v319_v39, %v278_v24  ;;  %v288_v24 = vmul.f32 %v825_v50, %v825_v50 }
  0xa9   : > { %v321_v47 = vadd.f32 %v320_v43, %v279_v26  ;;  %v289_v26 = vmul.f32 %v828_v52, %v828_v52 }
  0xab   : > { %v322_v51 = vadd.f32 %v321_v47, %v280_v28  ;;  %v290_v28 = vmul.f32 %v831_v54, %v831_v54 }
  0xad   : > { %v323_v55 = vadd.f32 %v322_v51, %v281_v30  ;;  %v291_v30 = vmul.f32 %v834_v56, %v834_v56 }
  0xaf   : > { %v324_v25 = vadd.f32 %v323_v55, %v282_v32  ;;  %v292_v32 = vmul.f32 %v837_v58, %v837_v58 }
  0xb1   : > { %v325_v20 = vadd.f32 %v324_v25, %v283_v34  ;;  %v293_v34 = vmul.f32 %v840_v60, %v840_v60  ;;  %v294_v25 = vmul.f32 %v843_v62, %v843_v62 }
  0xb3   : > { %v326_v22 = vadd.f32 %v325_v20, %v284_v18  ;;  %v1015_v18 = vsub.f32 %v781_v33, %v786_v59  ;;  %v295_v20 = vmul.f32 %v846_v3, %v846_v3 }
  0xb5   : > { %v327_v29 = vadd.f32 %v326_v22, %v285_v36  ;;  %v297_v22 = vmul.f32 %v1015_v18, %v1015_v18 }
  0xb7   : > { %v328_v6 = vadd.f32 %v327_v29, %v286_v1 }
  0xb9   : > { %v329_v39 = vadd.f32 %v328_v6, %v287_v38  ;;  %v296_v38 = vmul.f32 %v849_v7, %v849_v7  ;;  %v339_v6 = vsel %vm201_vm0, %v297_v22, 0.0 }
  0xbb   : > { %v330_v43 = vadd.f32 %v329_v39, %v288_v24 }
  0xbd   : > { %v331_v47 = vadd.f32 %v330_v43, %v289_v26 }
  0xbf   : > { %v332_v51 = vadd.f32 %v331_v47, %v290_v28 }
  0xc1   : > { %v333_v55 = vadd.f32 %v332_v51, %v291_v30 }
  0xc3   : > { %v334_v36 = vadd.f32 %v333_v55, %v292_v32 }
  0xc5   : > { %v335_v1 = vadd.f32 %v334_v36, %v293_v34 }
  0xc7   : > { %v336_v29 = vadd.f32 %v335_v1, %v294_v25 }
  0xc9   : > { %v337_v24 = vadd.f32 %v336_v29, %v295_v20 }
  0xcb   : > { %v338_v33 = vadd.f32 %v337_v24, %v296_v38 }
  0xcd   : > { %v340_v59 = vadd.f32 %v339_v6, %v338_v33 }
  0xcf   : > { %v341_v26 = vrot.slane %v340_v59, 4 }
  0xd1   : > { %v342_v39 = vadd.f32 %v341_v26, %v340_v59 }
  0xd3   : > { %v343_v28 = vrot.slane %v342_v39, 2 }
  0xd5   : > { %v344_v43 = vadd.f32 %v343_v28, %v342_v39 }
  0xd7   : > { %v345_v30 = vrot.slane %v344_v43, 1 }
  0xd9   : > { %v346_v47 = vadd.f32 %v345_v30, %v344_v43 }
  0xdb   : > { %v347_v32 = vmul.f32 0.002915452, %v346_v47 }
  0xdd   : > { %v348_v51 = vadd.f32 1e-05, %v347_v32 }
  0xdf   : > { %638 = vrsqrt.f32 %v348_v51 }
  0xec   : > { %v1026_v34 = vpop.eup %638 }
  0xed   : > { %v350_v55 = vmul.f32 %v1026_v34, %v853_v11  ;;  %v351_v25 = vmul.f32 %v1026_v34, %v857_v15  ;;  %v352_v36 = vmul.f32 %v1026_v34, %v861_v19  ;;  %v353_v20 = vmul.f32 %v1026_v34, %v865_v23 }
  0xee   : > { %v354_v1 = vmul.f32 %v1026_v34, %v873_v0  ;;  %v355_v22 = vmul.f32 %v1026_v34, %v879_v2  ;;  %v356_v38 = vmul.f32 %v1026_v34, %v885_v31  ;;  %v357_v11 = vmul.f32 %v1026_v34, %v891_v37 }
  0xef   : > { %vm393_vm1 = vcmp.ge.f32.partialorder %v350_v55, 0.0  ;;  %v436_v15 = vmul.f32 0.2, %v350_v55  ;;  %vm394_vm2 = vcmp.ge.f32.partialorder %v351_v25, 0.0  ;;  %v437_v19 = vmul.f32 0.2, %v351_v25 }
  0xf0   : > { %vm395_vm3 = vcmp.ge.f32.partialorder %v352_v36, 0.0  ;;  %v438_v23 = vmul.f32 0.2, %v352_v36  ;;  %vm396_vm4 = vcmp.ge.f32.partialorder %v353_v20, 0.0  ;;  %v439_v0 = vmul.f32 0.2, %v353_v20 }
  0xf1   : > { %v479_v2 = vsel %vm393_vm1, %v350_v55, %v436_v15  ;;  %v480_v31 = vsel %vm394_vm2, %v351_v25, %v437_v19  ;;  %vm397_vm5 = vcmp.ge.f32.partialorder %v354_v1, 0.0  ;;  %v440_v37 = vmul.f32 0.2, %v354_v1 }
  0xf2   : > { %522 = vst [vmem:[%s1049_s14] sm:$0xff] %v479_v2  ;;  %523 = vst [vmem:[%s1049_s14 + $0x8] sm:$0xff] %v480_v31  ;;  %v481_v29 = vsel %vm395_vm3, %v352_v36, %v438_v23  ;;  %v482_v24 = vsel %vm396_vm4, %v353_v20, %v439_v0  ;;  %vm398_vm6 = vcmp.ge.f32.partialorder %v355_v22, 0.0  ;;  %v441_v6 = vmul.f32 0.2, %v355_v22 }
  0xf3   : > { %524 = vst [vmem:[%s1049_s14 + $0x10] sm:$0xff] %v481_v29  ;;  %525 = vst [vmem:[%s1049_s14 + $0x18] sm:$0xff] %v482_v24  ;;  %v483_v33 = vsel %vm397_vm5, %v354_v1, %v440_v37  ;;  %vm399_vm7 = vcmp.ge.f32.partialorder %v356_v38, 0.0  ;;  %v442_v59 = vmul.f32 0.2, %v356_v38  ;;  %vm400_vm8 = vcmp.ge.f32.partialorder %v357_v11, 0.0 }
  0xf4   : > { %526 = vst [vmem:[%s1049_s14 + $0x20] sm:$0xff] %v483_v33  ;;  %v484_v26 = vsel %vm398_vm6, %v355_v22, %v441_v6  ;;  %v443_v39 = vmul.f32 0.2, %v357_v11  ;;  %v358_v28 = vmul.f32 %v1026_v34, %v897_v41  ;;  %v359_v43 = vmul.f32 %v1026_v34, %v903_v45 }
  0xf5   : > { %527 = vst [vmem:[%s1049_s14 + $0x28] sm:$0xff] %v484_v26  ;;  %v485_v30 = vsel %vm399_vm7, %v356_v38, %v442_v59  ;;  %v360_v47 = vmul.f32 %v1026_v34, %v909_v49  ;;  %v361_v32 = vmul.f32 %v1026_v34, %v915_v53  ;;  %v362_v51 = vmul.f32 %v1026_v34, %v921_v57 }
  0xf6   : > { %528 = vst [vmem:[%s1049_s14 + $0x30] sm:$0xff] %v485_v30  ;;  %v486_v55 = vsel %vm400_vm8, %v357_v11, %v443_v39  ;;  %vm401_vm9 = vcmp.ge.f32.partialorder %v358_v28, 0.0  ;;  %v444_v25 = vmul.f32 0.2, %v358_v28  ;;  %vm402_vm10 = vcmp.ge.f32.partialorder %v359_v43, 0.0 }
  0xf7   : > { %529 = vst [vmem:[%s1049_s14 + $0x38] sm:$0xff] %v486_v55  ;;  %v445_v41 = vmul.f32 0.2, %v359_v43  ;;  %vm403_vm11 = vcmp.ge.f32.partialorder %v360_v47, 0.0  ;;  %v446_v45 = vmul.f32 0.2, %v360_v47  ;;  %v363_v1 = vmul.f32 %v1026_v34, %v927_v27 }
  0xf8   : > { %vm404_vm12 = vcmp.ge.f32.partialorder %v361_v32, 0.0  ;;  %v487_v49 = vsel %vm401_vm9, %v358_v28, %v444_v25  ;;  %v447_v53 = vmul.f32 0.2, %v361_v32  ;;  %vm405_vm13 = vcmp.ge.f32.partialorder %v362_v51, 0.0 }
  0xf9   : > { %v448_v36 = vmul.f32 0.2, %v362_v51  ;;  %530 = vst [vmem:[%s1049_s14 + $0x40] sm:$0xff] %v487_v49  ;;  %v488_v57 = vsel %vm402_vm10, %v359_v43, %v445_v41  ;;  %v489_v20 = vsel %vm403_vm11, %v360_v47, %v446_v45  ;;  %v364_v22 = vmul.f32 %v1026_v34, %v933_v4 }
  0xfa   : > { %531 = vst [vmem:[%s1049_s14 + $0x48] sm:$0xff] %v488_v57  ;;  %532 = vst [vmem:[%s1049_s14 + $0x50] sm:$0xff] %v489_v20  ;;  %v490_v38 = vsel %vm404_vm12, %v361_v32, %v447_v53  ;;  %v365_v15 = vmul.f32 %v1026_v34, %v939_v35  ;;  %v366_v19 = vmul.f32 %v1026_v34, %v945_v8  ;;  %vm406_vm14 = vcmp.ge.f32.partialorder %v363_v1, 0.0 }
  0xfb   : > { %v491_v11 = vsel %vm405_vm13, %v362_v51, %v448_v36  ;;  %533 = vst [vmem:[%s1049_s14 + $0x58] sm:$0xff] %v490_v38  ;;  %v449_v23 = vmul.f32 0.2, %v363_v1  ;;  %vm407_vm15 = vcmp.ge.f32.partialorder %v364_v22, 0.0  ;;  %v450_v27 = vmul.f32 0.2, %v364_v22 }
  0xfc   : > { %534 = vst [vmem:[%s1049_s14 + $0x60] sm:$0xff] %v491_v11  ;;  %vm408_vm0 = vcmp.ge.f32.partialorder %v365_v15, 0.0  ;;  %v451_v4 = vmul.f32 0.2, %v365_v15  ;;  %vm409_vm1 = vcmp.ge.f32.partialorder %v366_v19, 0.0  ;;  %v367_v35 = vmul.f32 %v1026_v34, %v951_v10 }
  0xfd   : > { %v452_v0 = vmul.f32 0.2, %v366_v19  ;;  %v492_v2 = vsel %vm406_vm14, %v363_v1, %v449_v23  ;;  %v493_v31 = vsel %vm407_vm15, %v364_v22, %v450_v27  ;;  %v368_v8 = vmul.f32 %v1026_v34, %v957_v12 }
  0xfe   : > { %535 = vst [vmem:[%s1049_s14 + $0x68] sm:$0xff] %v492_v2  ;;  %536 = vst [vmem:[%s1049_s14 + $0x70] sm:$0xff] %v493_v31  ;;  %v494_v37 = vsel %vm408_vm0, %v365_v15, %v451_v4  ;;  %v369_v24 = vmul.f32 %v1026_v34, %v963_v14  ;;  %v370_v6 = vmul.f32 %v1026_v34, %v969_v16  ;;  %vm410_vm2 = vcmp.ge.f32.partialorder %v367_v35, 0.0 }
  0xff   : > { %v495_v29 = vsel %vm409_vm1, %v366_v19, %v452_v0  ;;  %537 = vst [vmem:[%s1049_s14 + $0x78] sm:$0xff] %v494_v37  ;;  %v453_v33 = vmul.f32 0.2, %v367_v35  ;;  %vm411_vm3 = vcmp.ge.f32.partialorder %v368_v8, 0.0  ;;  %v454_v10 = vmul.f32 0.2, %v368_v8 }
 0x100   : > { %538 = vst [vmem:[%s1049_s14 + $0x80] sm:$0xff] %v495_v29  ;;  %vm412_vm4 = vcmp.ge.f32.partialorder %v369_v24, 0.0  ;;  %v455_v12 = vmul.f32 0.2, %v369_v24  ;;  %vm413_vm5 = vcmp.ge.f32.partialorder %v370_v6, 0.0  ;;  %v371_v14 = vmul.f32 %v1026_v34, %v789_v61 }
 0x101   : > { %v456_v59 = vmul.f32 0.2, %v370_v6  ;;  %v496_v26 = vsel %vm410_vm2, %v367_v35, %v453_v33  ;;  %v497_v39 = vsel %vm411_vm3, %v368_v8, %v454_v10  ;;  %v372_v16 = vmul.f32 %v1026_v34, %v792_v63 }
 0x102   : > { %539 = vst [vmem:[%s1049_s14 + $0x88] sm:$0xff] %v496_v26  ;;  %540 = vst [vmem:[%s1049_s14 + $0x90] sm:$0xff] %v497_v39  ;;  %v498_v28 = vsel %vm412_vm4, %v369_v24, %v455_v12  ;;  %v373_v30 = vmul.f32 %v1026_v34, %v795_v5  ;;  %v374_v47 = vmul.f32 %v1026_v34, %v798_v9  ;;  %vm414_vm6 = vcmp.ge.f32.partialorder %v371_v14, 0.0 }
 0x103   : > { %v499_v43 = vsel %vm413_vm5, %v370_v6, %v456_v59  ;;  %541 = vst [vmem:[%s1049_s14 + $0x98] sm:$0xff] %v498_v28  ;;  %v457_v32 = vmul.f32 0.2, %v371_v14  ;;  %vm415_vm7 = vcmp.ge.f32.partialorder %v372_v16, 0.0  ;;  %v458_v61 = vmul.f32 0.2, %v372_v16 }
 0x104   : > { %542 = vst [vmem:[%s1049_s14 + $0xa0] sm:$0xff] %v499_v43  ;;  %vm416_vm8 = vcmp.ge.f32.partialorder %v373_v30, 0.0  ;;  %v459_v63 = vmul.f32 0.2, %v373_v30  ;;  %vm417_vm9 = vcmp.ge.f32.partialorder %v374_v47, 0.0  ;;  %v375_v5 = vmul.f32 %v1026_v34, %v801_v13 }
 0x105   : > { %v460_v51 = vmul.f32 0.2, %v374_v47  ;;  %v500_v55 = vsel %vm414_vm6, %v371_v14, %v457_v32  ;;  %v501_v25 = vsel %vm415_vm7, %v372_v16, %v458_v61  ;;  %v376_v9 = vmul.f32 %v1026_v34, %v804_v17 }
 0x106   : > { %543 = vst [vmem:[%s1049_s14 + $0xa8] sm:$0xff] %v500_v55  ;;  %544 = vst [vmem:[%s1049_s14 + $0xb0] sm:$0xff] %v501_v25  ;;  %v502_v41 = vsel %vm416_vm8, %v373_v30, %v459_v63  ;;  %v377_v49 = vmul.f32 %v1026_v34, %v807_v21  ;;  %v378_v53 = vmul.f32 %v1026_v34, %v810_v40  ;;  %vm418_vm10 = vcmp.ge.f32.partialorder %v375_v5, 0.0 }
 0x107   : > { %v503_v45 = vsel %vm417_vm9, %v374_v47, %v460_v51  ;;  %545 = vst [vmem:[%s1049_s14 + $0xb8] sm:$0xff] %v502_v41  ;;  %v461_v36 = vmul.f32 0.2, %v375_v5  ;;  %vm419_vm11 = vcmp.ge.f32.partialorder %v376_v9, 0.0  ;;  %v462_v13 = vmul.f32 0.2, %v376_v9 }
 0x108   : > { %546 = vst [vmem:[%s1049_s14 + $0xc0] sm:$0xff] %v503_v45  ;;  %vm420_vm12 = vcmp.ge.f32.partialorder %v377_v49, 0.0  ;;  %v463_v17 = vmul.f32 0.2, %v377_v49  ;;  %vm421_vm13 = vcmp.ge.f32.partialorder %v378_v53, 0.0  ;;  %v379_v21 = vmul.f32 %v1026_v34, %v813_v42 }
 0x109   : > { %v464_v57 = vmul.f32 0.2, %v378_v53  ;;  %v504_v20 = vsel %vm418_vm10, %v375_v5, %v461_v36  ;;  %v505_v1 = vsel %vm419_vm11, %v376_v9, %v462_v13  ;;  %v380_v40 = vmul.f32 %v1026_v34, %v816_v44 }
 0x10a   : > { %547 = vst [vmem:[%s1049_s14 + $0xc8] sm:$0xff] %v504_v20  ;;  %548 = vst [vmem:[%s1049_s14 + $0xd0] sm:$0xff] %v505_v1  ;;  %v506_v22 = vsel %vm420_vm12, %v377_v49, %v463_v17  ;;  %v381_v11 = vmul.f32 %v1026_v34, %v819_v46  ;;  %v382_v15 = vmul.f32 %v1026_v34, %v822_v48  ;;  %vm422_vm14 = vcmp.ge.f32.partialorder %v379_v21, 0.0 }
 0x10b   : > { %v507_v38 = vsel %vm421_vm13, %v378_v53, %v464_v57  ;;  %549 = vst [vmem:[%s1049_s14 + $0xd8] sm:$0xff] %v506_v22  ;;  %v465_v19 = vmul.f32 0.2, %v379_v21  ;;  %vm423_vm15 = vcmp.ge.f32.partialorder %v380_v40, 0.0  ;;  %v466_v42 = vmul.f32 0.2, %v380_v40 }
 0x10c   : > { %550 = vst [vmem:[%s1049_s14 + $0xe0] sm:$0xff] %v507_v38  ;;  %vm424_vm0 = vcmp.ge.f32.partialorder %v381_v11, 0.0  ;;  %v467_v44 = vmul.f32 0.2, %v381_v11  ;;  %vm425_vm1 = vcmp.ge.f32.partialorder %v382_v15, 0.0  ;;  %v383_v46 = vmul.f32 %v1026_v34, %v825_v50 }
 0x10d   : > { %v468_v23 = vmul.f32 0.2, %v382_v15  ;;  %v508_v27 = vsel %vm422_vm14, %v379_v21, %v465_v19  ;;  %v509_v4 = vsel %vm423_vm15, %v380_v40, %v466_v42  ;;  %v384_v48 = vmul.f32 %v1026_v34, %v828_v52 }
 0x10e   : > { %551 = vst [vmem:[%s1049_s14 + $0xe8] sm:$0xff] %v508_v27  ;;  %552 = vst [vmem:[%s1049_s14 + $0xf0] sm:$0xff] %v509_v4  ;;  %v510_v0 = vsel %vm424_vm0, %v381_v11, %v467_v44  ;;  %v385_v31 = vmul.f32 %v1026_v34, %v831_v54  ;;  %v386_v35 = vmul.f32 %v1026_v34, %v834_v56  ;;  %vm426_vm2 = vcmp.ge.f32.partialorder %v383_v46, 0.0 }
 0x10f   : > { %v511_v2 = vsel %vm425_vm1, %v382_v15, %v468_v23  ;;  %553 = vst [vmem:[%s1049_s14 + $0xf8] sm:$0xff] %v510_v0  ;;  %v469_v8 = vmul.f32 0.2, %v383_v46  ;;  %vm427_vm3 = vcmp.ge.f32.partialorder %v384_v48, 0.0  ;;  %v470_v50 = vmul.f32 0.2, %v384_v48 }
 0x110   : > { %554 = vst [vmem:[%s1049_s14 + $0x100] sm:$0xff] %v511_v2  ;;  %vm428_vm4 = vcmp.ge.f32.partialorder %v385_v31, 0.0  ;;  %v471_v52 = vmul.f32 0.2, %v385_v31  ;;  %vm429_vm5 = vcmp.ge.f32.partialorder %v386_v35, 0.0  ;;  %v387_v54 = vmul.f32 %v1026_v34, %v837_v58 }
 0x111   : > { %v472_v37 = vmul.f32 0.2, %v386_v35  ;;  %v512_v29 = vsel %vm426_vm2, %v383_v46, %v469_v8  ;;  %v513_v24 = vsel %vm427_vm3, %v384_v48, %v470_v50  ;;  %v388_v56 = vmul.f32 %v1026_v34, %v840_v60 }
 0x112   : > { %555 = vst [vmem:[%s1049_s14 + $0x108] sm:$0xff] %v512_v29  ;;  %556 = vst [vmem:[%s1049_s14 + $0x110] sm:$0xff] %v513_v24  ;;  %v514_v6 = vsel %vm428_vm4, %v385_v31, %v471_v52  ;;  %v389_v10 = vmul.f32 %v1026_v34, %v843_v62  ;;  %v390_v12 = vmul.f32 %v1026_v34, %v846_v3  ;;  %vm430_vm6 = vcmp.ge.f32.partialorder %v387_v54, 0.0 }
 0x113   : > { %v515_v33 = vsel %vm429_vm5, %v386_v35, %v472_v37  ;;  %557 = vst [vmem:[%s1049_s14 + $0x118] sm:$0xff] %v514_v6  ;;  %v473_v58 = vmul.f32 0.2, %v387_v54  ;;  %vm431_vm7 = vcmp.ge.f32.partialorder %v388_v56, 0.0  ;;  %v474_v60 = vmul.f32 0.2, %v388_v56 }
 0x114   : > { %558 = vst [vmem:[%s1049_s14 + $0x120] sm:$0xff] %v515_v33  ;;  %vm432_vm8 = vcmp.ge.f32.partialorder %v389_v10, 0.0  ;;  %v475_v59 = vmul.f32 0.2, %v389_v10  ;;  %vm433_vm9 = vcmp.ge.f32.partialorder %v390_v12, 0.0  ;;  %v391_v3 = vmul.f32 %v1026_v34, %v849_v7 }
 0x115   : > { %v476_v26 = vmul.f32 0.2, %v390_v12  ;;  %v516_v39 = vsel %vm430_vm6, %v387_v54, %v473_v58  ;;  %v517_v62 = vsel %vm431_vm7, %v388_v56, %v474_v60  ;;  %v392_v14 = vmul.f32 %v1026_v34, %v1015_v18 }
 0x116   : > { %559 = vst [vmem:[%s1049_s14 + $0x128] sm:$0xff] %v516_v39  ;;  %560 = vst [vmem:[%s1049_s14 + $0x130] sm:$0xff] %v517_v62  ;;  %v518_v16 = vsel %vm432_vm8, %v389_v10, %v475_v59  ;;  %vm434_vm10 = vcmp.ge.f32.partialorder %v391_v3, 0.0  ;;  %v477_v43 = vmul.f32 0.2, %v391_v3 }
 0x117   : > { %v519_v28 = vsel %vm433_vm9, %v390_v12, %v476_v26  ;;  %561 = vst [vmem:[%s1049_s14 + $0x138] sm:$0xff] %v518_v16  ;;  %vm435_vm11 = vcmp.ge.f32.partialorder %v392_v14, 0.0  ;;  %v478_v30 = vmul.f32 0.2, %v392_v14 }
 0x118   : > { %562 = vst [vmem:[%s1049_s14 + $0x140] sm:$0xff] %v519_v28  ;;  %v520_v47 = vsel %vm434_vm10, %v391_v3, %v477_v43 }
 0x119   : > { %v521_v32 = vsel %vm435_vm11, %v392_v14, %v478_v30  ;;  %563 = vst [vmem:[%s1049_s14 + $0x148] sm:$0xff] %v520_v47 }
 0x11a   : > { %564 = vst [vmem:[%s1049_s14 + $0x150] sm:$0x7f] %v521_v32 }
 0x11b PF: > { %s11_s6 = sadd.s32 1, %s646_s6  }
 0x11c   : > { %p8_p4 = scmp.ge.s32.totalorder %s11_s6, 4  }
 0x11e   :  { %10 = sbr.rel (!%p8_p4) target bundleno = 1 (0x1), region = 54 }

// kernel: apply.7
= control target key start
LH: loop header
LB: loop body
LE: loop exit
PB: predicated region body
PF: predicated region fallthrough
CT: control target
= control target key end

     0   :  { %s2851_s12 = smov 0   ;;  %s2853_s13 = smov 0   ;;  %s4183_s0 = inlined_call_operand.vmem [shape: bf16[432,8192], index: 0, kind: input, shape index: {}]   ;;  %s4184_s1 = inlined_call_operand.vmem [shape: bf16[8192,128], index: 1, kind: input, shape index: {}]   ;;  %s4185_s2 = inlined_call_operand.vmem [shape: f32[1,128], index: 2, kind: input, shape index: {}]   ;;  %s4186_s3 = inlined_call_operand.vmem [shape: f32[432,128], index: 3, kind: output, shape index: {}]  }
   0x1   :  { %s2855_s14 = smov 0   ;;  %s2857_s15 = smov 0  }
   0x2   :  { %s2859_s16 = smov 0  }
   0x3 LB: > { %s25_s17 = sadd.s32 1, %s2823_s15  ;;  %p48_p1 = scmp.ne.s32.totalorder %s2815_s13, %s2811_s12  ;;  %s2827_s16 = sphi %s2859_s16, %s13_s16   ;;  %s2823_s15 = sphi %s2857_s15, %s4190_s15   ;;  %s2819_s14 = sphi %s2855_s14, %s4189_s14   ;;  %s2815_s13 = sphi %s2853_s13, %s4188_s13   ;;  %s2811_s12 = sphi %s2851_s12, %s4187_s12  }
   0x4   : > { %p26_p0 = scmp.ge.s32.totalorder %s25_s17, 16  ;;  %p49_p2 = scmp.eq.s32.totalorder %s2827_s16, 0 }
   0x5   : > { %s41_s19 = sadd.s32 1, %s2815_s13  ;;  %p2397_p5 = scmp.ge.s32.totalorder %s2827_s16, 16 }
   0x6   : > { %s4192_s17 = smov (%p26_p0, %s25_s17), 0  ;;  %p50_p3 = por %p49_p2, %p48_p1 }
   0x7   : > { %s37_s18 = ssub.s32 %s2823_s15, %s4192_s17  ;;  %162 = sbr.rel (%p2397_p5) target bundleno = 70 (0x46), region = 20 }
   0x8   : > { %p39_p4 = scmp.eq.s32.totalorder %s37_s18, 0 }
   0xa   : > { %s2886_s20 = scalar_select %p39_p4, %s2815_s13, %s41_s19  }
   0xc   : > { %165 = sbr.rel (!%p50_p3) target bundleno = 70 (0x46), region = 24  ;;  %s167_s21 = sand.u32 (%p50_p3), 1, %s2815_s13  }
   0xd   : > { %s2550_s22 = sshll.u32 (%p50_p3), %s2823_s15, 4  ;;  %s2551_s23 = smul.u32 (%p50_p3), 864, %s167_s21 }
   0xe   : > { %s2894_s26 = scalar_lea.vmem (%p50_p3), %s4183_s0, %s2550_s22 }
   0xf   : > { %v188_v0 = vld [vmem:[%s2894_s26] sm:$0xff] (%p50_p3)  ;;  %v190_v1 = vld [vmem:[%s2894_s26 + $0x8] sm:$0xff] (%p50_p3)  ;;  %s2902_s27 = scalar_lea.vmem (%p50_p3), [#allocation2], %s2551_s23 }
  0x10   : > { %v192_v2 = vld [vmem:[%s2894_s26 + $0x100] sm:$0xff] (%p50_p3)  ;;  %v194_v3 = vld [vmem:[%s2894_s26 + $0x108] sm:$0xff] (%p50_p3)  ;;  %189 = vst [vmem:[%s2902_s27] sm:$0xff] (%p50_p3), %v188_v0  ;;  %191 = vst [vmem:[%s2902_s27 + $0x8] sm:$0xff] (%p50_p3), %v190_v1 }
  0x11   : > { %v196_v4 = vld [vmem:[%s2894_s26 + $0x200] sm:$0xff]  ;;  %v198_v5 = vld [vmem:[%s2894_s26 + $0x208] sm:$0xff]  ;;  %193 = vst [vmem:[%s2902_s27 + $0x10] sm:$0xff] %v192_v2  ;;  %195 = vst [vmem:[%s2902_s27 + $0x18] sm:$0xff] %v194_v3 }
  0x12   : > { %197 = vst [vmem:[%s2902_s27 + $0x20] sm:$0xff] %v196_v4  ;;  %199 = vst [vmem:[%s2902_s27 + $0x28] sm:$0xff] %v198_v5  ;;  %v200_v6 = vld [vmem:[%s2894_s26 + $0x300] sm:$0xff]  ;;  %v202_v7 = vld [vmem:[%s2894_s26 + $0x308] sm:$0xff] }
  0x13   : > { %v204_v8 = vld [vmem:[%s2894_s26 + $0x400] sm:$0xff]  ;;  %201 = vst [vmem:[%s2902_s27 + $0x30] sm:$0xff] %v200_v6  ;;  %203 = vst [vmem:[%s2902_s27 + $0x38] sm:$0xff] %v202_v7  ;;  %v206_v9 = vld [vmem:[%s2894_s26 + $0x408] sm:$0xff] }
  0x14   : > { %205 = vst [vmem:[%s2902_s27 + $0x40] sm:$0xff] %v204_v8  ;;  %v208_v10 = vld [vmem:[%s2894_s26 + $0x500] sm:$0xff]  ;;  %v210_v11 = vld [vmem:[%s2894_s26 + $0x508] sm:$0xff]  ;;  %207 = vst [vmem:[%s2902_s27 + $0x48] sm:$0xff] %v206_v9 }
  0x15   : > { %209 = vst [vmem:[%s2902_s27 + $0x50] sm:$0xff] %v208_v10  ;;  %211 = vst [vmem:[%s2902_s27 + $0x58] sm:$0xff] %v210_v11  ;;  %v212_v12 = vld [vmem:[%s2894_s26 + $0x600] sm:$0xff]  ;;  %v214_v13 = vld [vmem:[%s2894_s26 + $0x608] sm:$0xff] }
  0x16   : > { %v216_v14 = vld [vmem:[%s2894_s26 + $0x700] sm:$0xff]  ;;  %213 = vst [vmem:[%s2902_s27 + $0x60] sm:$0xff] %v212_v12  ;;  %215 = vst [vmem:[%s2902_s27 + $0x68] sm:$0xff] %v214_v13  ;;  %v218_v15 = vld [vmem:[%s2894_s26 + $0x708] sm:$0xff] }
  0x17   : > { %217 = vst [vmem:[%s2902_s27 + $0x70] sm:$0xff] %v216_v14  ;;  %v220_v16 = vld [vmem:[%s2894_s26 + $0x800] sm:$0xff]  ;;  %v222_v17 = vld [vmem:[%s2894_s26 + $0x808] sm:$0xff]  ;;  %219 = vst [vmem:[%s2902_s27 + $0x78] sm:$0xff] %v218_v15 }
  0x18   : > { %221 = vst [vmem:[%s2902_s27 + $0x80] sm:$0xff] %v220_v16  ;;  %223 = vst [vmem:[%s2902_s27 + $0x88] sm:$0xff] %v222_v17  ;;  %v224_v18 = vld [vmem:[%s2894_s26 + $0x900] sm:$0xff]  ;;  %v226_v19 = vld [vmem:[%s2894_s26 + $0x908] sm:$0xff] }
  0x19   : > { %v228_v20 = vld [vmem:[%s2894_s26 + $0xa00] sm:$0xff]  ;;  %225 = vst [vmem:[%s2902_s27 + $0x90] sm:$0xff] %v224_v18  ;;  %227 = vst [vmem:[%s2902_s27 + $0x98] sm:$0xff] %v226_v19  ;;  %v230_v21 = vld [vmem:[%s2894_s26 + $0xa08] sm:$0xff] }
  0x1a   : > { %229 = vst [vmem:[%s2902_s27 + $0xa0] sm:$0xff] %v228_v20  ;;  %v232_v22 = vld [vmem:[%s2894_s26 + $0xb00] sm:$0xff]  ;;  %v234_v23 = vld [vmem:[%s2894_s26 + $0xb08] sm:$0xff]  ;;  %231 = vst [vmem:[%s2902_s27 + $0xa8] sm:$0xff] %v230_v21 }
  0x1b   : > { %233 = vst [vmem:[%s2902_s27 + $0xb0] sm:$0xff] %v232_v22  ;;  %235 = vst [vmem:[%s2902_s27 + $0xb8] sm:$0xff] %v234_v23  ;;  %v236_v24 = vld [vmem:[%s2894_s26 + $0xc00] sm:$0xff]  ;;  %v238_v25 = vld [vmem:[%s2894_s26 + $0xc08] sm:$0xff] }
  0x1c   : > { %v240_v26 = vld [vmem:[%s2894_s26 + $0xd00] sm:$0xff]  ;;  %237 = vst [vmem:[%s2902_s27 + $0xc0] sm:$0xff] %v236_v24  ;;  %239 = vst [vmem:[%s2902_s27 + $0xc8] sm:$0xff] %v238_v25  ;;  %v242_v27 = vld [vmem:[%s2894_s26 + $0xd08] sm:$0xff] }
  0x1d   : > { %241 = vst [vmem:[%s2902_s27 + $0xd0] sm:$0xff] %v240_v26  ;;  %v244_v28 = vld [vmem:[%s2894_s26 + $0xe00] sm:$0xff]  ;;  %v246_v29 = vld [vmem:[%s2894_s26 + $0xe08] sm:$0xff]  ;;  %243 = vst [vmem:[%s2902_s27 + $0xd8] sm:$0xff] %v242_v27 }
  0x1e   : > { %245 = vst [vmem:[%s2902_s27 + $0xe0] sm:$0xff] %v244_v28  ;;  %247 = vst [vmem:[%s2902_s27 + $0xe8] sm:$0xff] %v246_v29  ;;  %v248_v30 = vld [vmem:[%s2894_s26 + $0xf00] sm:$0xff]  ;;  %v250_v31 = vld [vmem:[%s2894_s26 + $0xf08] sm:$0xff] }
  0x1f   : > { %v252_v32 = vld [vmem:[%s2894_s26 + $0x1000] sm:$0xff]  ;;  %249 = vst [vmem:[%s2902_s27 + $0xf0] sm:$0xff] %v248_v30  ;;  %251 = vst [vmem:[%s2902_s27 + $0xf8] sm:$0xff] %v250_v31  ;;  %v254_v33 = vld [vmem:[%s2894_s26 + $0x1008] sm:$0xff] }
  0x20   : > { %253 = vst [vmem:[%s2902_s27 + $0x100] sm:$0xff] %v252_v32  ;;  %v256_v34 = vld [vmem:[%s2894_s26 + $0x1100] sm:$0xff]  ;;  %v258_v35 = vld [vmem:[%s2894_s26 + $0x1108] sm:$0xff]  ;;  %255 = vst [vmem:[%s2902_s27 + $0x108] sm:$0xff] %v254_v33 }
  0x21   : > { %257 = vst [vmem:[%s2902_s27 + $0x110] sm:$0xff] %v256_v34  ;;  %259 = vst [vmem:[%s2902_s27 + $0x118] sm:$0xff] %v258_v35  ;;  %v260_v36 = vld [vmem:[%s2894_s26 + $0x1200] sm:$0xff]  ;;  %v262_v37 = vld [vmem:[%s2894_s26 + $0x1208] sm:$0xff] }
  0x22   : > { %v264_v38 = vld [vmem:[%s2894_s26 + $0x1300] sm:$0xff]  ;;  %261 = vst [vmem:[%s2902_s27 + $0x120] sm:$0xff] %v260_v36  ;;  %263 = vst [vmem:[%s2902_s27 + $0x128] sm:$0xff] %v262_v37  ;;  %v266_v39 = vld [vmem:[%s2894_s26 + $0x1308] sm:$0xff] }
  0x23   : > { %265 = vst [vmem:[%s2902_s27 + $0x130] sm:$0xff] %v264_v38  ;;  %v268_v40 = vld [vmem:[%s2894_s26 + $0x1400] sm:$0xff]  ;;  %v270_v41 = vld [vmem:[%s2894_s26 + $0x1408] sm:$0xff]  ;;  %267 = vst [vmem:[%s2902_s27 + $0x138] sm:$0xff] %v266_v39 }
  0x24   : > { %269 = vst [vmem:[%s2902_s27 + $0x140] sm:$0xff] %v268_v40  ;;  %271 = vst [vmem:[%s2902_s27 + $0x148] sm:$0xff] %v270_v41  ;;  %v272_v42 = vld [vmem:[%s2894_s26 + $0x1500] sm:$0xff]  ;;  %v274_v43 = vld [vmem:[%s2894_s26 + $0x1508] sm:$0xff] }
  0x25   : > { %v276_v44 = vld [vmem:[%s2894_s26 + $0x1600] sm:$0xff]  ;;  %273 = vst [vmem:[%s2902_s27 + $0x150] sm:$0xff] %v272_v42  ;;  %275 = vst [vmem:[%s2902_s27 + $0x158] sm:$0xff] %v274_v43  ;;  %v278_v45 = vld [vmem:[%s2894_s26 + $0x1608] sm:$0xff] }
  0x26   : > { %277 = vst [vmem:[%s2902_s27 + $0x160] sm:$0xff] %v276_v44  ;;  %v280_v46 = vld [vmem:[%s2894_s26 + $0x1700] sm:$0xff]  ;;  %v282_v47 = vld [vmem:[%s2894_s26 + $0x1708] sm:$0xff]  ;;  %279 = vst [vmem:[%s2902_s27 + $0x168] sm:$0xff] %v278_v45 }
  0x27   : > { %281 = vst [vmem:[%s2902_s27 + $0x170] sm:$0xff] %v280_v46  ;;  %283 = vst [vmem:[%s2902_s27 + $0x178] sm:$0xff] %v282_v47  ;;  %v284_v48 = vld [vmem:[%s2894_s26 + $0x1800] sm:$0xff]  ;;  %v286_v49 = vld [vmem:[%s2894_s26 + $0x1808] sm:$0xff] }
  0x28   : > { %v288_v50 = vld [vmem:[%s2894_s26 + $0x1900] sm:$0xff]  ;;  %285 = vst [vmem:[%s2902_s27 + $0x180] sm:$0xff] %v284_v48  ;;  %287 = vst [vmem:[%s2902_s27 + $0x188] sm:$0xff] %v286_v49  ;;  %v290_v51 = vld [vmem:[%s2894_s26 + $0x1908] sm:$0xff] }
  0x29   : > { %289 = vst [vmem:[%s2902_s27 + $0x190] sm:$0xff] %v288_v50  ;;  %v292_v52 = vld [vmem:[%s2894_s26 + $0x1a00] sm:$0xff]  ;;  %v294_v53 = vld [vmem:[%s2894_s26 + $0x1a08] sm:$0xff]  ;;  %291 = vst [vmem:[%s2902_s27 + $0x198] sm:$0xff] %v290_v51 }
  0x2a   : > { %293 = vst [vmem:[%s2902_s27 + $0x1a0] sm:$0xff] %v292_v52  ;;  %295 = vst [vmem:[%s2902_s27 + $0x1a8] sm:$0xff] %v294_v53  ;;  %v296_v54 = vld [vmem:[%s2894_s26 + $0x1b00] sm:$0xff]  ;;  %v298_v55 = vld [vmem:[%s2894_s26 + $0x1b08] sm:$0xff] }
  0x2b   : > { %v300_v56 = vld [vmem:[%s2894_s26 + $0x1c00] sm:$0xff]  ;;  %297 = vst [vmem:[%s2902_s27 + $0x1b0] sm:$0xff] %v296_v54  ;;  %299 = vst [vmem:[%s2902_s27 + $0x1b8] sm:$0xff] %v298_v55  ;;  %v302_v57 = vld [vmem:[%s2894_s26 + $0x1c08] sm:$0xff] }
  0x2c   : > { %301 = vst [vmem:[%s2902_s27 + $0x1c0] sm:$0xff] %v300_v56  ;;  %v304_v58 = vld [vmem:[%s2894_s26 + $0x1d00] sm:$0xff]  ;;  %v306_v59 = vld [vmem:[%s2894_s26 + $0x1d08] sm:$0xff]  ;;  %303 = vst [vmem:[%s2902_s27 + $0x1c8] sm:$0xff] %v302_v57 }
  0x2d   : > { %305 = vst [vmem:[%s2902_s27 + $0x1d0] sm:$0xff] %v304_v58  ;;  %307 = vst [vmem:[%s2902_s27 + $0x1d8] sm:$0xff] %v306_v59  ;;  %v308_v60 = vld [vmem:[%s2894_s26 + $0x1e00] sm:$0xff]  ;;  %v310_v61 = vld [vmem:[%s2894_s26 + $0x1e08] sm:$0xff] }
  0x2e   : > { %v312_v62 = vld [vmem:[%s2894_s26 + $0x1f00] sm:$0xff]  ;;  %309 = vst [vmem:[%s2902_s27 + $0x1e0] sm:$0xff] %v308_v60  ;;  %311 = vst [vmem:[%s2902_s27 + $0x1e8] sm:$0xff] %v310_v61  ;;  %v314_v63 = vld [vmem:[%s2894_s26 + $0x1f08] sm:$0xff] }
  0x2f   : > { %313 = vst [vmem:[%s2902_s27 + $0x1f0] sm:$0xff] %v312_v62  ;;  %v316_v0 = vld [vmem:[%s2894_s26 + $0x2000] sm:$0xff]  ;;  %v318_v1 = vld [vmem:[%s2894_s26 + $0x2008] sm:$0xff]  ;;  %315 = vst [vmem:[%s2902_s27 + $0x1f8] sm:$0xff] %v314_v63 }
  0x30   : > { %317 = vst [vmem:[%s2902_s27 + $0x200] sm:$0xff] %v316_v0  ;;  %319 = vst [vmem:[%s2902_s27 + $0x208] sm:$0xff] %v318_v1  ;;  %v320_v2 = vld [vmem:[%s2894_s26 + $0x2100] sm:$0xff]  ;;  %v322_v3 = vld [vmem:[%s2894_s26 + $0x2108] sm:$0xff] }
  0x31   : > { %v324_v4 = vld [vmem:[%s2894_s26 + $0x2200] sm:$0xff]  ;;  %321 = vst [vmem:[%s2902_s27 + $0x210] sm:$0xff] %v320_v2  ;;  %323 = vst [vmem:[%s2902_s27 + $0x218] sm:$0xff] %v322_v3  ;;  %v326_v5 = vld [vmem:[%s2894_s26 + $0x2208] sm:$0xff] }
  0x32   : > { %325 = vst [vmem:[%s2902_s27 + $0x220] sm:$0xff] %v324_v4  ;;  %v328_v6 = vld [vmem:[%s2894_s26 + $0x2300] sm:$0xff]  ;;  %v330_v7 = vld [vmem:[%s2894_s26 + $0x2308] sm:$0xff]  ;;  %327 = vst [vmem:[%s2902_s27 + $0x228] sm:$0xff] %v326_v5 }
  0x33   : > { %329 = vst [vmem:[%s2902_s27 + $0x230] sm:$0xff] %v328_v6  ;;  %331 = vst [vmem:[%s2902_s27 + $0x238] sm:$0xff] %v330_v7  ;;  %v332_v8 = vld [vmem:[%s2894_s26 + $0x2400] sm:$0xff]  ;;  %v334_v9 = vld [vmem:[%s2894_s26 + $0x2408] sm:$0xff] }
  0x34   : > { %v336_v10 = vld [vmem:[%s2894_s26 + $0x2500] sm:$0xff]  ;;  %333 = vst [vmem:[%s2902_s27 + $0x240] sm:$0xff] %v332_v8  ;;  %335 = vst [vmem:[%s2902_s27 + $0x248] sm:$0xff] %v334_v9  ;;  %v338_v11 = vld [vmem:[%s2894_s26 + $0x2508] sm:$0xff] }
  0x35   : > { %337 = vst [vmem:[%s2902_s27 + $0x250] sm:$0xff] %v336_v10  ;;  %v340_v12 = vld [vmem:[%s2894_s26 + $0x2600] sm:$0xff]  ;;  %v342_v13 = vld [vmem:[%s2894_s26 + $0x2608] sm:$0xff]  ;;  %339 = vst [vmem:[%s2902_s27 + $0x258] sm:$0xff] %v338_v11 }
  0x36   : > { %341 = vst [vmem:[%s2902_s27 + $0x260] sm:$0xff] %v340_v12  ;;  %343 = vst [vmem:[%s2902_s27 + $0x268] sm:$0xff] %v342_v13  ;;  %v344_v14 = vld [vmem:[%s2894_s26 + $0x2700] sm:$0xff]  ;;  %v346_v15 = vld [vmem:[%s2894_s26 + $0x2708] sm:$0xff] }
  0x37   : > { %v348_v16 = vld [vmem:[%s2894_s26 + $0x2800] sm:$0xff]  ;;  %345 = vst [vmem:[%s2902_s27 + $0x270] sm:$0xff] %v344_v14  ;;  %347 = vst [vmem:[%s2902_s27 + $0x278] sm:$0xff] %v346_v15  ;;  %v350_v17 = vld [vmem:[%s2894_s26 + $0x2808] sm:$0xff] }
  0x38   : > { %349 = vst [vmem:[%s2902_s27 + $0x280] sm:$0xff] %v348_v16  ;;  %v352_v18 = vld [vmem:[%s2894_s26 + $0x2900] sm:$0xff]  ;;  %v354_v19 = vld [vmem:[%s2894_s26 + $0x2908] sm:$0xff]  ;;  %351 = vst [vmem:[%s2902_s27 + $0x288] sm:$0xff] %v350_v17 }
  0x39   : > { %353 = vst [vmem:[%s2902_s27 + $0x290] sm:$0xff] %v352_v18  ;;  %355 = vst [vmem:[%s2902_s27 + $0x298] sm:$0xff] %v354_v19  ;;  %v356_v20 = vld [vmem:[%s2894_s26 + $0x2a00] sm:$0xff]  ;;  %v358_v21 = vld [vmem:[%s2894_s26 + $0x2a08] sm:$0xff] }
  0x3a   : > { %v360_v22 = vld [vmem:[%s2894_s26 + $0x2b00] sm:$0xff]  ;;  %357 = vst [vmem:[%s2902_s27 + $0x2a0] sm:$0xff] %v356_v20  ;;  %359 = vst [vmem:[%s2902_s27 + $0x2a8] sm:$0xff] %v358_v21  ;;  %v362_v23 = vld [vmem:[%s2894_s26 + $0x2b08] sm:$0xff] }
  0x3b   : > { %361 = vst [vmem:[%s2902_s27 + $0x2b0] sm:$0xff] %v360_v22  ;;  %v364_v24 = vld [vmem:[%s2894_s26 + $0x2c00] sm:$0xff]  ;;  %v366_v25 = vld [vmem:[%s2894_s26 + $0x2c08] sm:$0xff]  ;;  %363 = vst [vmem:[%s2902_s27 + $0x2b8] sm:$0xff] %v362_v23 }
  0x3c   : > { %365 = vst [vmem:[%s2902_s27 + $0x2c0] sm:$0xff] %v364_v24  ;;  %367 = vst [vmem:[%s2902_s27 + $0x2c8] sm:$0xff] %v366_v25  ;;  %v368_v26 = vld [vmem:[%s2894_s26 + $0x2d00] sm:$0xff]  ;;  %v370_v27 = vld [vmem:[%s2894_s26 + $0x2d08] sm:$0xff] }
  0x3d   : > { %v372_v28 = vld [vmem:[%s2894_s26 + $0x2e00] sm:$0xff]  ;;  %369 = vst [vmem:[%s2902_s27 + $0x2d0] sm:$0xff] %v368_v26  ;;  %371 = vst [vmem:[%s2902_s27 + $0x2d8] sm:$0xff] %v370_v27  ;;  %v374_v29 = vld [vmem:[%s2894_s26 + $0x2e08] sm:$0xff] }
  0x3e   : > { %373 = vst [vmem:[%s2902_s27 + $0x2e0] sm:$0xff] %v372_v28  ;;  %v376_v30 = vld [vmem:[%s2894_s26 + $0x2f00] sm:$0xff]  ;;  %v378_v31 = vld [vmem:[%s2894_s26 + $0x2f08] sm:$0xff]  ;;  %375 = vst [vmem:[%s2902_s27 + $0x2e8] sm:$0xff] %v374_v29 }
  0x3f   : > { %377 = vst [vmem:[%s2902_s27 + $0x2f0] sm:$0xff] %v376_v30  ;;  %379 = vst [vmem:[%s2902_s27 + $0x2f8] sm:$0xff] %v378_v31  ;;  %v380_v32 = vld [vmem:[%s2894_s26 + $0x3000] sm:$0xff]  ;;  %v382_v33 = vld [vmem:[%s2894_s26 + $0x3008] sm:$0xff] }
  0x40   : > { %v384_v34 = vld [vmem:[%s2894_s26 + $0x3100] sm:$0xff]  ;;  %381 = vst [vmem:[%s2902_s27 + $0x300] sm:$0xff] %v380_v32  ;;  %383 = vst [vmem:[%s2902_s27 + $0x308] sm:$0xff] %v382_v33  ;;  %v386_v35 = vld [vmem:[%s2894_s26 + $0x3108] sm:$0xff] }
  0x41   : > { %385 = vst [vmem:[%s2902_s27 + $0x310] sm:$0xff] %v384_v34  ;;  %v388_v36 = vld [vmem:[%s2894_s26 + $0x3200] sm:$0xff]  ;;  %v390_v37 = vld [vmem:[%s2894_s26 + $0x3208] sm:$0xff]  ;;  %387 = vst [vmem:[%s2902_s27 + $0x318] sm:$0xff] %v386_v35 }
  0x42   : > { %389 = vst [vmem:[%s2902_s27 + $0x320] sm:$0xff] %v388_v36  ;;  %391 = vst [vmem:[%s2902_s27 + $0x328] sm:$0xff] %v390_v37  ;;  %v392_v38 = vld [vmem:[%s2894_s26 + $0x3300] sm:$0xff]  ;;  %v394_v39 = vld [vmem:[%s2894_s26 + $0x3308] sm:$0xff] }
  0x43   : > { %v396_v40 = vld [vmem:[%s2894_s26 + $0x3400] sm:$0xff]  ;;  %393 = vst [vmem:[%s2902_s27 + $0x330] sm:$0xff] %v392_v38  ;;  %395 = vst [vmem:[%s2902_s27 + $0x338] sm:$0xff] %v394_v39  ;;  %v398_v41 = vld [vmem:[%s2894_s26 + $0x3408] sm:$0xff] }
  0x44   : > { %397 = vst [vmem:[%s2902_s27 + $0x340] sm:$0xff] %v396_v40  ;;  %v400_v42 = vld [vmem:[%s2894_s26 + $0x3500] sm:$0xff]  ;;  %v402_v43 = vld [vmem:[%s2894_s26 + $0x3508] sm:$0xff]  ;;  %399 = vst [vmem:[%s2902_s27 + $0x348] sm:$0xff] %v398_v41 }
  0x45   : > { %401 = vst [vmem:[%s2902_s27 + $0x350] sm:$0xff] %v400_v42  ;;  %403 = vst [vmem:[%s2902_s27 + $0x358] sm:$0xff] %v402_v43 }
  0x46 PF: > { %p2400_p6 = scmp.ge.s32.totalorder %s2827_s16, 1  ;;  %p420_p7 = scmp.lt.s32.totalorder %s2827_s16, 17 }
  0x48   : > { %p421_p8 = pnand %p2400_p6, %p420_p7 }
  0x49   : > { %s427_s28 = sand.u32 (!%p421_p8), 1, %s2811_s12   ;;  %s2401_s29 = sshll.u32 (!%p421_p8), %s2819_s14, 6 }
  0x4a   : > { %424 = sbr.rel (%p421_p8) target bundleno = 618 (0x26a), region = 51  ;;  %p467_p9 = scmp.lt.s32.totalorder (!%p421_p8), %s2401_s29, 1023 }
  0x4b   : > { %s2552_s30 = smul.u32 (!%p421_p8), 864, %s427_s28  ;;  %p2403_p10 = scmp.ne.s32.totalorder (!%p421_p8), %s2819_s14, 0 }
  0x4d   : > { %s3123_s8 = scalar_lea.vmem (!%p421_p8), [#allocation2], %s2552_s30 }
  0x4f   : > { %s4194_s29 = smov (!%p467_p9, %s2401_s29), 1023  ;;  %491 = sbr.rel (%p2403_p10) target bundleno = 112 (0x70), region = 59 }
  0x50   : > { %s2402_s4 = sshll.u32 %s4194_s29, 2 }
  0x51   : > { %s3121_s7 = scalar_lea.vmem %s4184_s1, %s2402_s4 }
  0x54   : > { %v2829_v44 = vmov 0.0  }
  0x55   : > { %492 = vst [vmem:[%s4186_s3] sm:$0xff] %v2829_v44  ;;  %493 = vst [vmem:[%s4186_s3 + $0x8] sm:$0xff] %v2829_v44 }
  0x56   : > { %494 = vst [vmem:[%s4186_s3 + $0x10] sm:$0xff] %v2829_v44  ;;  %495 = vst [vmem:[%s4186_s3 + $0x18] sm:$0xff] %v2829_v44 }
  0x57   : > { %496 = vst [vmem:[%s4186_s3 + $0x20] sm:$0xff] %v2829_v44  ;;  %497 = vst [vmem:[%s4186_s3 + $0x28] sm:$0xff] %v2829_v44 }
  0x58   : > { %498 = vst [vmem:[%s4186_s3 + $0x30] sm:$0xff] %v2829_v44  ;;  %499 = vst [vmem:[%s4186_s3 + $0x38] sm:$0xff] %v2829_v44 }
  0x59   : > { %500 = vst [vmem:[%s4186_s3 + $0x40] sm:$0xff] %v2829_v44  ;;  %501 = vst [vmem:[%s4186_s3 + $0x48] sm:$0xff] %v2829_v44 }
  0x5a   : > { %502 = vst [vmem:[%s4186_s3 + $0x50] sm:$0xff] %v2829_v44  ;;  %503 = vst [vmem:[%s4186_s3 + $0x58] sm:$0xff] %v2829_v44 }
  0x5b   : > { %504 = vst [vmem:[%s4186_s3 + $0x60] sm:$0xff] %v2829_v44  ;;  %505 = vst [vmem:[%s4186_s3 + $0x68] sm:$0xff] %v2829_v44 }
  0x5c   : > { %506 = vst [vmem:[%s4186_s3 + $0x70] sm:$0xff] %v2829_v44  ;;  %507 = vst [vmem:[%s4186_s3 + $0x78] sm:$0xff] %v2829_v44 }
  0x5d   : > { %508 = vst [vmem:[%s4186_s3 + $0x80] sm:$0xff] %v2829_v44  ;;  %509 = vst [vmem:[%s4186_s3 + $0x88] sm:$0xff] %v2829_v44 }
  0x5e   : > { %510 = vst [vmem:[%s4186_s3 + $0x90] sm:$0xff] %v2829_v44  ;;  %511 = vst [vmem:[%s4186_s3 + $0x98] sm:$0xff] %v2829_v44 }
  0x5f   : > { %512 = vst [vmem:[%s4186_s3 + $0xa0] sm:$0xff] %v2829_v44  ;;  %513 = vst [vmem:[%s4186_s3 + $0xa8] sm:$0xff] %v2829_v44 }
  0x60   : > { %514 = vst [vmem:[%s4186_s3 + $0xb0] sm:$0xff] %v2829_v44  ;;  %515 = vst [vmem:[%s4186_s3 + $0xb8] sm:$0xff] %v2829_v44 }
  0x61   : > { %516 = vst [vmem:[%s4186_s3 + $0xc0] sm:$0xff] %v2829_v44  ;;  %517 = vst [vmem:[%s4186_s3 + $0xc8] sm:$0xff] %v2829_v44 }
  0x62   : > { %518 = vst [vmem:[%s4186_s3 + $0xd0] sm:$0xff] %v2829_v44  ;;  %519 = vst [vmem:[%s4186_s3 + $0xd8] sm:$0xff] %v2829_v44 }
  0x63   : > { %520 = vst [vmem:[%s4186_s3 + $0xe0] sm:$0xff] %v2829_v44  ;;  %521 = vst [vmem:[%s4186_s3 + $0xe8] sm:$0xff] %v2829_v44 }
  0x64   : > { %522 = vst [vmem:[%s4186_s3 + $0xf0] sm:$0xff] %v2829_v44  ;;  %523 = vst [vmem:[%s4186_s3 + $0xf8] sm:$0xff] %v2829_v44 }
  0x65   : > { %524 = vst [vmem:[%s4186_s3 + $0x100] sm:$0xff] %v2829_v44  ;;  %525 = vst [vmem:[%s4186_s3 + $0x108] sm:$0xff] %v2829_v44 }
  0x66   : > { %526 = vst [vmem:[%s4186_s3 + $0x110] sm:$0xff] %v2829_v44  ;;  %527 = vst [vmem:[%s4186_s3 + $0x118] sm:$0xff] %v2829_v44 }
  0x67   : > { %528 = vst [vmem:[%s4186_s3 + $0x120] sm:$0xff] %v2829_v44  ;;  %529 = vst [vmem:[%s4186_s3 + $0x128] sm:$0xff] %v2829_v44 }
  0x68   : > { %530 = vst [vmem:[%s4186_s3 + $0x130] sm:$0xff] %v2829_v44  ;;  %531 = vst [vmem:[%s4186_s3 + $0x138] sm:$0xff] %v2829_v44 }
  0x69   : > { %532 = vst [vmem:[%s4186_s3 + $0x140] sm:$0xff] %v2829_v44  ;;  %533 = vst [vmem:[%s4186_s3 + $0x148] sm:$0xff] %v2829_v44 }
  0x6a   : > { %534 = vst [vmem:[%s4186_s3 + $0x150] sm:$0xff] %v2829_v44  ;;  %535 = vst [vmem:[%s4186_s3 + $0x158] sm:$0xff] %v2829_v44 }
  0x6b   : > { %536 = vst [vmem:[%s4186_s3 + $0x160] sm:$0xff] %v2829_v44  ;;  %537 = vst [vmem:[%s4186_s3 + $0x168] sm:$0xff] %v2829_v44 }
  0x6c   : > { %538 = vst [vmem:[%s4186_s3 + $0x170] sm:$0xff] %v2829_v44  ;;  %539 = vst [vmem:[%s4186_s3 + $0x178] sm:$0xff] %v2829_v44 }
  0x6d   : > { %540 = vst [vmem:[%s4186_s3 + $0x180] sm:$0xff] %v2829_v44  ;;  %541 = vst [vmem:[%s4186_s3 + $0x188] sm:$0xff] %v2829_v44 }
  0x6e   : > { %542 = vst [vmem:[%s4186_s3 + $0x190] sm:$0xff] %v2829_v44  ;;  %543 = vst [vmem:[%s4186_s3 + $0x198] sm:$0xff] %v2829_v44 }
  0x6f   : > { %544 = vst [vmem:[%s4186_s3 + $0x1a0] sm:$0xff] %v2829_v44  ;;  %545 = vst [vmem:[%s4186_s3 + $0x1a8] sm:$0xff] %v2829_v44 }
  0x70 PF: > { %v2595_v45 = vld [vmem:[%s3121_s7 + $0x38] sm:$0xff]   ;;  %v2830_v46 = vmov 0   ;;  %v2597_v48 = vld [vmem:[%s3121_s7 + $0x30] sm:$0xff]   ;;  %v2599_v50 = vld [vmem:[%s3121_s7 + $0x28] sm:$0xff]   ;;  %p2544_p11 = scmp.ne.s32.totalorder %s2819_s14, 15 }
  0x71   : > { %1504 = vmatprep.subr.bf16.mxu0 %v2830_v46  ;;  %1753 = vmatprep.subr.bf16.mxu1 %v2830_v46  ;;  %v2596_v47 = vld [vmem:[%s3121_s7 + $0xb8] sm:$0xff]   ;;  %v2598_v49 = vld [vmem:[%s3121_s7 + $0xb0] sm:$0xff]   ;;  %v2600_v51 = vld [vmem:[%s3121_s7 + $0xa8] sm:$0xff]  }
  0x72   : > { %1505 = vmatpush1.bf16.msra.mxu0 %v2595_v45  ;;  %1754 = vmatpush1.bf16.msra.mxu1 %v2596_v47  ;;  %v2601_v52 = vld [vmem:[%s3121_s7 + $0x20] sm:$0xff]   ;;  %v2603_v54 = vld [vmem:[%s3121_s7 + $0x18] sm:$0xff]   ;;  %v2605_v56 = vld [vmem:[%s3121_s7 + $0x10] sm:$0xff]  }
  0x73   : > { %1506 = vmatprep.subr.bf16.mxu0 %v2830_v46  ;;  %1755 = vmatprep.subr.bf16.mxu1 %v2830_v46  ;;  %v2602_v53 = vld [vmem:[%s3121_s7 + $0xa0] sm:$0xff]   ;;  %v2604_v55 = vld [vmem:[%s3121_s7 + $0x98] sm:$0xff]   ;;  %v2606_v57 = vld [vmem:[%s3121_s7 + $0x90] sm:$0xff]  }
  0x74   : > { %v2607_v58 = vld [vmem:[%s3121_s7 + $0x8] sm:$0xff]   ;;  %v2609_v60 = vld [vmem:[%s3121_s7] sm:$0xff]   ;;  %v2611_v62 = vld [vmem:[%s3121_s7 + $0x78] sm:$0xff]  }
  0x75   : > { %v2608_v59 = vld [vmem:[%s3121_s7 + $0x88] sm:$0xff]   ;;  %v2610_v61 = vld [vmem:[%s3121_s7 + $0x80] sm:$0xff]   ;;  %v2612_v63 = vld [vmem:[%s3121_s7 + $0xf8] sm:$0xff]  }
  0x76   : > { %1507 = vmatpush1.bf16.msra.mxu0 %v2597_v48  ;;  %1756 = vmatpush1.bf16.msra.mxu1 %v2598_v49  ;;  %v2629_v0 = vld [vmem:[%s3123_s8 + $0x4] ss:$16 sps:$4 sm:$0xff]   ;;  %v2632_v2 = vld [vmem:[%s3123_s8 + $0xc] ss:$16 sps:$4 sm:$0xff]   ;;  %v2627_v16 = vld [vmem:[%s3123_s8] ss:$16 sps:$4 sm:$0xff]  }
  0x77   : > { %1508 = vmatprep.subr.bf16.mxu0 %v2830_v46  ;;  %1757 = vmatprep.subr.bf16.mxu1 %v2830_v46  ;;  %v2613_v1 = vld [vmem:[%s3121_s7 + $0x70] sm:$0xff]   ;;  %v2615_v4 = vld [vmem:[%s3121_s7 + $0x68] sm:$0xff]   ;;  %v2617_v6 = vld [vmem:[%s3121_s7 + $0x60] sm:$0xff]  }
  0x78   : > { %v2614_v3 = vld [vmem:[%s3121_s7 + $0xf0] sm:$0xff]   ;;  %1536 = vmatprep.mubr.bf16.mxu0 %v2629_v0  ;;  %1785 = vmatprep.mubr.bf16.mxu1 %v2632_v2  ;;  %v2616_v5 = vld [vmem:[%s3121_s7 + $0xe8] sm:$0xff]   ;;  %v2618_v7 = vld [vmem:[%s3121_s7 + $0xe0] sm:$0xff]  }
  0x79   : > { %v2619_v8 = vld [vmem:[%s3121_s7 + $0x58] sm:$0xff]   ;;  %v2621_v10 = vld [vmem:[%s3121_s7 + $0x50] sm:$0xff]   ;;  %v2623_v12 = vld [vmem:[%s3121_s7 + $0x48] sm:$0xff]  }
  0x7a   : > { %1509 = vmatpush1.bf16.msra.mxu0 %v2599_v50  ;;  %1758 = vmatpush1.bf16.msra.mxu1 %v2600_v51  ;;  %v2620_v9 = vld [vmem:[%s3121_s7 + $0xd8] sm:$0xff]   ;;  %v2622_v11 = vld [vmem:[%s3121_s7 + $0xd0] sm:$0xff]   ;;  %v2624_v13 = vld [vmem:[%s3121_s7 + $0xc8] sm:$0xff]  }
  0x7b   : > { %1510 = vmatprep.subr.bf16.mxu0 %v2830_v46  ;;  %1759 = vmatprep.subr.bf16.mxu1 %v2830_v46  ;;  %v2625_v14 = vld [vmem:[%s3121_s7 + $0x40] sm:$0xff]   ;;  %v2630_v17 = vld [vmem:[%s3123_s8 + $0x8] ss:$16 sps:$4 sm:$0xff]   ;;  %v2635_v19 = vld [vmem:[%s3123_s8 + $0x2c] ss:$16 sps:$4 sm:$0xff]  }
  0x7c   : > { %v2626_v15 = vld [vmem:[%s3121_s7 + $0xc0] sm:$0xff]   ;;  %v2638_v21 = vld [vmem:[%s3123_s8 + $0x28] ss:$16 sps:$4 sm:$0xff]   ;;  %v2641_v23 = vld [vmem:[%s3123_s8 + $0x4c] ss:$16 sps:$4 sm:$0xff]  }
  0x7d   : > { %v2633_v18 = vld [vmem:[%s3123_s8 + $0x24] ss:$16 sps:$4 sm:$0xff]   ;;  %v2637_v20 = vld [vmem:[%s3123_s8 + $0x20] ss:$16 sps:$4 sm:$0xff]   ;;  %v2644_v25 = vld [vmem:[%s3123_s8 + $0x48] ss:$16 sps:$4 sm:$0xff]  }
  0x7e   : > { %1511 = vmatpush1.bf16.msra.mxu0 %v2601_v52  ;;  %1760 = vmatpush1.bf16.msra.mxu1 %v2602_v53  ;;  %v2639_v22 = vld [vmem:[%s3123_s8 + $0x44] ss:$16 sps:$4 sm:$0xff]   ;;  %v2643_v24 = vld [vmem:[%s3123_s8 + $0x40] ss:$16 sps:$4 sm:$0xff]   ;;  %v2647_v27 = vld [vmem:[%s3123_s8 + $0x6c] ss:$16 sps:$4 sm:$0xff]  }
  0x7f   : > { %1512 = vmatprep.subr.bf16.mxu0 %v2830_v46  ;;  %1761 = vmatprep.subr.bf16.mxu1 %v2830_v46  ;;  %v2645_v26 = vld [vmem:[%s3123_s8 + $0x64] ss:$16 sps:$4 sm:$0xff]   ;;  %v2649_v28 = vld [vmem:[%s3123_s8 + $0x60] ss:$16 sps:$4 sm:$0xff]   ;;  %v2650_v29 = vld [vmem:[%s3123_s8 + $0x68] ss:$16 sps:$4 sm:$0xff]  }
  0x80   : > { %v2651_v30 = vld [vmem:[%s3123_s8 + $0x84] ss:$16 sps:$4 sm:$0xff]   ;;  %v2653_v31 = vld [vmem:[%s3123_s8 + $0x8c] ss:$16 sps:$4 sm:$0xff]   ;;  %v2655_v32 = vld [vmem:[%s3123_s8 + $0x80] ss:$16 sps:$4 sm:$0xff]  }
  0x81   : > { %v2656_v33 = vld [vmem:[%s3123_s8 + $0x88] ss:$16 sps:$4 sm:$0xff]   ;;  %v2657_v34 = vld [vmem:[%s3123_s8 + $0xa4] ss:$16 sps:$4 sm:$0xff]   ;;  %v2659_v35 = vld [vmem:[%s3123_s8 + $0xac] ss:$16 sps:$4 sm:$0xff]  }
  0x82   : > { %1513 = vmatpush1.bf16.msra.mxu0 %v2603_v54  ;;  %1762 = vmatpush1.bf16.msra.mxu1 %v2604_v55  ;;  %v2661_v36 = vld [vmem:[%s3123_s8 + $0xa0] ss:$16 sps:$4 sm:$0xff]   ;;  %v2662_v37 = vld [vmem:[%s3123_s8 + $0xa8] ss:$16 sps:$4 sm:$0xff]   ;;  %v2663_v38 = vld [vmem:[%s3123_s8 + $0xc4] ss:$16 sps:$4 sm:$0xff]  }
  0x83   : > { %1514 = vmatprep.subr.bf16.mxu0 %v2830_v46  ;;  %1763 = vmatprep.subr.bf16.mxu1 %v2830_v46  ;;  %v2665_v39 = vld [vmem:[%s3123_s8 + $0xcc] ss:$16 sps:$4 sm:$0xff]   ;;  %v2667_v40 = vld [vmem:[%s3123_s8 + $0xc0] ss:$16 sps:$4 sm:$0xff]   ;;  %v2668_v41 = vld [vmem:[%s3123_s8 + $0xc8] ss:$16 sps:$4 sm:$0xff]  }
  0x84   : > { %v2669_v42 = vld [vmem:[%s3123_s8 + $0xe4] ss:$16 sps:$4 sm:$0xff]   ;;  %v2671_v43 = vld [vmem:[%s3123_s8 + $0xec] ss:$16 sps:$4 sm:$0xff]   ;;  %v2673_v44 = vld [vmem:[%s3123_s8 + $0xe0] ss:$16 sps:$4 sm:$0xff]  }
  0x85   : > { %v2674_v45 = vld [vmem:[%s3123_s8 + $0xe8] ss:$16 sps:$4 sm:$0xff]   ;;  %v2677_v47 = vld [vmem:[%s3123_s8 + $0x10c] ss:$16 sps:$4 sm:$0xff]   ;;  %v2679_v48 = vld [vmem:[%s3123_s8 + $0x100] ss:$16 sps:$4 sm:$0xff]  }
  0x86   : > { %1515 = vmatpush1.bf16.msra.mxu0 %v2605_v56  ;;  %1764 = vmatpush1.bf16.msra.mxu1 %v2606_v57  ;;  %v2680_v49 = vld [vmem:[%s3123_s8 + $0x108] ss:$16 sps:$4 sm:$0xff]   ;;  %v2681_v50 = vld [vmem:[%s3123_s8 + $0x124] ss:$16 sps:$4 sm:$0xff]   ;;  %v2683_v51 = vld [vmem:[%s3123_s8 + $0x12c] ss:$16 sps:$4 sm:$0xff]  }
  0x87   : > { %1516 = vmatprep.subr.bf16.mxu0 %v2830_v46  ;;  %1765 = vmatprep.subr.bf16.mxu1 %v2830_v46  ;;  %v2685_v52 = vld [vmem:[%s3123_s8 + $0x120] ss:$16 sps:$4 sm:$0xff]   ;;  %v2686_v53 = vld [vmem:[%s3123_s8 + $0x128] ss:$16 sps:$4 sm:$0xff]   ;;  %v2687_v54 = vld [vmem:[%s3123_s8 + $0x144] ss:$16 sps:$4 sm:$0xff]  }
  0x88   : > { %v2689_v55 = vld [vmem:[%s3123_s8 + $0x14c] ss:$16 sps:$4 sm:$0xff]   ;;  %v2691_v56 = vld [vmem:[%s3123_s8 + $0x140] ss:$16 sps:$4 sm:$0xff]   ;;  %v2692_v57 = vld [vmem:[%s3123_s8 + $0x148] ss:$16 sps:$4 sm:$0xff]  }
  0x89   : > { %v2703_v0 = vld [vmem:[%s3123_s8 + $0x180] ss:$16 sps:$4 sm:$0xff]   ;;  %v2705_v2 = vld [vmem:[%s3123_s8 + $0x1a4] ss:$16 sps:$4 sm:$0xff]  }
  0x8a   : > { %1517 = vmatpush1.bf16.msra.mxu0 %v2607_v58  ;;  %1766 = vmatpush1.bf16.msra.mxu1 %v2608_v59  ;;  %v2693_v58 = vld [vmem:[%s3123_s8 + $0x164] ss:$16 sps:$4 sm:$0xff]   ;;  %v2695_v59 = vld [vmem:[%s3123_s8 + $0x16c] ss:$16 sps:$4 sm:$0xff]  }
  0x8b   : > { %1518 = vmatprep.subr.bf16.mxu0 %v2830_v46  ;;  %1767 = vmatprep.subr.bf16.mxu1 %v2830_v46 }
  0x8e   : > { %1519 = vmatpush1.bf16.msra.mxu0 %v2609_v60  ;;  %1768 = vmatpush1.bf16.msra.mxu1 %v2610_v61  ;;  %v2697_v60 = vld [vmem:[%s3123_s8 + $0x160] ss:$16 sps:$4 sm:$0xff]   ;;  %v2698_v61 = vld [vmem:[%s3123_s8 + $0x168] ss:$16 sps:$4 sm:$0xff]  }
  0x8f   : > { %1520 = vmatprep.subr.bf16.mxu0 %v2830_v46  ;;  %1769 = vmatprep.subr.bf16.mxu1 %v2830_v46 }
  0x92   : > { %1521 = vmatpush2.bf16.msra.mxu0 %v2611_v62  ;;  %1770 = vmatpush2.bf16.msra.mxu1 %v2612_v63  ;;  %v2699_v62 = vld [vmem:[%s3123_s8 + $0x184] ss:$16 sps:$4 sm:$0xff]   ;;  %v2701_v63 = vld [vmem:[%s3123_s8 + $0x18c] ss:$16 sps:$4 sm:$0xff]  }
  0x93   : > { %1522 = vmatprep.subr.bf16.mxu0 %v2830_v46  ;;  %1771 = vmatprep.subr.bf16.mxu1 %v2830_v46 }
  0x96   : > { %1523 = vmatpush2.bf16.msra.mxu0 %v2613_v1  ;;  %1772 = vmatpush2.bf16.msra.mxu1 %v2614_v3  ;;  %v2704_v1 = vld [vmem:[%s3123_s8 + $0x188] ss:$16 sps:$4 sm:$0xff]   ;;  %v2707_v3 = vld [vmem:[%s3123_s8 + $0x1ac] ss:$16 sps:$4 sm:$0xff]  }
  0x97   : > { %1524 = vmatprep.subr.bf16.mxu0 %v2830_v46  ;;  %1773 = vmatprep.subr.bf16.mxu1 %v2830_v46 }
  0x9a   : > { %1525 = vmatpush2.bf16.msra.mxu0 %v2615_v4  ;;  %1774 = vmatpush2.bf16.msra.mxu1 %v2616_v5  ;;  %v2709_v4 = vld [vmem:[%s3123_s8 + $0x1a0] ss:$16 sps:$4 sm:$0xff]   ;;  %v2710_v5 = vld [vmem:[%s3123_s8 + $0x1a8] ss:$16 sps:$4 sm:$0xff]  }
  0x9b   : > { %1526 = vmatprep.subr.bf16.mxu0 %v2830_v46  ;;  %1775 = vmatprep.subr.bf16.mxu1 %v2830_v46 }
  0x9e   : > { %1527 = vmatpush2.bf16.msra.mxu0 %v2617_v6  ;;  %1776 = vmatpush2.bf16.msra.mxu1 %v2618_v7  ;;  %v2711_v6 = vld [vmem:[%s3123_s8 + $0x1c4] ss:$16 sps:$4 sm:$0xff]   ;;  %v2713_v7 = vld [vmem:[%s3123_s8 + $0x1cc] ss:$16 sps:$4 sm:$0xff]  }
  0x9f   : > { %1528 = vmatprep.subr.bf16.mxu0 %v2830_v46  ;;  %1777 = vmatprep.subr.bf16.mxu1 %v2830_v46 }
  0xa2   : > { %1529 = vmatpush2.bf16.msra.mxu0 %v2619_v8  ;;  %1778 = vmatpush2.bf16.msra.mxu1 %v2620_v9  ;;  %v2715_v8 = vld [vmem:[%s3123_s8 + $0x1c0] ss:$16 sps:$4 sm:$0xff]   ;;  %v2716_v9 = vld [vmem:[%s3123_s8 + $0x1c8] ss:$16 sps:$4 sm:$0xff]  }
  0xa3   : > { %1530 = vmatprep.subr.bf16.mxu0 %v2830_v46  ;;  %1779 = vmatprep.subr.bf16.mxu1 %v2830_v46 }
  0xa6   : > { %1531 = vmatpush2.bf16.msra.mxu0 %v2621_v10  ;;  %1780 = vmatpush2.bf16.msra.mxu1 %v2622_v11  ;;  %v2717_v10 = vld [vmem:[%s3123_s8 + $0x1e4] ss:$16 sps:$4 sm:$0xff]   ;;  %v2719_v11 = vld [vmem:[%s3123_s8 + $0x1ec] ss:$16 sps:$4 sm:$0xff]  }
  0xa7   : > { %1532 = vmatprep.subr.bf16.mxu0 %v2830_v46  ;;  %1781 = vmatprep.subr.bf16.mxu1 %v2830_v46 }
  0xaa   : > { %1533 = vmatpush2.bf16.msra.mxu0 %v2623_v12  ;;  %1782 = vmatpush2.bf16.msra.mxu1 %v2624_v13  ;;  %v2721_v12 = vld [vmem:[%s3123_s8 + $0x1e0] ss:$16 sps:$4 sm:$0xff]   ;;  %v2722_v13 = vld [vmem:[%s3123_s8 + $0x1e8] ss:$16 sps:$4 sm:$0xff]  }
  0xab   : > { %1534 = vmatprep.subr.bf16.mxu0 %v2830_v46  ;;  %1783 = vmatprep.subr.bf16.mxu1 %v2830_v46  ;;  %v2675_v46 = vld [vmem:[%s3123_s8 + $0x104] ss:$16 sps:$4 sm:$0xff]  }
  0xae   : > { %1535 = vmatpush2.bf16.msra.mxu0 %v2625_v14  ;;  %1784 = vmatpush2.bf16.msra.mxu1 %v2626_v15  ;;  %v2723_v14 = vld [vmem:[%s3123_s8 + $0x204] ss:$16 sps:$4 sm:$0xff]   ;;  %v2725_v15 = vld [vmem:[%s3123_s8 + $0x20c] ss:$16 sps:$4 sm:$0xff]  }
  0xb1   : > { %1537 = vmatmul.mubr.bf16.vlgmr.msra.gmra.mxu0 %v2627_v16  ;;  %1786 = vmatmul.mubr.bf16.vlgmr.msra.gmra.mxu1 %v2630_v17  ;;  %v2727_v16 = vld [vmem:[%s3123_s8 + $0x200] ss:$16 sps:$4 sm:$0xff]   ;;  %v2728_v17 = vld [vmem:[%s3123_s8 + $0x208] ss:$16 sps:$4 sm:$0xff]  }
  0xb2   : > { %1544 = vmatprep.mubr.bf16.mxu0 %v2633_v18  ;;  %1793 = vmatprep.mubr.bf16.mxu1 %v2635_v19  ;;  %v2729_v18 = vld [vmem:[%s3123_s8 + $0x224] ss:$16 sps:$4 sm:$0xff]   ;;  %v2731_v19 = vld [vmem:[%s3123_s8 + $0x22c] ss:$16 sps:$4 sm:$0xff]  }
  0xb9   : > { %1545 = vmatmul.mubr.bf16.gmra.mxu0 %v2637_v20  ;;  %1794 = vmatmul.mubr.bf16.gmra.mxu1 %v2638_v21  ;;  %v2733_v20 = vld [vmem:[%s3123_s8 + $0x220] ss:$16 sps:$4 sm:$0xff]   ;;  %v2734_v21 = vld [vmem:[%s3123_s8 + $0x228] ss:$16 sps:$4 sm:$0xff]  }
  0xba   : > { %1552 = vmatprep.mubr.bf16.mxu0 %v2639_v22  ;;  %1801 = vmatprep.mubr.bf16.mxu1 %v2641_v23  ;;  %v2735_v22 = vld [vmem:[%s3123_s8 + $0x244] ss:$16 sps:$4 sm:$0xff]   ;;  %v2737_v23 = vld [vmem:[%s3123_s8 + $0x24c] ss:$16 sps:$4 sm:$0xff]  }
  0xc1   : > { %1553 = vmatmul.mubr.bf16.gmra.mxu0 %v2643_v24  ;;  %1802 = vmatmul.mubr.bf16.gmra.mxu1 %v2644_v25  ;;  %v2739_v24 = vld [vmem:[%s3123_s8 + $0x240] ss:$16 sps:$4 sm:$0xff]   ;;  %v2740_v25 = vld [vmem:[%s3123_s8 + $0x248] ss:$16 sps:$4 sm:$0xff]  }
  0xc2   : > { %1560 = vmatprep.mubr.bf16.mxu0 %v2645_v26  ;;  %1809 = vmatprep.mubr.bf16.mxu1 %v2647_v27  ;;  %v2741_v26 = vld [vmem:[%s3123_s8 + $0x264] ss:$16 sps:$4 sm:$0xff]   ;;  %v2743_v27 = vld [vmem:[%s3123_s8 + $0x26c] ss:$16 sps:$4 sm:$0xff]  }
  0xc9   : > { %1561 = vmatmul.mubr.bf16.gmra.mxu0 %v2649_v28  ;;  %1810 = vmatmul.mubr.bf16.gmra.mxu1 %v2650_v29  ;;  %v2745_v28 = vld [vmem:[%s3123_s8 + $0x260] ss:$16 sps:$4 sm:$0xff]   ;;  %v2746_v29 = vld [vmem:[%s3123_s8 + $0x268] ss:$16 sps:$4 sm:$0xff]  }
  0xca   : > { %1568 = vmatprep.mubr.bf16.mxu0 %v2651_v30  ;;  %1817 = vmatprep.mubr.bf16.mxu1 %v2653_v31  ;;  %v2747_v30 = vld [vmem:[%s3123_s8 + $0x284] ss:$16 sps:$4 sm:$0xff]   ;;  %v2749_v31 = vld [vmem:[%s3123_s8 + $0x28c] ss:$16 sps:$4 sm:$0xff]  }
  0xd1   : > { %1569 = vmatmul.mubr.bf16.gmra.mxu0 %v2655_v32  ;;  %1818 = vmatmul.mubr.bf16.gmra.mxu1 %v2656_v33  ;;  %v2751_v32 = vld [vmem:[%s3123_s8 + $0x280] ss:$16 sps:$4 sm:$0xff]   ;;  %v2752_v33 = vld [vmem:[%s3123_s8 + $0x288] ss:$16 sps:$4 sm:$0xff]  }
  0xd2   : > { %1576 = vmatprep.mubr.bf16.mxu0 %v2657_v34  ;;  %1825 = vmatprep.mubr.bf16.mxu1 %v2659_v35  ;;  %v2753_v34 = vld [vmem:[%s3123_s8 + $0x2a4] ss:$16 sps:$4 sm:$0xff]   ;;  %v2755_v35 = vld [vmem:[%s3123_s8 + $0x2ac] ss:$16 sps:$4 sm:$0xff]  }
  0xd9   : > { %1577 = vmatmul.mubr.bf16.gmra.mxu0 %v2661_v36  ;;  %1826 = vmatmul.mubr.bf16.gmra.mxu1 %v2662_v37  ;;  %v2757_v36 = vld [vmem:[%s3123_s8 + $0x2a0] ss:$16 sps:$4 sm:$0xff]   ;;  %v2758_v37 = vld [vmem:[%s3123_s8 + $0x2a8] ss:$16 sps:$4 sm:$0xff]  }
  0xda   : > { %1584 = vmatprep.mubr.bf16.mxu0 %v2663_v38  ;;  %1833 = vmatprep.mubr.bf16.mxu1 %v2665_v39  ;;  %v2759_v38 = vld [vmem:[%s3123_s8 + $0x2c4] ss:$16 sps:$4 sm:$0xff]   ;;  %v2761_v39 = vld [vmem:[%s3123_s8 + $0x2cc] ss:$16 sps:$4 sm:$0xff]  }
  0xe1   : > { %1585 = vmatmul.mubr.bf16.gmra.mxu0 %v2667_v40  ;;  %1834 = vmatmul.mubr.bf16.gmra.mxu1 %v2668_v41  ;;  %v2763_v40 = vld [vmem:[%s3123_s8 + $0x2c0] ss:$16 sps:$4 sm:$0xff]   ;;  %v2764_v41 = vld [vmem:[%s3123_s8 + $0x2c8] ss:$16 sps:$4 sm:$0xff]  }
  0xe2   : > { %1592 = vmatprep.mubr.bf16.mxu0 %v2669_v42  ;;  %1841 = vmatprep.mubr.bf16.mxu1 %v2671_v43  ;;  %v2765_v42 = vld [vmem:[%s3123_s8 + $0x2e4] ss:$16 sps:$4 sm:$0xff]   ;;  %v2767_v43 = vld [vmem:[%s3123_s8 + $0x2ec] ss:$16 sps:$4 sm:$0xff]  }
  0xe9   : > { %1593 = vmatmul.mubr.bf16.gmra.mxu0 %v2673_v44  ;;  %1842 = vmatmul.mubr.bf16.gmra.mxu1 %v2674_v45  ;;  %v2769_v44 = vld [vmem:[%s3123_s8 + $0x2e0] ss:$16 sps:$4 sm:$0xff]   ;;  %v2770_v45 = vld [vmem:[%s3123_s8 + $0x2e8] ss:$16 sps:$4 sm:$0xff]  }
  0xea   : > { %1600 = vmatprep.mubr.bf16.mxu0 %v2675_v46  ;;  %1849 = vmatprep.mubr.bf16.mxu1 %v2677_v47  ;;  %v2771_v46 = vld [vmem:[%s3123_s8 + $0x304] ss:$16 sps:$4 sm:$0xff]   ;;  %v2773_v47 = vld [vmem:[%s3123_s8 + $0x30c] ss:$16 sps:$4 sm:$0xff]  }
  0xf1   : > { %1601 = vmatmul.mubr.bf16.gmra.mxu0 %v2679_v48  ;;  %1850 = vmatmul.mubr.bf16.gmra.mxu1 %v2680_v49  ;;  %v2775_v48 = vld [vmem:[%s3123_s8 + $0x300] ss:$16 sps:$4 sm:$0xff]   ;;  %v2776_v49 = vld [vmem:[%s3123_s8 + $0x308] ss:$16 sps:$4 sm:$0xff]  }
  0xf2   : > { %1608 = vmatprep.mubr.bf16.mxu0 %v2681_v50  ;;  %1857 = vmatprep.mubr.bf16.mxu1 %v2683_v51  ;;  %v2777_v50 = vld [vmem:[%s3123_s8 + $0x324] ss:$16 sps:$4 sm:$0xff]   ;;  %v2779_v51 = vld [vmem:[%s3123_s8 + $0x32c] ss:$16 sps:$4 sm:$0xff]  }
  0xf9   : > { %1609 = vmatmul.mubr.bf16.gmra.mxu0 %v2685_v52  ;;  %1858 = vmatmul.mubr.bf16.gmra.mxu1 %v2686_v53  ;;  %v546_v53 = vld [vmem:[%s4186_s3] sm:$0xff] }
  0xfa   : > { %1616 = vmatprep.mubr.bf16.mxu0 %v2687_v54  ;;  %1865 = vmatprep.mubr.bf16.mxu1 %v2689_v55 }
 0x101   : > { %1617 = vmatmul.mubr.bf16.gmra.mxu0 %v2691_v56  ;;  %1866 = vmatmul.mubr.bf16.gmra.mxu1 %v2692_v57 }
 0x102   : > { %1624 = vmatprep.mubr.bf16.mxu0 %v2693_v58  ;;  %1873 = vmatprep.mubr.bf16.mxu1 %v2695_v59 }
 0x109   : > { %1625 = vmatmul.mubr.bf16.gmra.mxu0 %v2697_v60  ;;  %1874 = vmatmul.mubr.bf16.gmra.mxu1 %v2698_v61  ;;  %v2781_v60 = vld [vmem:[%s3123_s8 + $0x320] ss:$16 sps:$4 sm:$0xff]   ;;  %v547_v61 = vld [vmem:[%s4186_s3 + $0x8] sm:$0xff] }
 0x10a   : > { %1632 = vmatprep.mubr.bf16.mxu0 %v2699_v62  ;;  %1881 = vmatprep.mubr.bf16.mxu1 %v2701_v63  ;;  %v2782_v63 = vld [vmem:[%s3123_s8 + $0x328] ss:$16 sps:$4 sm:$0xff]  }
 0x111   : > { %1633 = vmatmul.mubr.bf16.gmra.mxu0 %v2703_v0  ;;  %1882 = vmatmul.mubr.bf16.gmra.mxu1 %v2704_v1  ;;  %v2783_v0 = vld [vmem:[%s3123_s8 + $0x344] ss:$16 sps:$4 sm:$0xff]  }
 0x112   : > { %1640 = vmatprep.mubr.bf16.mxu0 %v2705_v2  ;;  %1889 = vmatprep.mubr.bf16.mxu1 %v2707_v3  ;;  %v2785_v3 = vld [vmem:[%s3123_s8 + $0x34c] ss:$16 sps:$4 sm:$0xff]  }
 0x119   : > { %1641 = vmatmul.mubr.bf16.gmra.mxu0 %v2709_v4  ;;  %1890 = vmatmul.mubr.bf16.gmra.mxu1 %v2710_v5 }
 0x11a   : > { %1648 = vmatprep.mubr.bf16.mxu0 %v2711_v6  ;;  %1897 = vmatprep.mubr.bf16.mxu1 %v2713_v7  ;;  %v548_v7 = vld [vmem:[%s4186_s3 + $0x10] sm:$0xff] }
 0x121   : > { %1649 = vmatmul.mubr.bf16.gmra.mxu0 %v2715_v8  ;;  %1898 = vmatmul.mubr.bf16.gmra.mxu1 %v2716_v9 }
 0x122   : > { %1656 = vmatprep.mubr.bf16.mxu0 %v2717_v10  ;;  %1905 = vmatprep.mubr.bf16.mxu1 %v2719_v11 }
 0x129   : > { %1657 = vmatmul.mubr.bf16.gmra.mxu0 %v2721_v12  ;;  %1906 = vmatmul.mubr.bf16.gmra.mxu1 %v2722_v13 }
 0x12a   : > { %1664 = vmatprep.mubr.bf16.mxu0 %v2723_v14  ;;  %1913 = vmatprep.mubr.bf16.mxu1 %v2725_v15  ;;  %v2787_v14 = vld [vmem:[%s3123_s8 + $0x340] ss:$16 sps:$4 sm:$0xff]   ;;  %v549_v15 = vld [vmem:[%s4186_s3 + $0x18] sm:$0xff] }
 0x131   : > { %1665 = vmatmul.mubr.bf16.gmra.mxu0 %v2727_v16  ;;  %1914 = vmatmul.mubr.bf16.gmra.mxu1 %v2728_v17  ;;  %v2788_v17 = vld [vmem:[%s3123_s8 + $0x348] ss:$16 sps:$4 sm:$0xff]  }
 0x132   : > { %1672 = vmatprep.mubr.bf16.mxu0 %v2729_v18  ;;  %1921 = vmatprep.mubr.bf16.mxu1 %v2731_v19 }
 0x139   : > { %1673 = vmatmul.mubr.bf16.gmra.mxu0 %v2733_v20  ;;  %1922 = vmatmul.mubr.bf16.gmra.mxu1 %v2734_v21 }
 0x13a   : > { %1680 = vmatprep.mubr.bf16.mxu0 %v2735_v22  ;;  %1929 = vmatprep.mubr.bf16.mxu1 %v2737_v23  ;;  %v550_v23 = vld [vmem:[%s4186_s3 + $0x20] sm:$0xff] }
 0x141   : > { %1681 = vmatmul.mubr.bf16.gmra.mxu0 %v2739_v24  ;;  %1930 = vmatmul.mubr.bf16.gmra.mxu1 %v2740_v25 }
 0x142   : > { %1688 = vmatprep.mubr.bf16.mxu0 %v2741_v26  ;;  %1937 = vmatprep.mubr.bf16.mxu1 %v2743_v27 }
 0x149   : > { %1689 = vmatmul.mubr.bf16.gmra.mxu0 %v2745_v28  ;;  %1938 = vmatmul.mubr.bf16.gmra.mxu1 %v2746_v29 }
 0x14a   : > { %1696 = vmatprep.mubr.bf16.mxu0 %v2747_v30  ;;  %1945 = vmatprep.mubr.bf16.mxu1 %v2749_v31  ;;  %v551_v30 = vld [vmem:[%s4186_s3 + $0x28] sm:$0xff] }
 0x151   : > { %1697 = vmatmul.mubr.bf16.gmra.mxu0 %v2751_v32  ;;  %1946 = vmatmul.mubr.bf16.gmra.mxu1 %v2752_v33 }
 0x152   : > { %1704 = vmatprep.mubr.bf16.mxu0 %v2753_v34  ;;  %1953 = vmatprep.mubr.bf16.mxu1 %v2755_v35 }
 0x159   : > { %1705 = vmatmul.mubr.bf16.gmra.mxu0 %v2757_v36  ;;  %1954 = vmatmul.mubr.bf16.gmra.mxu1 %v2758_v37  ;;  %v552_v37 = vld [vmem:[%s4186_s3 + $0x30] sm:$0xff] }
 0x15a   : > { %1712 = vmatprep.mubr.bf16.mxu0 %v2759_v38  ;;  %1961 = vmatprep.mubr.bf16.mxu1 %v2761_v39 }
 0x161   : > { %1713 = vmatmul.mubr.bf16.gmra.mxu0 %v2763_v40  ;;  %1962 = vmatmul.mubr.bf16.gmra.mxu1 %v2764_v41 }
 0x162   : > { %1720 = vmatprep.mubr.bf16.mxu0 %v2765_v42  ;;  %1969 = vmatprep.mubr.bf16.mxu1 %v2767_v43 }
 0x169   : > { %1721 = vmatmul.mubr.bf16.gmra.mxu0 %v2769_v44  ;;  %1970 = vmatmul.mubr.bf16.gmra.mxu1 %v2770_v45  ;;  %v553_v44 = vld [vmem:[%s4186_s3 + $0x38] sm:$0xff] }
 0x16a   : > { %1728 = vmatprep.mubr.bf16.mxu0 %v2771_v46  ;;  %1977 = vmatprep.mubr.bf16.mxu1 %v2773_v47 }
 0x171   : > { %v1538_v52 = vpop.f32.mrf.mxu0  ;;  %1729 = vmatmul.mubr.bf16.gmra.mxu0 %v2775_v48  ;;  %v1787_v54 = vpop.f32.mrf.mxu1  ;;  %1978 = vmatmul.mubr.bf16.gmra.mxu1 %v2776_v49 }
 0x172   : > { %1736 = vmatprep.mubr.bf16.mxu0 %v2777_v50  ;;  %v1788_v55 = vadd.f32 %v1787_v54, %v1538_v52  ;;  %1985 = vmatprep.mubr.bf16.mxu1 %v2779_v51  ;;  %v554_v51 = vld [vmem:[%s4186_s3 + $0x40] sm:$0xff] }
 0x173   : > { %v1540_v56 = vpop.f32.mrf.mxu0  ;;  %v1789_v57 = vpop.f32.mrf.mxu1 }
 0x174   : > { %v2002_v58 = vadd.f32 %v1788_v55, %v546_v53 }
 0x175   : > { %v1541_v59 = vpop.f32.mrf.mxu0  ;;  %v1790_v62 = vpop.f32.mrf.mxu1 }
 0x176   : > { %2056 = vst [vmem:[%s4186_s3] sm:$0xff] %v2002_v58  ;;  %v1791_v1 = vadd.f32 %v1790_v62, %v1541_v59  ;;  %v555_v58 = vld [vmem:[%s4186_s3 + $0x48] sm:$0xff] }
 0x177   : > { %v1543_v2 = vpop.f32.mrf.mxu0  ;;  %v1792_v4 = vpop.f32.mrf.mxu1 }
 0x178   : > { %v2003_v5 = vadd.f32 %v1791_v1, %v547_v61  ;;  %v556_v1 = vld [vmem:[%s4186_s3 + $0x50] sm:$0xff] }
 0x179   : > { %v1546_v6 = vpop.f32.mrf.mxu0  ;;  %1737 = vmatmul.mubr.bf16.gmra.mxu0 %v2781_v60  ;;  %v1795_v8 = vpop.f32.mrf.mxu1  ;;  %1986 = vmatmul.mubr.bf16.gmra.mxu1 %v2782_v63 }
 0x17a   : > { %1744 = vmatprep.mubr.bf16.mxu0 %v2783_v0  ;;  %2057 = vst [vmem:[%s4186_s3 + $0x8] sm:$0xff] %v2003_v5  ;;  %v1796_v9 = vadd.f32 %v1795_v8, %v1546_v6  ;;  %1993 = vmatprep.mubr.bf16.mxu1 %v2785_v3  ;;  %v557_v8 = vld [vmem:[%s4186_s3 + $0x58] sm:$0xff] }
 0x17b   : > { %v1548_v10 = vpop.f32.mrf.mxu0  ;;  %v1797_v11 = vpop.f32.mrf.mxu1 }
 0x17c   : > { %v2004_v12 = vadd.f32 %v1796_v9, %v548_v7 }
 0x17d   : > { %v1549_v13 = vpop.f32.mrf.mxu0  ;;  %v1798_v16 = vpop.f32.mrf.mxu1 }
 0x17e   : > { %2058 = vst [vmem:[%s4186_s3 + $0x10] sm:$0xff] %v2004_v12  ;;  %v1799_v18 = vadd.f32 %v1798_v16, %v1549_v13 }
 0x17f   : > { %v1551_v19 = vpop.f32.mrf.mxu0  ;;  %v1800_v20 = vpop.f32.mrf.mxu1 }
 0x180   : > { %v2005_v21 = vadd.f32 %v1799_v18, %v549_v15  ;;  %v558_v15 = vld [vmem:[%s4186_s3 + $0x60] sm:$0xff] }
 0x181   : > { %v1554_v22 = vpop.f32.mrf.mxu0  ;;  %1745 = vmatmul.mubr.bf16.gmra.mxu0 %v2787_v14  ;;  %v1803_v24 = vpop.f32.mrf.mxu1  ;;  %1994 = vmatmul.mubr.bf16.gmra.mxu1 %v2788_v17 }
 0x182   : > { %2059 = vst [vmem:[%s4186_s3 + $0x18] sm:$0xff] %v2005_v21  ;;  %v1804_v25 = vadd.f32 %v1803_v24, %v1554_v22  ;;  %v559_v22 = vld [vmem:[%s4186_s3 + $0x68] sm:$0xff] }
 0x183   : > { %v1556_v26 = vpop.f32.mrf.mxu0  ;;  %v1805_v27 = vpop.f32.mrf.mxu1 }
 0x184   : > { %v2006_v28 = vadd.f32 %v1804_v25, %v550_v23 }
 0x185   : > { %v1557_v29 = vpop.f32.mrf.mxu0  ;;  %v1806_v31 = vpop.f32.mrf.mxu1 }
 0x186   : > { %2060 = vst [vmem:[%s4186_s3 + $0x20] sm:$0xff] %v2006_v28  ;;  %v1807_v32 = vadd.f32 %v1806_v31, %v1557_v29  ;;  %v560_v29 = vld [vmem:[%s4186_s3 + $0x70] sm:$0xff] }
 0x187   : > { %v1559_v33 = vpop.f32.mrf.mxu0  ;;  %v1808_v34 = vpop.f32.mrf.mxu1 }
 0x188   : > { %v2007_v35 = vadd.f32 %v1807_v32, %v551_v30 }
 0x189   : > { %v1562_v36 = vpop.f32.mrf.mxu0  ;;  %v1811_v38 = vpop.f32.mrf.mxu1 }
 0x18a   : > { %2061 = vst [vmem:[%s4186_s3 + $0x28] sm:$0xff] %v2007_v35  ;;  %v1812_v39 = vadd.f32 %v1811_v38, %v1562_v36  ;;  %v561_v36 = vld [vmem:[%s4186_s3 + $0x78] sm:$0xff] }
 0x18b   : > { %v1564_v40 = vpop.f32.mrf.mxu0  ;;  %v1813_v41 = vpop.f32.mrf.mxu1 }
 0x18c   : > { %v2008_v42 = vadd.f32 %v1812_v39, %v552_v37 }
 0x18d   : > { %v1565_v43 = vpop.f32.mrf.mxu0  ;;  %v1814_v45 = vpop.f32.mrf.mxu1 }
 0x18e   : > { %2062 = vst [vmem:[%s4186_s3 + $0x30] sm:$0xff] %v2008_v42  ;;  %v1815_v46 = vadd.f32 %v1814_v45, %v1565_v43  ;;  %v562_v43 = vld [vmem:[%s4186_s3 + $0x80] sm:$0xff] }
 0x18f   : > { %v1567_v47 = vpop.f32.mrf.mxu0  ;;  %v1816_v48 = vpop.f32.mrf.mxu1 }
 0x190   : > { %v2009_v49 = vadd.f32 %v1815_v46, %v553_v44 }
 0x191   : > { %v1570_v50 = vpop.f32.mrf.mxu0  ;;  %v1819_v52 = vpop.f32.mrf.mxu1 }
 0x192   : > { %2063 = vst [vmem:[%s4186_s3 + $0x38] sm:$0xff] %v2009_v49  ;;  %v1820_v53 = vadd.f32 %v1819_v52, %v1570_v50  ;;  %v563_v50 = vld [vmem:[%s4186_s3 + $0x88] sm:$0xff] }
 0x193   : > { %v1572_v54 = vpop.f32.mrf.mxu0  ;;  %v1821_v55 = vpop.f32.mrf.mxu1 }
 0x194   : > { %v2010_v56 = vadd.f32 %v1820_v53, %v554_v51 }
 0x195   : > { %v1573_v57 = vpop.f32.mrf.mxu0  ;;  %v1822_v59 = vpop.f32.mrf.mxu1 }
 0x196   : > { %2064 = vst [vmem:[%s4186_s3 + $0x40] sm:$0xff] %v2010_v56  ;;  %v1823_v60 = vadd.f32 %v1822_v59, %v1573_v57  ;;  %v564_v57 = vld [vmem:[%s4186_s3 + $0x90] sm:$0xff] }
 0x197   : > { %v1575_v61 = vpop.f32.mrf.mxu0  ;;  %v1824_v62 = vpop.f32.mrf.mxu1 }
 0x198   : > { %v2011_v63 = vadd.f32 %v1823_v60, %v555_v58 }
 0x199   : > { %v1578_v0 = vpop.f32.mrf.mxu0  ;;  %v1827_v2 = vpop.f32.mrf.mxu1 }
 0x19a   : > { %2065 = vst [vmem:[%s4186_s3 + $0x48] sm:$0xff] %v2011_v63  ;;  %v1828_v3 = vadd.f32 %v1827_v2, %v1578_v0  ;;  %v565_v0 = vld [vmem:[%s4186_s3 + $0x98] sm:$0xff] }
 0x19b   : > { %v1580_v4 = vpop.f32.mrf.mxu0  ;;  %v1829_v5 = vpop.f32.mrf.mxu1 }
 0x19c   : > { %v2012_v6 = vadd.f32 %v1828_v3, %v556_v1 }
 0x19d   : > { %v1581_v7 = vpop.f32.mrf.mxu0  ;;  %v1830_v9 = vpop.f32.mrf.mxu1 }
 0x19e   : > { %2066 = vst [vmem:[%s4186_s3 + $0x50] sm:$0xff] %v2012_v6  ;;  %v1831_v10 = vadd.f32 %v1830_v9, %v1581_v7  ;;  %v566_v7 = vld [vmem:[%s4186_s3 + $0xa0] sm:$0xff] }
 0x19f   : > { %v1583_v11 = vpop.f32.mrf.mxu0  ;;  %v1832_v12 = vpop.f32.mrf.mxu1 }
 0x1a0   : > { %v2013_v13 = vadd.f32 %v1831_v10, %v557_v8 }
 0x1a1   : > { %v1586_v14 = vpop.f32.mrf.mxu0  ;;  %v1835_v16 = vpop.f32.mrf.mxu1 }
 0x1a2   : > { %2067 = vst [vmem:[%s4186_s3 + $0x58] sm:$0xff] %v2013_v13  ;;  %v1836_v17 = vadd.f32 %v1835_v16, %v1586_v14  ;;  %v567_v14 = vld [vmem:[%s4186_s3 + $0xa8] sm:$0xff] }
 0x1a3   : > { %v1588_v18 = vpop.f32.mrf.mxu0  ;;  %v1837_v19 = vpop.f32.mrf.mxu1 }
 0x1a4   : > { %v2014_v20 = vadd.f32 %v1836_v17, %v558_v15 }
 0x1a5   : > { %v1589_v21 = vpop.f32.mrf.mxu0  ;;  %v1838_v23 = vpop.f32.mrf.mxu1 }
 0x1a6   : > { %2068 = vst [vmem:[%s4186_s3 + $0x60] sm:$0xff] %v2014_v20  ;;  %v1839_v24 = vadd.f32 %v1838_v23, %v1589_v21  ;;  %v568_v21 = vld [vmem:[%s4186_s3 + $0xb0] sm:$0xff] }
 0x1a7   : > { %v1591_v25 = vpop.f32.mrf.mxu0  ;;  %v1840_v26 = vpop.f32.mrf.mxu1 }
 0x1a8   : > { %v2015_v27 = vadd.f32 %v1839_v24, %v559_v22 }
 0x1a9   : > { %v1594_v28 = vpop.f32.mrf.mxu0  ;;  %v1843_v30 = vpop.f32.mrf.mxu1 }
 0x1aa   : > { %2069 = vst [vmem:[%s4186_s3 + $0x68] sm:$0xff] %v2015_v27  ;;  %v1844_v31 = vadd.f32 %v1843_v30, %v1594_v28  ;;  %v569_v28 = vld [vmem:[%s4186_s3 + $0xb8] sm:$0xff] }
 0x1ab   : > { %v1596_v32 = vpop.f32.mrf.mxu0  ;;  %v1845_v33 = vpop.f32.mrf.mxu1 }
 0x1ac   : > { %v2016_v34 = vadd.f32 %v1844_v31, %v560_v29 }
 0x1ad   : > { %v1597_v35 = vpop.f32.mrf.mxu0  ;;  %v1846_v37 = vpop.f32.mrf.mxu1 }
 0x1ae   : > { %2070 = vst [vmem:[%s4186_s3 + $0x70] sm:$0xff] %v2016_v34  ;;  %v1847_v38 = vadd.f32 %v1846_v37, %v1597_v35  ;;  %v570_v35 = vld [vmem:[%s4186_s3 + $0xc0] sm:$0xff] }
 0x1af   : > { %v1599_v39 = vpop.f32.mrf.mxu0  ;;  %v1848_v40 = vpop.f32.mrf.mxu1 }
 0x1b0   : > { %v2017_v41 = vadd.f32 %v1847_v38, %v561_v36 }
 0x1b1   : > { %v1602_v42 = vpop.f32.mrf.mxu0  ;;  %v1851_v44 = vpop.f32.mrf.mxu1 }
 0x1b2   : > { %2071 = vst [vmem:[%s4186_s3 + $0x78] sm:$0xff] %v2017_v41  ;;  %v1852_v45 = vadd.f32 %v1851_v44, %v1602_v42  ;;  %v571_v42 = vld [vmem:[%s4186_s3 + $0xc8] sm:$0xff] }
 0x1b3   : > { %v1604_v46 = vpop.f32.mrf.mxu0  ;;  %v1853_v47 = vpop.f32.mrf.mxu1 }
 0x1b4   : > { %v2018_v48 = vadd.f32 %v1852_v45, %v562_v43 }
 0x1b5   : > { %v1605_v49 = vpop.f32.mrf.mxu0  ;;  %v1854_v51 = vpop.f32.mrf.mxu1 }
 0x1b6   : > { %2072 = vst [vmem:[%s4186_s3 + $0x80] sm:$0xff] %v2018_v48  ;;  %v1855_v52 = vadd.f32 %v1854_v51, %v1605_v49  ;;  %v572_v49 = vld [vmem:[%s4186_s3 + $0xd0] sm:$0xff] }
 0x1b7   : > { %v1607_v53 = vpop.f32.mrf.mxu0  ;;  %v1856_v54 = vpop.f32.mrf.mxu1 }
 0x1b8   : > { %v2019_v55 = vadd.f32 %v1855_v52, %v563_v50 }
 0x1b9   : > { %v1610_v56 = vpop.f32.mrf.mxu0  ;;  %v1859_v58 = vpop.f32.mrf.mxu1 }
 0x1ba   : > { %2073 = vst [vmem:[%s4186_s3 + $0x88] sm:$0xff] %v2019_v55  ;;  %v1860_v59 = vadd.f32 %v1859_v58, %v1610_v56  ;;  %v573_v56 = vld [vmem:[%s4186_s3 + $0xd8] sm:$0xff] }
 0x1bb   : > { %v1612_v60 = vpop.f32.mrf.mxu0  ;;  %v1861_v61 = vpop.f32.mrf.mxu1 }
 0x1bc   : > { %v2020_v62 = vadd.f32 %v1860_v59, %v564_v57 }
 0x1bd   : > { %v1613_v63 = vpop.f32.mrf.mxu0  ;;  %v1862_v1 = vpop.f32.mrf.mxu1 }
 0x1be   : > { %2074 = vst [vmem:[%s4186_s3 + $0x90] sm:$0xff] %v2020_v62  ;;  %v1863_v2 = vadd.f32 %v1862_v1, %v1613_v63  ;;  %v574_v63 = vld [vmem:[%s4186_s3 + $0xe0] sm:$0xff] }
 0x1bf   : > { %v1615_v3 = vpop.f32.mrf.mxu0  ;;  %v1864_v4 = vpop.f32.mrf.mxu1 }
 0x1c0   : > { %v2021_v5 = vadd.f32 %v1863_v2, %v565_v0 }
 0x1c1   : > { %v1618_v6 = vpop.f32.mrf.mxu0  ;;  %v1867_v8 = vpop.f32.mrf.mxu1 }
 0x1c2   : > { %2075 = vst [vmem:[%s4186_s3 + $0x98] sm:$0xff] %v2021_v5  ;;  %v1868_v9 = vadd.f32 %v1867_v8, %v1618_v6  ;;  %v575_v6 = vld [vmem:[%s4186_s3 + $0xe8] sm:$0xff] }
 0x1c3   : > { %v1620_v10 = vpop.f32.mrf.mxu0  ;;  %v1869_v11 = vpop.f32.mrf.mxu1 }
 0x1c4   : > { %v2022_v12 = vadd.f32 %v1868_v9, %v566_v7 }
 0x1c5   : > { %v1621_v13 = vpop.f32.mrf.mxu0  ;;  %v1870_v15 = vpop.f32.mrf.mxu1 }
 0x1c6   : > { %2076 = vst [vmem:[%s4186_s3 + $0xa0] sm:$0xff] %v2022_v12  ;;  %v1871_v16 = vadd.f32 %v1870_v15, %v1621_v13  ;;  %v576_v13 = vld [vmem:[%s4186_s3 + $0xf0] sm:$0xff] }
 0x1c7   : > { %v1623_v17 = vpop.f32.mrf.mxu0  ;;  %v1872_v18 = vpop.f32.mrf.mxu1 }
 0x1c8   : > { %v2023_v19 = vadd.f32 %v1871_v16, %v567_v14 }
 0x1c9   : > { %v1626_v20 = vpop.f32.mrf.mxu0  ;;  %v1875_v22 = vpop.f32.mrf.mxu1 }
 0x1ca   : > { %2077 = vst [vmem:[%s4186_s3 + $0xa8] sm:$0xff] %v2023_v19  ;;  %v1876_v23 = vadd.f32 %v1875_v22, %v1626_v20  ;;  %v577_v20 = vld [vmem:[%s4186_s3 + $0xf8] sm:$0xff] }
 0x1cb   : > { %v1628_v24 = vpop.f32.mrf.mxu0  ;;  %v1877_v25 = vpop.f32.mrf.mxu1 }
 0x1cc   : > { %v2024_v26 = vadd.f32 %v1876_v23, %v568_v21 }
 0x1cd   : > { %v1629_v27 = vpop.f32.mrf.mxu0  ;;  %v1878_v29 = vpop.f32.mrf.mxu1 }
 0x1ce   : > { %2078 = vst [vmem:[%s4186_s3 + $0xb0] sm:$0xff] %v2024_v26  ;;  %v1879_v30 = vadd.f32 %v1878_v29, %v1629_v27  ;;  %v578_v27 = vld [vmem:[%s4186_s3 + $0x100] sm:$0xff] }
 0x1cf   : > { %v1631_v31 = vpop.f32.mrf.mxu0  ;;  %v1880_v32 = vpop.f32.mrf.mxu1 }
 0x1d0   : > { %v2025_v33 = vadd.f32 %v1879_v30, %v569_v28 }
 0x1d1   : > { %v1634_v34 = vpop.f32.mrf.mxu0  ;;  %v1883_v36 = vpop.f32.mrf.mxu1 }
 0x1d2   : > { %2079 = vst [vmem:[%s4186_s3 + $0xb8] sm:$0xff] %v2025_v33  ;;  %v1884_v37 = vadd.f32 %v1883_v36, %v1634_v34  ;;  %v579_v34 = vld [vmem:[%s4186_s3 + $0x108] sm:$0xff] }
 0x1d3   : > { %v1636_v38 = vpop.f32.mrf.mxu0  ;;  %v1885_v39 = vpop.f32.mrf.mxu1 }
 0x1d4   : > { %v2026_v40 = vadd.f32 %v1884_v37, %v570_v35 }
 0x1d5   : > { %v1637_v41 = vpop.f32.mrf.mxu0  ;;  %v1886_v43 = vpop.f32.mrf.mxu1 }
 0x1d6   : > { %2080 = vst [vmem:[%s4186_s3 + $0xc0] sm:$0xff] %v2026_v40  ;;  %v1887_v44 = vadd.f32 %v1886_v43, %v1637_v41  ;;  %v580_v41 = vld [vmem:[%s4186_s3 + $0x110] sm:$0xff] }
 0x1d7   : > { %v1639_v45 = vpop.f32.mrf.mxu0  ;;  %v1888_v46 = vpop.f32.mrf.mxu1 }
 0x1d8   : > { %v2027_v47 = vadd.f32 %v1887_v44, %v571_v42 }
 0x1d9   : > { %v1642_v48 = vpop.f32.mrf.mxu0  ;;  %v1891_v50 = vpop.f32.mrf.mxu1 }
 0x1da   : > { %2081 = vst [vmem:[%s4186_s3 + $0xc8] sm:$0xff] %v2027_v47  ;;  %v1892_v51 = vadd.f32 %v1891_v50, %v1642_v48  ;;  %v581_v48 = vld [vmem:[%s4186_s3 + $0x118] sm:$0xff] }
 0x1db   : > { %v1644_v52 = vpop.f32.mrf.mxu0  ;;  %v1893_v53 = vpop.f32.mrf.mxu1 }
 0x1dc   : > { %v2028_v54 = vadd.f32 %v1892_v51, %v572_v49 }
 0x1dd   : > { %v1645_v55 = vpop.f32.mrf.mxu0  ;;  %v1894_v57 = vpop.f32.mrf.mxu1 }
 0x1de   : > { %2082 = vst [vmem:[%s4186_s3 + $0xd0] sm:$0xff] %v2028_v54  ;;  %v1895_v58 = vadd.f32 %v1894_v57, %v1645_v55  ;;  %v582_v55 = vld [vmem:[%s4186_s3 + $0x120] sm:$0xff] }
 0x1df   : > { %v1647_v59 = vpop.f32.mrf.mxu0  ;;  %v1896_v60 = vpop.f32.mrf.mxu1 }
 0x1e0   : > { %v2029_v61 = vadd.f32 %v1895_v58, %v573_v56 }
 0x1e1   : > { %v1650_v62 = vpop.f32.mrf.mxu0  ;;  %v1899_v0 = vpop.f32.mrf.mxu1 }
 0x1e2   : > { %2083 = vst [vmem:[%s4186_s3 + $0xd8] sm:$0xff] %v2029_v61  ;;  %v1900_v1 = vadd.f32 %v1899_v0, %v1650_v62  ;;  %v583_v62 = vld [vmem:[%s4186_s3 + $0x128] sm:$0xff] }
 0x1e3   : > { %v1652_v2 = vpop.f32.mrf.mxu0  ;;  %v1901_v3 = vpop.f32.mrf.mxu1 }
 0x1e4   : > { %v2030_v4 = vadd.f32 %v1900_v1, %v574_v63 }
 0x1e5   : > { %v1653_v5 = vpop.f32.mrf.mxu0  ;;  %v1902_v7 = vpop.f32.mrf.mxu1 }
 0x1e6   : > { %2084 = vst [vmem:[%s4186_s3 + $0xe0] sm:$0xff] %v2030_v4  ;;  %v1903_v8 = vadd.f32 %v1902_v7, %v1653_v5  ;;  %v584_v5 = vld [vmem:[%s4186_s3 + $0x130] sm:$0xff] }
 0x1e7   : > { %v1655_v9 = vpop.f32.mrf.mxu0  ;;  %v1904_v10 = vpop.f32.mrf.mxu1 }
 0x1e8   : > { %v2031_v11 = vadd.f32 %v1903_v8, %v575_v6 }
 0x1e9   : > { %v1658_v12 = vpop.f32.mrf.mxu0  ;;  %v1907_v14 = vpop.f32.mrf.mxu1 }
 0x1ea   : > { %2085 = vst [vmem:[%s4186_s3 + $0xe8] sm:$0xff] %v2031_v11  ;;  %v1908_v15 = vadd.f32 %v1907_v14, %v1658_v12  ;;  %v585_v12 = vld [vmem:[%s4186_s3 + $0x138] sm:$0xff] }
 0x1eb   : > { %v1660_v16 = vpop.f32.mrf.mxu0  ;;  %v1909_v17 = vpop.f32.mrf.mxu1 }
 0x1ec   : > { %v2032_v18 = vadd.f32 %v1908_v15, %v576_v13 }
 0x1ed   : > { %v1661_v19 = vpop.f32.mrf.mxu0  ;;  %v1910_v21 = vpop.f32.mrf.mxu1 }
 0x1ee   : > { %2086 = vst [vmem:[%s4186_s3 + $0xf0] sm:$0xff] %v2032_v18  ;;  %v1911_v22 = vadd.f32 %v1910_v21, %v1661_v19  ;;  %v586_v19 = vld [vmem:[%s4186_s3 + $0x140] sm:$0xff] }
 0x1ef   : > { %v1663_v23 = vpop.f32.mrf.mxu0  ;;  %v1912_v24 = vpop.f32.mrf.mxu1 }
 0x1f0   : > { %v2033_v25 = vadd.f32 %v1911_v22, %v577_v20 }
 0x1f1   : > { %v1666_v26 = vpop.f32.mrf.mxu0  ;;  %v1915_v28 = vpop.f32.mrf.mxu1 }
 0x1f2   : > { %2087 = vst [vmem:[%s4186_s3 + $0xf8] sm:$0xff] %v2033_v25  ;;  %v1916_v29 = vadd.f32 %v1915_v28, %v1666_v26  ;;  %v587_v26 = vld [vmem:[%s4186_s3 + $0x148] sm:$0xff] }
 0x1f3   : > { %v1668_v30 = vpop.f32.mrf.mxu0  ;;  %v1917_v31 = vpop.f32.mrf.mxu1 }
 0x1f4   : > { %v2034_v32 = vadd.f32 %v1916_v29, %v578_v27 }
 0x1f5   : > { %v1669_v33 = vpop.f32.mrf.mxu0  ;;  %v1918_v35 = vpop.f32.mrf.mxu1 }
 0x1f6   : > { %2088 = vst [vmem:[%s4186_s3 + $0x100] sm:$0xff] %v2034_v32  ;;  %v1919_v36 = vadd.f32 %v1918_v35, %v1669_v33  ;;  %v588_v33 = vld [vmem:[%s4186_s3 + $0x150] sm:$0xff] }
 0x1f7   : > { %v1671_v37 = vpop.f32.mrf.mxu0  ;;  %v1920_v38 = vpop.f32.mrf.mxu1 }
 0x1f8   : > { %v2035_v39 = vadd.f32 %v1919_v36, %v579_v34 }
 0x1f9   : > { %v1674_v40 = vpop.f32.mrf.mxu0  ;;  %v1923_v42 = vpop.f32.mrf.mxu1 }
 0x1fa   : > { %2089 = vst [vmem:[%s4186_s3 + $0x108] sm:$0xff] %v2035_v39  ;;  %v1924_v43 = vadd.f32 %v1923_v42, %v1674_v40  ;;  %v589_v40 = vld [vmem:[%s4186_s3 + $0x158] sm:$0xff] }
 0x1fb   : > { %v1676_v44 = vpop.f32.mrf.mxu0  ;;  %v1925_v45 = vpop.f32.mrf.mxu1 }
 0x1fc   : > { %v2036_v46 = vadd.f32 %v1924_v43, %v580_v41 }
 0x1fd   : > { %v1677_v47 = vpop.f32.mrf.mxu0  ;;  %v1926_v49 = vpop.f32.mrf.mxu1 }
 0x1fe   : > { %2090 = vst [vmem:[%s4186_s3 + $0x110] sm:$0xff] %v2036_v46  ;;  %v1927_v50 = vadd.f32 %v1926_v49, %v1677_v47  ;;  %v590_v47 = vld [vmem:[%s4186_s3 + $0x160] sm:$0xff] }
 0x1ff   : > { %v1679_v51 = vpop.f32.mrf.mxu0  ;;  %v1928_v52 = vpop.f32.mrf.mxu1 }
 0x200   : > { %v2037_v53 = vadd.f32 %v1927_v50, %v581_v48 }
 0x201   : > { %v1682_v54 = vpop.f32.mrf.mxu0  ;;  %v1931_v56 = vpop.f32.mrf.mxu1 }
 0x202   : > { %2091 = vst [vmem:[%s4186_s3 + $0x118] sm:$0xff] %v2037_v53  ;;  %v1932_v57 = vadd.f32 %v1931_v56, %v1682_v54  ;;  %v591_v54 = vld [vmem:[%s4186_s3 + $0x168] sm:$0xff] }
 0x203   : > { %v1684_v58 = vpop.f32.mrf.mxu0  ;;  %v1933_v59 = vpop.f32.mrf.mxu1 }
 0x204   : > { %v2038_v60 = vadd.f32 %v1932_v57, %v582_v55 }
 0x205   : > { %v1685_v61 = vpop.f32.mrf.mxu0  ;;  %v1934_v63 = vpop.f32.mrf.mxu1 }
 0x206   : > { %2092 = vst [vmem:[%s4186_s3 + $0x120] sm:$0xff] %v2038_v60  ;;  %v1935_v0 = vadd.f32 %v1934_v63, %v1685_v61  ;;  %v592_v61 = vld [vmem:[%s4186_s3 + $0x170] sm:$0xff] }
 0x207   : > { %v1687_v1 = vpop.f32.mrf.mxu0  ;;  %v1936_v2 = vpop.f32.mrf.mxu1 }
 0x208   : > { %v2039_v3 = vadd.f32 %v1935_v0, %v583_v62 }
 0x209   : > { %v1690_v4 = vpop.f32.mrf.mxu0  ;;  %v1939_v6 = vpop.f32.mrf.mxu1 }
 0x20a   : > { %2093 = vst [vmem:[%s4186_s3 + $0x128] sm:$0xff] %v2039_v3  ;;  %v1940_v7 = vadd.f32 %v1939_v6, %v1690_v4  ;;  %v593_v4 = vld [vmem:[%s4186_s3 + $0x178] sm:$0xff] }
 0x20b   : > { %v1692_v8 = vpop.f32.mrf.mxu0  ;;  %v1941_v9 = vpop.f32.mrf.mxu1 }
 0x20c   : > { %v2040_v10 = vadd.f32 %v1940_v7, %v584_v5 }
 0x20d   : > { %v1693_v11 = vpop.f32.mrf.mxu0  ;;  %v1942_v13 = vpop.f32.mrf.mxu1 }
 0x20e   : > { %2094 = vst [vmem:[%s4186_s3 + $0x130] sm:$0xff] %v2040_v10  ;;  %v1943_v14 = vadd.f32 %v1942_v13, %v1693_v11  ;;  %v594_v11 = vld [vmem:[%s4186_s3 + $0x180] sm:$0xff] }
 0x20f   : > { %v1695_v15 = vpop.f32.mrf.mxu0  ;;  %v1944_v16 = vpop.f32.mrf.mxu1 }
 0x210   : > { %v2041_v17 = vadd.f32 %v1943_v14, %v585_v12 }
 0x211   : > { %v1698_v18 = vpop.f32.mrf.mxu0  ;;  %v1947_v20 = vpop.f32.mrf.mxu1 }
 0x212   : > { %2095 = vst [vmem:[%s4186_s3 + $0x138] sm:$0xff] %v2041_v17  ;;  %v1948_v21 = vadd.f32 %v1947_v20, %v1698_v18  ;;  %v595_v18 = vld [vmem:[%s4186_s3 + $0x188] sm:$0xff] }
 0x213   : > { %v1700_v22 = vpop.f32.mrf.mxu0  ;;  %v1949_v23 = vpop.f32.mrf.mxu1 }
 0x214   : > { %v2042_v24 = vadd.f32 %v1948_v21, %v586_v19 }
 0x215   : > { %v1701_v25 = vpop.f32.mrf.mxu0  ;;  %v1950_v27 = vpop.f32.mrf.mxu1 }
 0x216   : > { %2096 = vst [vmem:[%s4186_s3 + $0x140] sm:$0xff] %v2042_v24  ;;  %v1951_v28 = vadd.f32 %v1950_v27, %v1701_v25  ;;  %v596_v25 = vld [vmem:[%s4186_s3 + $0x190] sm:$0xff] }
 0x217   : > { %v1703_v29 = vpop.f32.mrf.mxu0  ;;  %v1952_v30 = vpop.f32.mrf.mxu1 }
 0x218   : > { %v2043_v31 = vadd.f32 %v1951_v28, %v587_v26 }
 0x219   : > { %v1706_v32 = vpop.f32.mrf.mxu0  ;;  %v1955_v34 = vpop.f32.mrf.mxu1 }
 0x21a   : > { %2097 = vst [vmem:[%s4186_s3 + $0x148] sm:$0xff] %v2043_v31  ;;  %v1956_v35 = vadd.f32 %v1955_v34, %v1706_v32  ;;  %v597_v32 = vld [vmem:[%s4186_s3 + $0x198] sm:$0xff] }
 0x21b   : > { %v1708_v36 = vpop.f32.mrf.mxu0  ;;  %v1957_v37 = vpop.f32.mrf.mxu1 }
 0x21c   : > { %v2044_v38 = vadd.f32 %v1956_v35, %v588_v33 }
 0x21d   : > { %v1709_v39 = vpop.f32.mrf.mxu0  ;;  %v1958_v41 = vpop.f32.mrf.mxu1 }
 0x21e   : > { %2098 = vst [vmem:[%s4186_s3 + $0x150] sm:$0xff] %v2044_v38  ;;  %v1959_v42 = vadd.f32 %v1958_v41, %v1709_v39  ;;  %v598_v39 = vld [vmem:[%s4186_s3 + $0x1a0] sm:$0xff] }
 0x21f   : > { %v1711_v43 = vpop.f32.mrf.mxu0  ;;  %v1960_v44 = vpop.f32.mrf.mxu1 }
 0x220   : > { %v2045_v45 = vadd.f32 %v1959_v42, %v589_v40 }
 0x221   : > { %v1714_v46 = vpop.f32.mrf.mxu0  ;;  %v1963_v48 = vpop.f32.mrf.mxu1 }
 0x222   : > { %2099 = vst [vmem:[%s4186_s3 + $0x158] sm:$0xff] %v2045_v45  ;;  %v1964_v49 = vadd.f32 %v1963_v48, %v1714_v46  ;;  %v599_v46 = vld [vmem:[%s4186_s3 + $0x1a8] sm:$0xff] }
 0x223   : > { %v1716_v50 = vpop.f32.mrf.mxu0  ;;  %v1965_v51 = vpop.f32.mrf.mxu1 }
 0x224   : > { %v2046_v52 = vadd.f32 %v1964_v49, %v590_v47 }
 0x225   : > { %v1717_v53 = vpop.f32.mrf.mxu0  ;;  %v1966_v55 = vpop.f32.mrf.mxu1 }
 0x226   : > { %2100 = vst [vmem:[%s4186_s3 + $0x160] sm:$0xff] %v2046_v52  ;;  %v1967_v56 = vadd.f32 %v1966_v55, %v1717_v53 }
 0x227   : > { %v1719_v57 = vpop.f32.mrf.mxu0  ;;  %v1968_v58 = vpop.f32.mrf.mxu1 }
 0x228   : > { %v2047_v59 = vadd.f32 %v1967_v56, %v591_v54 }
 0x229   : > { %v1722_v60 = vpop.f32.mrf.mxu0  ;;  %v1971_v62 = vpop.f32.mrf.mxu1 }
 0x22a   : > { %2101 = vst [vmem:[%s4186_s3 + $0x168] sm:$0xff] %v2047_v59  ;;  %v1972_v63 = vadd.f32 %v1971_v62, %v1722_v60 }
 0x22b   : > { %v1724_v0 = vpop.f32.mrf.mxu0  ;;  %v1973_v1 = vpop.f32.mrf.mxu1 }
 0x22c   : > { %v2048_v2 = vadd.f32 %v1972_v63, %v592_v61 }
 0x22d   : > { %v1725_v3 = vpop.f32.mrf.mxu0  ;;  %v1974_v5 = vpop.f32.mrf.mxu1 }
 0x22e   : > { %2102 = vst [vmem:[%s4186_s3 + $0x170] sm:$0xff] %v2048_v2  ;;  %v1975_v6 = vadd.f32 %v1974_v5, %v1725_v3 }
 0x22f   : > { %v1727_v7 = vpop.f32.mrf.mxu0  ;;  %v1976_v8 = vpop.f32.mrf.mxu1 }
 0x230   : > { %v2049_v9 = vadd.f32 %v1975_v6, %v593_v4 }
 0x231   : > { %v1730_v10 = vpop.f32.mrf.mxu0  ;;  %v1979_v12 = vpop.f32.mrf.mxu1 }
 0x232   : > { %2103 = vst [vmem:[%s4186_s3 + $0x178] sm:$0xff] %v2049_v9  ;;  %v1980_v13 = vadd.f32 %v1979_v12, %v1730_v10 }
 0x233   : > { %v1732_v14 = vpop.f32.mrf.mxu0  ;;  %v1981_v15 = vpop.f32.mrf.mxu1 }
 0x234   : > { %v2050_v16 = vadd.f32 %v1980_v13, %v594_v11 }
 0x235   : > { %v1733_v17 = vpop.f32.mrf.mxu0  ;;  %v1982_v19 = vpop.f32.mrf.mxu1 }
 0x236   : > { %2104 = vst [vmem:[%s4186_s3 + $0x180] sm:$0xff] %v2050_v16  ;;  %v1983_v20 = vadd.f32 %v1982_v19, %v1733_v17 }
 0x237   : > { %v1735_v21 = vpop.f32.mrf.mxu0  ;;  %v1984_v22 = vpop.f32.mrf.mxu1 }
 0x238   : > { %v2051_v23 = vadd.f32 %v1983_v20, %v595_v18 }
 0x239   : > { %v1738_v24 = vpop.f32.mrf.mxu0  ;;  %v1987_v26 = vpop.f32.mrf.mxu1 }
 0x23a   : > { %2105 = vst [vmem:[%s4186_s3 + $0x188] sm:$0xff] %v2051_v23  ;;  %v1988_v27 = vadd.f32 %v1987_v26, %v1738_v24 }
 0x23b   : > { %v1740_v28 = vpop.f32.mrf.mxu0  ;;  %v1989_v29 = vpop.f32.mrf.mxu1 }
 0x23c   : > { %v2052_v30 = vadd.f32 %v1988_v27, %v596_v25 }
 0x23d   : > { %v1741_v31 = vpop.f32.mrf.mxu0  ;;  %v1990_v33 = vpop.f32.mrf.mxu1 }
 0x23e   : > { %2106 = vst [vmem:[%s4186_s3 + $0x190] sm:$0xff] %v2052_v30  ;;  %v1991_v34 = vadd.f32 %v1990_v33, %v1741_v31 }
 0x23f   : > { %v1743_v35 = vpop.f32.mrf.mxu0  ;;  %v1992_v36 = vpop.f32.mrf.mxu1 }
 0x240   : > { %v2053_v37 = vadd.f32 %v1991_v34, %v597_v32 }
 0x241   : > { %v1746_v38 = vpop.f32.mrf.mxu0  ;;  %v1995_v40 = vpop.f32.mrf.mxu1 }
 0x242   : > { %2107 = vst [vmem:[%s4186_s3 + $0x198] sm:$0xff] %v2053_v37  ;;  %v1996_v41 = vadd.f32 %v1995_v40, %v1746_v38 }
 0x243   : > { %v1748_v42 = vpop.f32.mrf.mxu0  ;;  %v1997_v43 = vpop.f32.mrf.mxu1 }
 0x244   : > { %v2054_v44 = vadd.f32 %v1996_v41, %v598_v39 }
 0x245   : > { %v1749_v45 = vpop.f32.mrf.mxu0  ;;  %v1998_v47 = vpop.f32.mrf.mxu1 }
 0x246   : > { %2108 = vst [vmem:[%s4186_s3 + $0x1a0] sm:$0xff] %v2054_v44  ;;  %v1999_v48 = vadd.f32 %v1998_v47, %v1749_v45  ;;  %2113 = sbr.rel (%p2544_p11) target bundleno = 618 (0x26a), region = 63 }
 0x247   : > { %v1751_v49 = vpop.f32.mrf.mxu0  ;;  %v2000_v50 = vpop.f32.mrf.mxu1 }
 0x248   : > { %v2055_v51 = vadd.f32 %v1999_v48, %v599_v46 }
 0x24a   : > { %2109 = vst [vmem:[%s4186_s3 + $0x1a8] sm:$0xff] %v2055_v51 }
 0x24b   : > { %v2114_v52 = vld [vmem:[%s4186_s3] sm:$0xff]  ;;  %v2115_v54 = vld [vmem:[%s4186_s3 + $0x8] sm:$0xff]  ;;  %v2116_v57 = vld [vmem:[%s4186_s3 + $0x10] sm:$0xff] }
 0x24c   : > { %v3791_v53 = vld [vmem:[%s4185_s2] ss:$0 sm:$0xff]  ;;  %v2117_v58 = vld [vmem:[%s4186_s3 + $0x18] sm:$0xff]  ;;  %v2119_v63 = vld [vmem:[%s4186_s3 + $0x28] sm:$0xff] }
 0x24d   : > { %v2175_v55 = vadd.f32 %v3791_v53, %v2114_v52  ;;  %v2176_v56 = vadd.f32 %v3791_v53, %v2115_v54  ;;  %v2118_v59 = vld [vmem:[%s4186_s3 + $0x20] sm:$0xff]  ;;  %v2177_v60 = vadd.f32 %v3791_v53, %v2116_v57  ;;  %v2178_v61 = vadd.f32 %v3791_v53, %v2117_v58  ;;  %v2120_v0 = vld [vmem:[%s4186_s3 + $0x30] sm:$0xff]  ;;  %v2121_v1 = vld [vmem:[%s4186_s3 + $0x38] sm:$0xff] }
 0x24e   : > { %v2179_v62 = vadd.f32 %v3791_v53, %v2118_v59  ;;  %v2180_v2 = vadd.f32 %v3791_v53, %v2119_v63  ;;  %v2181_v3 = vadd.f32 %v3791_v53, %v2120_v0  ;;  %v2182_v4 = vadd.f32 %v3791_v53, %v2121_v1  ;;  %v2122_v5 = vld [vmem:[%s4186_s3 + $0x40] sm:$0xff]  ;;  %v2123_v6 = vld [vmem:[%s4186_s3 + $0x48] sm:$0xff]  ;;  %v2124_v7 = vld [vmem:[%s4186_s3 + $0x50] sm:$0xff] }
 0x24f   : > { %2229 = vst [vmem:[%s4186_s3] sm:$0xff] %v2175_v55  ;;  %2230 = vst [vmem:[%s4186_s3 + $0x8] sm:$0xff] %v2176_v56  ;;  %v2183_v8 = vadd.f32 %v3791_v53, %v2122_v5  ;;  %v2184_v9 = vadd.f32 %v3791_v53, %v2123_v6  ;;  %v2185_v10 = vadd.f32 %v3791_v53, %v2124_v7  ;;  %v2125_v11 = vld [vmem:[%s4186_s3 + $0x58] sm:$0xff]  ;;  %v2126_v12 = vld [vmem:[%s4186_s3 + $0x60] sm:$0xff] }
 0x250   : > { %2231 = vst [vmem:[%s4186_s3 + $0x10] sm:$0xff] %v2177_v60  ;;  %2232 = vst [vmem:[%s4186_s3 + $0x18] sm:$0xff] %v2178_v61  ;;  %v2127_v13 = vld [vmem:[%s4186_s3 + $0x68] sm:$0xff]  ;;  %v2186_v14 = vadd.f32 %v3791_v53, %v2125_v11  ;;  %v2187_v15 = vadd.f32 %v3791_v53, %v2126_v12  ;;  %v2128_v17 = vld [vmem:[%s4186_s3 + $0x70] sm:$0xff] }
 0x251   : > { %2233 = vst [vmem:[%s4186_s3 + $0x20] sm:$0xff] %v2179_v62  ;;  %2234 = vst [vmem:[%s4186_s3 + $0x28] sm:$0xff] %v2180_v2  ;;  %v2188_v16 = vadd.f32 %v3791_v53, %v2127_v13  ;;  %v2129_v18 = vld [vmem:[%s4186_s3 + $0x78] sm:$0xff]  ;;  %v2130_v19 = vld [vmem:[%s4186_s3 + $0x80] sm:$0xff]  ;;  %v2189_v20 = vadd.f32 %v3791_v53, %v2128_v17 }
 0x252   : > { %2235 = vst [vmem:[%s4186_s3 + $0x30] sm:$0xff] %v2181_v3  ;;  %2236 = vst [vmem:[%s4186_s3 + $0x38] sm:$0xff] %v2182_v4  ;;  %v2190_v21 = vadd.f32 %v3791_v53, %v2129_v18  ;;  %v2191_v22 = vadd.f32 %v3791_v53, %v2130_v19  ;;  %v2131_v23 = vld [vmem:[%s4186_s3 + $0x88] sm:$0xff]  ;;  %v2132_v24 = vld [vmem:[%s4186_s3 + $0x90] sm:$0xff] }
 0x253   : > { %2237 = vst [vmem:[%s4186_s3 + $0x40] sm:$0xff] %v2183_v8  ;;  %2238 = vst [vmem:[%s4186_s3 + $0x48] sm:$0xff] %v2184_v9  ;;  %v2133_v25 = vld [vmem:[%s4186_s3 + $0x98] sm:$0xff]  ;;  %v2192_v26 = vadd.f32 %v3791_v53, %v2131_v23  ;;  %v2193_v27 = vadd.f32 %v3791_v53, %v2132_v24  ;;  %v2134_v29 = vld [vmem:[%s4186_s3 + $0xa0] sm:$0xff] }
 0x254   : > { %2239 = vst [vmem:[%s4186_s3 + $0x50] sm:$0xff] %v2185_v10  ;;  %2240 = vst [vmem:[%s4186_s3 + $0x58] sm:$0xff] %v2186_v14  ;;  %v2194_v28 = vadd.f32 %v3791_v53, %v2133_v25  ;;  %v2135_v30 = vld [vmem:[%s4186_s3 + $0xa8] sm:$0xff]  ;;  %v2136_v31 = vld [vmem:[%s4186_s3 + $0xb0] sm:$0xff]  ;;  %v2195_v32 = vadd.f32 %v3791_v53, %v2134_v29 }
 0x255   : > { %2241 = vst [vmem:[%s4186_s3 + $0x60] sm:$0xff] %v2187_v15  ;;  %2242 = vst [vmem:[%s4186_s3 + $0x68] sm:$0xff] %v2188_v16  ;;  %v2196_v33 = vadd.f32 %v3791_v53, %v2135_v30  ;;  %v2197_v34 = vadd.f32 %v3791_v53, %v2136_v31  ;;  %v2137_v35 = vld [vmem:[%s4186_s3 + $0xb8] sm:$0xff]  ;;  %v2138_v36 = vld [vmem:[%s4186_s3 + $0xc0] sm:$0xff] }
 0x256   : > { %2243 = vst [vmem:[%s4186_s3 + $0x70] sm:$0xff] %v2189_v20  ;;  %2244 = vst [vmem:[%s4186_s3 + $0x78] sm:$0xff] %v2190_v21  ;;  %v2139_v37 = vld [vmem:[%s4186_s3 + $0xc8] sm:$0xff]  ;;  %v2198_v38 = vadd.f32 %v3791_v53, %v2137_v35  ;;  %v2199_v39 = vadd.f32 %v3791_v53, %v2138_v36  ;;  %v2140_v41 = vld [vmem:[%s4186_s3 + $0xd0] sm:$0xff] }
 0x257   : > { %2245 = vst [vmem:[%s4186_s3 + $0x80] sm:$0xff] %v2191_v22  ;;  %2246 = vst [vmem:[%s4186_s3 + $0x88] sm:$0xff] %v2192_v26  ;;  %v2200_v40 = vadd.f32 %v3791_v53, %v2139_v37  ;;  %v2141_v42 = vld [vmem:[%s4186_s3 + $0xd8] sm:$0xff]  ;;  %v2142_v43 = vld [vmem:[%s4186_s3 + $0xe0] sm:$0xff]  ;;  %v2201_v44 = vadd.f32 %v3791_v53, %v2140_v41 }
 0x258   : > { %2247 = vst [vmem:[%s4186_s3 + $0x90] sm:$0xff] %v2193_v27  ;;  %2248 = vst [vmem:[%s4186_s3 + $0x98] sm:$0xff] %v2194_v28  ;;  %v2202_v45 = vadd.f32 %v3791_v53, %v2141_v42  ;;  %v2203_v46 = vadd.f32 %v3791_v53, %v2142_v43  ;;  %v2143_v47 = vld [vmem:[%s4186_s3 + $0xe8] sm:$0xff]  ;;  %v2144_v48 = vld [vmem:[%s4186_s3 + $0xf0] sm:$0xff] }
 0x259   : > { %2249 = vst [vmem:[%s4186_s3 + $0xa0] sm:$0xff] %v2195_v32  ;;  %2250 = vst [vmem:[%s4186_s3 + $0xa8] sm:$0xff] %v2196_v33  ;;  %v2145_v49 = vld [vmem:[%s4186_s3 + $0xf8] sm:$0xff]  ;;  %v2204_v50 = vadd.f32 %v3791_v53, %v2143_v47  ;;  %v2205_v51 = vadd.f32 %v3791_v53, %v2144_v48  ;;  %v2146_v54 = vld [vmem:[%s4186_s3 + $0x100] sm:$0xff] }
 0x25a   : > { %2251 = vst [vmem:[%s4186_s3 + $0xb0] sm:$0xff] %v2197_v34  ;;  %2252 = vst [vmem:[%s4186_s3 + $0xb8] sm:$0xff] %v2198_v38  ;;  %v2206_v52 = vadd.f32 %v3791_v53, %v2145_v49  ;;  %v2147_v55 = vld [vmem:[%s4186_s3 + $0x108] sm:$0xff]  ;;  %v2148_v56 = vld [vmem:[%s4186_s3 + $0x110] sm:$0xff]  ;;  %v2207_v57 = vadd.f32 %v3791_v53, %v2146_v54 }
 0x25b   : > { %2253 = vst [vmem:[%s4186_s3 + $0xc0] sm:$0xff] %v2199_v39  ;;  %2254 = vst [vmem:[%s4186_s3 + $0xc8] sm:$0xff] %v2200_v40  ;;  %v2208_v58 = vadd.f32 %v3791_v53, %v2147_v55  ;;  %v2209_v59 = vadd.f32 %v3791_v53, %v2148_v56  ;;  %v2149_v60 = vld [vmem:[%s4186_s3 + $0x118] sm:$0xff]  ;;  %v2150_v61 = vld [vmem:[%s4186_s3 + $0x120] sm:$0xff] }
 0x25c   : > { %2255 = vst [vmem:[%s4186_s3 + $0xd0] sm:$0xff] %v2201_v44  ;;  %2256 = vst [vmem:[%s4186_s3 + $0xd8] sm:$0xff] %v2202_v45  ;;  %v2151_v62 = vld [vmem:[%s4186_s3 + $0x128] sm:$0xff]  ;;  %v2210_v63 = vadd.f32 %v3791_v53, %v2149_v60  ;;  %v2211_v0 = vadd.f32 %v3791_v53, %v2150_v61  ;;  %v2152_v2 = vld [vmem:[%s4186_s3 + $0x130] sm:$0xff] }
 0x25d   : > { %2257 = vst [vmem:[%s4186_s3 + $0xe0] sm:$0xff] %v2203_v46  ;;  %2258 = vst [vmem:[%s4186_s3 + $0xe8] sm:$0xff] %v2204_v50  ;;  %v2212_v1 = vadd.f32 %v3791_v53, %v2151_v62  ;;  %v2153_v3 = vld [vmem:[%s4186_s3 + $0x138] sm:$0xff]  ;;  %v2154_v4 = vld [vmem:[%s4186_s3 + $0x140] sm:$0xff]  ;;  %v2213_v5 = vadd.f32 %v3791_v53, %v2152_v2 }
 0x25e   : > { %2259 = vst [vmem:[%s4186_s3 + $0xf0] sm:$0xff] %v2205_v51  ;;  %2260 = vst [vmem:[%s4186_s3 + $0xf8] sm:$0xff] %v2206_v52  ;;  %v2214_v6 = vadd.f32 %v3791_v53, %v2153_v3  ;;  %v2215_v7 = vadd.f32 %v3791_v53, %v2154_v4  ;;  %v2155_v8 = vld [vmem:[%s4186_s3 + $0x148] sm:$0xff]  ;;  %v2156_v9 = vld [vmem:[%s4186_s3 + $0x150] sm:$0xff] }
 0x25f   : > { %2261 = vst [vmem:[%s4186_s3 + $0x100] sm:$0xff] %v2207_v57  ;;  %2262 = vst [vmem:[%s4186_s3 + $0x108] sm:$0xff] %v2208_v58  ;;  %v2157_v10 = vld [vmem:[%s4186_s3 + $0x158] sm:$0xff]  ;;  %v2216_v11 = vadd.f32 %v3791_v53, %v2155_v8  ;;  %v2217_v12 = vadd.f32 %v3791_v53, %v2156_v9  ;;  %v2158_v14 = vld [vmem:[%s4186_s3 + $0x160] sm:$0xff] }
 0x260   : > { %2263 = vst [vmem:[%s4186_s3 + $0x110] sm:$0xff] %v2209_v59  ;;  %2264 = vst [vmem:[%s4186_s3 + $0x118] sm:$0xff] %v2210_v63  ;;  %v2218_v13 = vadd.f32 %v3791_v53, %v2157_v10  ;;  %v2159_v15 = vld [vmem:[%s4186_s3 + $0x168] sm:$0xff]  ;;  %v2160_v16 = vld [vmem:[%s4186_s3 + $0x170] sm:$0xff]  ;;  %v2219_v17 = vadd.f32 %v3791_v53, %v2158_v14 }
 0x261   : > { %2265 = vst [vmem:[%s4186_s3 + $0x120] sm:$0xff] %v2211_v0  ;;  %2266 = vst [vmem:[%s4186_s3 + $0x128] sm:$0xff] %v2212_v1  ;;  %v2220_v18 = vadd.f32 %v3791_v53, %v2159_v15  ;;  %v2221_v19 = vadd.f32 %v3791_v53, %v2160_v16  ;;  %v2161_v20 = vld [vmem:[%s4186_s3 + $0x178] sm:$0xff]  ;;  %v2162_v21 = vld [vmem:[%s4186_s3 + $0x180] sm:$0xff] }
 0x262   : > { %2267 = vst [vmem:[%s4186_s3 + $0x130] sm:$0xff] %v2213_v5  ;;  %2268 = vst [vmem:[%s4186_s3 + $0x138] sm:$0xff] %v2214_v6  ;;  %v2163_v22 = vld [vmem:[%s4186_s3 + $0x188] sm:$0xff]  ;;  %v2222_v23 = vadd.f32 %v3791_v53, %v2161_v20  ;;  %v2223_v24 = vadd.f32 %v3791_v53, %v2162_v21  ;;  %v2164_v26 = vld [vmem:[%s4186_s3 + $0x190] sm:$0xff] }
 0x263   : > { %2269 = vst [vmem:[%s4186_s3 + $0x140] sm:$0xff] %v2215_v7  ;;  %2270 = vst [vmem:[%s4186_s3 + $0x148] sm:$0xff] %v2216_v11  ;;  %v2224_v25 = vadd.f32 %v3791_v53, %v2163_v22  ;;  %v2165_v27 = vld [vmem:[%s4186_s3 + $0x198] sm:$0xff]  ;;  %v2166_v28 = vld [vmem:[%s4186_s3 + $0x1a0] sm:$0xff]  ;;  %v2225_v29 = vadd.f32 %v3791_v53, %v2164_v26 }
 0x264   : > { %2271 = vst [vmem:[%s4186_s3 + $0x150] sm:$0xff] %v2217_v12  ;;  %2272 = vst [vmem:[%s4186_s3 + $0x158] sm:$0xff] %v2218_v13  ;;  %v2226_v30 = vadd.f32 %v3791_v53, %v2165_v27  ;;  %v2227_v31 = vadd.f32 %v3791_v53, %v2166_v28  ;;  %v2167_v32 = vld [vmem:[%s4186_s3 + $0x1a8] sm:$0xff] }
 0x265   : > { %2273 = vst [vmem:[%s4186_s3 + $0x160] sm:$0xff] %v2219_v17  ;;  %2274 = vst [vmem:[%s4186_s3 + $0x168] sm:$0xff] %v2220_v18  ;;  %v2228_v33 = vadd.f32 %v3791_v53, %v2167_v32 }
 0x266   : > { %2275 = vst [vmem:[%s4186_s3 + $0x170] sm:$0xff] %v2221_v19  ;;  %2276 = vst [vmem:[%s4186_s3 + $0x178] sm:$0xff] %v2222_v23 }
 0x267   : > { %2277 = vst [vmem:[%s4186_s3 + $0x180] sm:$0xff] %v2223_v24  ;;  %2278 = vst [vmem:[%s4186_s3 + $0x188] sm:$0xff] %v2224_v25 }
 0x268   : > { %2279 = vst [vmem:[%s4186_s3 + $0x190] sm:$0xff] %v2225_v29  ;;  %2280 = vst [vmem:[%s4186_s3 + $0x198] sm:$0xff] %v2226_v30 }
 0x269   : > { %2281 = vst [vmem:[%s4186_s3 + $0x1a0] sm:$0xff] %v2227_v31  ;;  %2282 = vst [vmem:[%s4186_s3 + $0x1a8] sm:$0xff] %v2228_v33 }
 0x26a PF: > { %s13_s16 = sadd.s32 1, %s2827_s16   ;;  %s4187_s12 = smov %s2815_s13 }
 0x26b   : > { %p10_p12 = scmp.ge.s32.totalorder %s13_s16, 18   ;;  %s4188_s13 = smov %s2886_s20 }
 0x26c   : > { %s4189_s14 = smov %s2823_s15  ;;  %s4190_s15 = smov %s4192_s17 }
 0x26d   :  { %12 = sbr.rel (!%p10_p12) target bundleno = 3 (0x3), region = 104 }

</bundles_post_ra>
